<compile_context>
chip_gen: v7x
topology: tpu7x:2x2x1
jax: 0.10.0
libtpu: 0.0.40
codegen_flags: <defaults>
</compile_context>

<pallas_src>
import functools

import jax
import jax.numpy as jnp
from jax.experimental import pallas as pl
from jax.experimental.pallas import tpu as pltpu

EPS = 1e-3  # BatchNorm2d(eps=0.001)


def conv_bn_kernel(w_ref, x_ref, gamma_ref, beta_ref, o_ref, *, compute_dtype):
    # w_ref:     [tc, Cin]   (tile of the [Cout, Cin] weight, original dtype)
    # x_ref:     [Cin, M]    (whole activation, resident, M = N*H*W)
    # gamma_ref: [Cout, 1]   f32, resident (constant index_map, fetched once)
    # beta_ref:  [Cout, 1]   f32, resident
    # o_ref:     [tc, M]
    tc = o_ref.shape[0]
    start = pl.multiple_of(pl.program_id(0) * tc, 8)

    # In-kernel cast to the MXU compute dtype (no separate XLA cast op).
    w = w_ref[...].astype(compute_dtype)
    x = x_ref[...].astype(compute_dtype)
    y = jnp.dot(w, x, preferred_element_type=jnp.float32)        # [tc, M] f32

    # Single-pass batch statistics per output channel (reduce over lane axis).
    inv_m = 1.0 / float(y.shape[-1])
    s1 = jnp.sum(y, axis=-1, keepdims=True)                      # [tc, 1]
    s2 = jnp.sum(y * y, axis=-1, keepdims=True)                  # [tc, 1]
    mean = s1 * inv_m
    var = jnp.maximum(s2 * inv_m - mean * mean, 0.0)             # biased var (PyTorch BN)
    inv_std = jax.lax.rsqrt(var + EPS)

    gamma = gamma_ref[pl.ds(start, tc), :]                       # [tc, 1]
    beta = beta_ref[pl.ds(start, tc), :]                         # [tc, 1]
    scale = inv_std * gamma
    shift = beta - mean * scale
    o_ref[...] = (y * scale + shift).astype(o_ref.dtype)


def conv2d_1x1_batchnorm(x_nchw, weight_oihw, gamma, beta, *,
                         cout_tiles=2,
                         compute_dtype=jnp.bfloat16,
                         out_dtype=jnp.float32):
    """x_nchw: [N, Cin, H, W], weight_oihw: [Cout, Cin, 1, 1] -> [N, Cout, H, W]."""
    N, Cin, H, W = x_nchw.shape
    Cout = weight_oihw.shape[0]
    M = N * H * W

    # --- layout: keep everything in the transposed ([C, spatial]) orientation.
    # For N == 1 these reshapes are free (pure metadata); no wrapper casts.
    if N == 1:
        x_t = x_nchw.reshape(Cin, M)
    else:
        x_t = jnp.transpose(x_nchw, (1, 0, 2, 3)).reshape(Cin, M)
    w_t = weight_oihw.reshape(Cout, Cin)                  # free reshape (1x1 kernel)
    gamma2d = gamma.reshape(Cout, 1).astype(jnp.float32)  # free (trailing unit dim)
    beta2d = beta.reshape(Cout, 1).astype(jnp.float32)

    # --- Cout tiling: small "parallel" grid so a 2-TC chip (v7x) can shard the
    # independent per-channel BN work; on 1-TC chips it is just cout_tiles steps.
    if Cout % cout_tiles != 0 or (Cout // cout_tiles) % 8 != 0:
        cout_tiles = 1
    tc = Cout // cout_tiles

    itemsize = lambda a: jnp.dtype(a).itemsize
    cost = pl.CostEstimate(
        flops=2 * Cout * Cin * M + 6 * Cout * M,
        transcendentals=Cout,
        bytes_accessed=(Cout * Cin * itemsize(w_t.dtype)
                        + Cin * M * itemsize(x_t.dtype)
                        + 2 * Cout * 4
                        + Cout * M * itemsize(out_dtype)),
    )

    out_t = pl.pallas_call(
        functools.partial(conv_bn_kernel, compute_dtype=compute_dtype),
        out_shape=jax.ShapeDtypeStruct((Cout, M), out_dtype),
        grid=(cout_tiles,),
        in_specs=[
            pl.BlockSpec((tc, Cin), lambda i: (i, 0)),     # weight tile
            pl.BlockSpec((Cin, M), lambda i: (0, 0)),      # whole activation (resident)
            pl.BlockSpec((Cout, 1), lambda i: (0, 0)),     # gamma (resident, fetched once)
            pl.BlockSpec((Cout, 1), lambda i: (0, 0)),     # beta  (resident, fetched once)
        ],
        out_specs=pl.BlockSpec((tc, M), lambda i: (i, 0)),
        compiler_params=pltpu.CompilerParams(dimension_semantics=("parallel",)),
        cost_estimate=cost,
    )(w_t, x_t, gamma2d, beta2d)

    if N == 1:
        return out_t.reshape(1, Cout, H, W)                # free reshape back to NCHW
    return jnp.transpose(out_t.reshape(Cout, N, H, W), (1, 0, 2, 3))


def _reference(x_nchw, weight_oihw, gamma, beta, *, cast_bf16):
    """Pure-JAX reference. cast_bf16=True matches the kernel's compute precision."""
    N, Cin, H, W = x_nchw.shape
    Cout = weight_oihw.shape[0]
    x2d = jnp.transpose(x_nchw, (0, 2, 3, 1)).reshape(-1, Cin)
    w2d = weight_oihw.reshape(Cout, Cin).T
    if cast_bf16:
        x2d = x2d.astype(jnp.bfloat16)
        w2d = w2d.astype(jnp.bfloat16)
    y = jnp.dot(x2d, w2d, preferred_element_type=jnp.float32)
    mean = jnp.mean(y, axis=0, keepdims=True)
    var = jnp.var(y, axis=0, keepdims=True)  # biased, like PyTorch BN normalization
    yn = (y - mean) / jnp.sqrt(var + EPS) * gamma[None, :] + beta[None, :]
    return jnp.transpose(yn.reshape(N, H, W, Cout), (0, 3, 1, 2))


if __name__ == "__main__":
    key = jax.random.PRNGKey(0)
    k_x, k_w, k_g, k_b = jax.random.split(key, 4)

    # Shapes implied by the module: Conv2d(224 -> 1344, 1x1), input [1, 224, 14, 14].
    N, Cin, H, W, Cout = 1, 224, 14, 14, 1344
    x = jax.random.normal(k_x, (N, Cin, H, W), dtype=jnp.float32)
    weight = jax.random.normal(k_w, (Cout, Cin, 1, 1), dtype=jnp.float32) * 0.05
    gamma = 1.0 + 0.1 * jax.random.normal(k_g, (Cout,), dtype=jnp.float32)
    beta = 0.1 * jax.random.normal(k_b, (Cout,), dtype=jnp.float32)

    out = conv2d_1x1_batchnorm(x, weight, gamma, beta)
    out = jax.block_until_ready(out)
    assert out.shape == (N, Cout, H, W)
    assert out.dtype == jnp.float32

    # Tight check against a reference at matched (bf16-compute / f32-accum) precision.
    ref_bf16 = _reference(x, weight, gamma, beta, cast_bf16=True)
    assert jnp.allclose(out, ref_bf16, atol=2e-3, rtol=2e-3), float(
        jnp.max(jnp.abs(out - ref_bf16)))

    # Loose semantic check against the full-f32 math of the PyTorch module.
    ref_f32 = _reference(x, weight, gamma, beta, cast_bf16=False)
    assert jnp.allclose(out, ref_f32, atol=5e-2, rtol=5e-2), float(
        jnp.max(jnp.abs(out - ref_f32)))

    # Single-tile path must also be valid (v6e sweep option).
    out1 = jax.block_until_ready(
        conv2d_1x1_batchnorm(x, weight, gamma, beta, cout_tiles=1))
    assert jnp.allclose(out1, out, atol=1e-5, rtol=1e-5)

    print("KERNEL_OK")
</pallas_src>

<mosaic_0001>
module attributes {stable_mosaic.version = 11 : i64} {
  func.func @conv_bn_kernel(%arg0: i32, %arg1: memref<672x224xf32, #tpu.memory_space<vmem>>, %arg2: memref<224x196xf32, #tpu.memory_space<vmem>>, %arg3: memref<1344x1xf32, #tpu.memory_space<vmem>>, %arg4: memref<1344x1xf32, #tpu.memory_space<vmem>>, %arg5: memref<672x196xf32, #tpu.memory_space<vmem>>) attributes {dimension_semantics = [#tpu.dimension_semantics<parallel>], iteration_bounds = array<i64: 2>, scalar_prefetch = 0 : i64, scratch_operands = 0 : i64, tpu.core_type = #tpu.core_type<tc>, window_params = [{transform_indices = @transform_0, window_bounds = array<i64: 672, 224>}, {pipeline_mode = #tpu.pipeline_mode<synchronous>, transform_indices = @transform_1, window_bounds = array<i64: 224, 196>}, {pipeline_mode = #tpu.pipeline_mode<synchronous>, transform_indices = @transform_2, window_bounds = array<i64: 1344, 1>}, {pipeline_mode = #tpu.pipeline_mode<synchronous>, transform_indices = @transform_3, window_bounds = array<i64: 1344, 1>}, {transform_indices = @transform_4, window_bounds = array<i64: 672, 196>}]} {
    %c672_i32 = arith.constant 672 : i32
    %0 = arith.muli %arg0, %c672_i32 : i32
    %1 = tpu.assume_multiple %0, 8 : i32
    %c0 = arith.constant 0 : index
    %c0_0 = arith.constant 0 : index
    %2 = vector.load %arg1[%c0, %c0_0] : memref<672x224xf32, #tpu.memory_space<vmem>>, vector<672x224xf32>
    %3 = arith.truncf %2 : vector<672x224xf32> to vector<672x224xbf16>
    %c0_1 = arith.constant 0 : index
    %c0_2 = arith.constant 0 : index
    %4 = vector.load %arg2[%c0_1, %c0_2] : memref<224x196xf32, #tpu.memory_space<vmem>>, vector<224x196xf32>
    %5 = arith.truncf %4 : vector<224x196xf32> to vector<224x196xbf16>
    %cst = arith.constant dense<0.000000e+00> : vector<672x196xf32>
    %6 = tpu.matmul %3, %5, %cst {dimension_numbers = #tpu.dot_dimension_numbers<[1], [0], [0], [1], [0, 0, 1, 1], [], []>} : vector<672x224xbf16>, vector<224x196xbf16>, vector<672x196xf32> -> vector<672x196xf32>
    %cst_3 = arith.constant dense<0.000000e+00> : vector<672xf32>
    %7 = vector.multi_reduction <add>, %6, %cst_3 [1] : vector<672x196xf32> to vector<672xf32>
    %8 = vector.shape_cast %7 : vector<672xf32> to vector<672x1xf32>
    %9 = arith.mulf %6, %6 : vector<672x196xf32>
    %cst_4 = arith.constant dense<0.000000e+00> : vector<672xf32>
    %10 = vector.multi_reduction <add>, %9, %cst_4 [1] : vector<672x196xf32> to vector<672xf32>
    %11 = vector.shape_cast %10 : vector<672xf32> to vector<672x1xf32>
    %cst_5 = arith.constant 0.00510204071 : f32
    %12 = vector.broadcast %cst_5 : f32 to vector<672x1xf32>
    %13 = arith.mulf %8, %12 : vector<672x1xf32>
    %cst_6 = arith.constant 0.00510204071 : f32
    %14 = vector.broadcast %cst_6 : f32 to vector<672x1xf32>
    %15 = arith.mulf %11, %14 : vector<672x1xf32>
    %16 = arith.mulf %13, %13 : vector<672x1xf32>
    %17 = arith.subf %15, %16 : vector<672x1xf32>
    %cst_7 = arith.constant 0.000000e+00 : f32
    %18 = vector.broadcast %cst_7 : f32 to vector<672x1xf32>
    %19 = arith.maximumf %17, %18 : vector<672x1xf32>
    %cst_8 = arith.constant 1.000000e-03 : f32
    %20 = vector.broadcast %cst_8 : f32 to vector<672x1xf32>
    %21 = arith.addf %19, %20 : vector<672x1xf32>
    %22 = math.rsqrt %21 : vector<672x1xf32>
    %23 = arith.index_cast %1 : i32 to index
    %c0_9 = arith.constant 0 : index
    %24 = vector.load %arg3[%23, %c0_9] : memref<1344x1xf32, #tpu.memory_space<vmem>>, vector<672x1xf32>
    %25 = arith.index_cast %1 : i32 to index
    %c0_10 = arith.constant 0 : index
    %26 = vector.load %arg4[%25, %c0_10] : memref<1344x1xf32, #tpu.memory_space<vmem>>, vector<672x1xf32>
    %27 = arith.mulf %22, %24 : vector<672x1xf32>
    %28 = arith.mulf %13, %27 : vector<672x1xf32>
    %29 = arith.subf %26, %28 : vector<672x1xf32>
    %30 = vector.broadcast %27 : vector<672x1xf32> to vector<672x196xf32>
    %31 = arith.mulf %6, %30 : vector<672x196xf32>
    %32 = vector.broadcast %29 : vector<672x1xf32> to vector<672x196xf32>
    %33 = arith.addf %31, %32 : vector<672x196xf32>
    %c0_11 = arith.constant 0 : index
    %c0_12 = arith.constant 0 : index
    %34 = vector.load %arg5[%c0_11, %c0_12] : memref<672x196xf32, #tpu.memory_space<vmem>>, vector<672x196xf32>
    tpu.vector_store %arg5[%c0_11, %c0_12], %33 {strides = array<i32>} : memref<672x196xf32, #tpu.memory_space<vmem>>, vector<672x196xf32>,
    return
  }
  func.func @transform_0(%arg0: i32) -> (i32, i32) {
    %c0_i32 = arith.constant 0 : i32
    %c0_i32_0 = arith.constant 0 : i32
    return %arg0, %c0_i32 : i32, i32
  }
  func.func @transform_1(%arg0: i32) -> (i32, i32) {
    %c0_i32 = arith.constant 0 : i32
    %c0_i32_0 = arith.constant 0 : i32
    %c0_i32_1 = arith.constant 0 : i32
    return %c0_i32, %c0_i32_0 : i32, i32
  }
  func.func @transform_2(%arg0: i32) -> (i32, i32) {
    %c0_i32 = arith.constant 0 : i32
    %c0_i32_0 = arith.constant 0 : i32
    %c0_i32_1 = arith.constant 0 : i32
    return %c0_i32, %c0_i32_0 : i32, i32
  }
  func.func @transform_3(%arg0: i32) -> (i32, i32) {
    %c0_i32 = arith.constant 0 : i32
    %c0_i32_0 = arith.constant 0 : i32
    %c0_i32_1 = arith.constant 0 : i32
    return %c0_i32, %c0_i32_0 : i32, i32
  }
  func.func @transform_4(%arg0: i32) -> (i32, i32) {
    %c0_i32 = arith.constant 0 : i32
    %c0_i32_0 = arith.constant 0 : i32
    return %arg0, %c0_i32 : i32, i32
  }
}

</mosaic_0001>

<bundles_post_ra>
// kernel: tpu_custom_call.1
= control target key start
LH: loop header
LB: loop body
LE: loop exit
PB: predicated region body
PF: predicated region fallthrough
CT: control target
= control target key end

     0   :  { %s4677_s15 = smov 0   ;;  %s8562_s0 = inlined_call_operand.vmem [shape: f32[1344,224], index: 0, kind: input, shape index: {}]   ;;  %s8563_s1 = inlined_call_operand.vmem [shape: f32[224,196], index: 1, kind: input, shape index: {}]   ;;  %s8564_s2 = inlined_call_operand.vmem [shape: f32[1344,1], index: 2, kind: input, shape index: {}]   ;;  %s8565_s3 = inlined_call_operand.vmem [shape: f32[1344,1], index: 3, kind: input, shape index: {}]   ;;  %s8566_s4 = inlined_call_operand.vmem [shape: f32[1344,196], index: 4, kind: output, shape index: {}]  }
   0x1 LB: > { %s4381_s16 = sadd.s32 4294967295, %s4649_s15   ;;  %p4385_p0 = scmp.ge.s32.totalorder %s4649_s15, 1  ;;  %s4649_s15 = sphi %s4677_s15, %s14_s15  }
   0x2   : > { %p164_p1 = scmp.lt.s32.totalorder %s4649_s15, 3 }
   0x4   : > { %p165_p2 = pnand %p4385_p0, %p164_p1 }
   0x6   : > { %168 = sbr.rel (%p165_p2) target bundleno = 1115 (0x45b), region = 36 }
   0xd   : > { %v461_v0 = vld [vmem:[%s8563_s1 + $0x8] sm:$0xff]  ;;  %v463_v1 = vld [vmem:[%s8563_s1 + $0x18] sm:$0xff]  ;;  %v460_v2 = vld [vmem:[%s8563_s1] sm:$0xff]  ;;  %s192_s23 = smul.u32 84, %s4381_s16  ;;  %vm544_vm0 = vcmask 785408   ;;  %vm1124_vm1 = vcmask 556032  }
   0xe   : > { %v517_v3 = vpack.c.bf16 %v463_v1, %v461_v0  ;;  %v462_v4 = vld [vmem:[%s8563_s1 + $0x10] sm:$0xff]  ;;  %v465_v5 = vld [vmem:[%s8563_s1 + $0x28] sm:$0xff]  ;;  %v467_v6 = vld [vmem:[%s8563_s1 + $0x38] sm:$0xff] }
   0xf   : > { %v516_v7 = vpack.c.bf16 %v462_v4, %v460_v2  ;;  %v519_v8 = vpack.c.bf16 %v467_v6, %v465_v5  ;;  %v464_v9 = vld [vmem:[%s8563_s1 + $0x20] sm:$0xff]  ;;  %v466_v10 = vld [vmem:[%s8563_s1 + $0x30] sm:$0xff]  ;;  %v469_v11 = vld [vmem:[%s8563_s1 + $0x48] sm:$0xff]  ;;  %p193_p3 = scmp.lt.s32.totalorder %s192_s23, 167 }
  0x10   : > { %671 = vmatprep.subr.bf16.mxu0 %v517_v3  ;;  %4436 = vmatprep.subr.bf16.mxu1 %v517_v3  ;;  %v471_v12 = vld [vmem:[%s8563_s1 + $0x58] sm:$0xff]  ;;  %v518_v13 = vpack.c.bf16 %v466_v10, %v464_v9  ;;  %v468_v15 = vld [vmem:[%s8563_s1 + $0x40] sm:$0xff]  ;;  %v470_v16 = vld [vmem:[%s8563_s1 + $0x50] sm:$0xff] }
  0x11   : > { %672 = vmatpush1.bf16.msra.mxu0 %v516_v7  ;;  %4450 = vmatpush1.bf16.msra.mxu1 %v516_v7  ;;  %v521_v14 = vpack.c.bf16 %v471_v12, %v469_v11  ;;  %v473_v17 = vld [vmem:[%s8563_s1 + $0x68] sm:$0xff]  ;;  %v475_v18 = vld [vmem:[%s8563_s1 + $0x78] sm:$0xff]  ;;  %v520_v19 = vpack.c.bf16 %v470_v16, %v468_v15  ;;  %s9575_s23 = smov (!%p193_p3, %s192_s23), 167  ;;  %v472_v21 = vld [vmem:[%s8563_s1 + $0x60] sm:$0xff] }
  0x12   : > { %673 = vmatprep.subr.bf16.mxu0 %v519_v8  ;;  %4437 = vmatprep.subr.bf16.mxu1 %v519_v8  ;;  %v523_v20 = vpack.c.bf16 %v475_v18, %v473_v17  ;;  %v474_v22 = vld [vmem:[%s8563_s1 + $0x70] sm:$0xff]  ;;  %v477_v23 = vld [vmem:[%s8563_s1 + $0x88] sm:$0xff]  ;;  %v479_v24 = vld [vmem:[%s8563_s1 + $0x98] sm:$0xff]  ;;  %s4434_s5 = sshll.u32 %s9575_s23, 4 }
  0x13   : > { %v522_v25 = vpack.c.bf16 %v474_v22, %v472_v21  ;;  %v525_v26 = vpack.c.bf16 %v479_v24, %v477_v23  ;;  %v476_v27 = vld [vmem:[%s8563_s1 + $0x80] sm:$0xff]  ;;  %v478_v28 = vld [vmem:[%s8563_s1 + $0x90] sm:$0xff]  ;;  %v481_v29 = vld [vmem:[%s8563_s1 + $0xa8] sm:$0xff]  ;;  %s4761_s18 = scalar_lea.vmem %s8562_s0, %s4434_s5  ;;  %s7494_s7 = scalar_lea.vmem %s8566_s4, %s4434_s5 }
  0x14   : > { %v483_v30 = vld [vmem:[%s8563_s1 + $0xb8] sm:$0xff]  ;;  %v524_v31 = vpack.c.bf16 %v478_v28, %v476_v27  ;;  %v480_v33 = vld [vmem:[%s8563_s1 + $0xa0] sm:$0xff]  ;;  %v482_v34 = vld [vmem:[%s8563_s1 + $0xb0] sm:$0xff] }
  0x15   : > { %674 = vmatpush1.bf16.msra.mxu0 %v518_v13  ;;  %4451 = vmatpush1.bf16.msra.mxu1 %v518_v13  ;;  %v527_v32 = vpack.c.bf16 %v483_v30, %v481_v29  ;;  %v485_v35 = vld [vmem:[%s8563_s1 + $0xc8] sm:$0xff]  ;;  %v487_v36 = vld [vmem:[%s8563_s1 + $0xd8] sm:$0xff]  ;;  %v526_v41 = vpack.c.bf16 %v482_v34, %v480_v33  ;;  %v484_v45 = vld [vmem:[%s8563_s1 + $0xc0] sm:$0xff] }
  0x16   : > { %675 = vmatprep.subr.bf16.mxu0 %v521_v14  ;;  %4438 = vmatprep.subr.bf16.mxu1 %v521_v14  ;;  %v209_v37 = vld [vmem:[%s4761_s18 + $0x8] sm:$0xff]  ;;  %v211_v38 = vld [vmem:[%s4761_s18 + $0x18] sm:$0xff]  ;;  %v529_v44 = vpack.c.bf16 %v487_v36, %v485_v35  ;;  %v486_v46 = vld [vmem:[%s8563_s1 + $0xd0] sm:$0xff] }
  0x17   : > { %v293_v39 = vld [vmem:[%s4761_s18 + $0x2a8] sm:$0xff]  ;;  %v295_v40 = vld [vmem:[%s4761_s18 + $0x2b8] sm:$0xff]  ;;  %v377_v42 = vpack.c.bf16 %v211_v38, %v209_v37  ;;  %v528_v49 = vpack.c.bf16 %v486_v46, %v484_v45  ;;  %v488_v51 = vld [vmem:[%s8563_s1 + $0xe0] sm:$0xff] }
  0x18   : > { %v419_v43 = vpack.c.bf16 %v295_v40, %v293_v39  ;;  %v489_v47 = vld [vmem:[%s8563_s1 + $0xe8] sm:$0xff]  ;;  %v491_v48 = vld [vmem:[%s8563_s1 + $0xf8] sm:$0xff]  ;;  %v490_v52 = vld [vmem:[%s8563_s1 + $0xf0] sm:$0xff] }
  0x19   : > { %676 = vmatpush1.bf16.msra.mxu0 %v520_v19  ;;  %4452 = vmatpush1.bf16.msra.mxu1 %v520_v19  ;;  %v531_v50 = vpack.c.bf16 %v491_v48, %v489_v47  ;;  %v493_v53 = vld [vmem:[%s8563_s1 + $0x108] sm:$0xff]  ;;  %v495_v54 = vld [vmem:[%s8563_s1 + $0x118] sm:$0xff]  ;;  %v530_v55 = vpack.c.bf16 %v490_v52, %v488_v51  ;;  %v492_v57 = vld [vmem:[%s8563_s1 + $0x100] sm:$0xff] }
  0x1a   : > { %677 = vmatprep.subr.bf16.mxu0 %v523_v20  ;;  %4439 = vmatprep.subr.bf16.mxu1 %v523_v20  ;;  %v533_v56 = vpack.c.bf16 %v495_v54, %v493_v53  ;;  %v494_v58 = vld [vmem:[%s8563_s1 + $0x110] sm:$0xff]  ;;  %v497_v59 = vld [vmem:[%s8563_s1 + $0x128] sm:$0xff]  ;;  %v499_v60 = vld [vmem:[%s8563_s1 + $0x138] sm:$0xff] }
  0x1b   : > { %4390 = vmatprep.mubr.msk.bf16.mxu0 %vm544_vm0, %v377_v42  ;;  %4411 = vmatprep.mubr.msk.bf16.mxu1 %vm544_vm0, %v419_v43  ;;  %v532_v61 = vpack.c.bf16 %v494_v58, %v492_v57  ;;  %v535_v62 = vpack.c.bf16 %v499_v60, %v497_v59  ;;  %v496_v63 = vld [vmem:[%s8563_s1 + $0x120] sm:$0xff]  ;;  %v498_v0 = vld [vmem:[%s8563_s1 + $0x130] sm:$0xff]  ;;  %v501_v1 = vld [vmem:[%s8563_s1 + $0x148] sm:$0xff] }
  0x1c   : > { %v503_v2 = vld [vmem:[%s8563_s1 + $0x158] sm:$0xff]  ;;  %v534_v3 = vpack.c.bf16 %v498_v0, %v496_v63  ;;  %v500_v5 = vld [vmem:[%s8563_s1 + $0x140] sm:$0xff]  ;;  %v502_v6 = vld [vmem:[%s8563_s1 + $0x150] sm:$0xff] }
  0x1d   : > { %678 = vmatpush1.bf16.msra.mxu0 %v522_v25  ;;  %4453 = vmatpush1.bf16.msra.mxu1 %v522_v25  ;;  %v537_v4 = vpack.c.bf16 %v503_v2, %v501_v1  ;;  %v505_v7 = vld [vmem:[%s8563_s1 + $0x168] sm:$0xff]  ;;  %v507_v8 = vld [vmem:[%s8563_s1 + $0x178] sm:$0xff]  ;;  %v536_v9 = vpack.c.bf16 %v502_v6, %v500_v5  ;;  %v504_v11 = vld [vmem:[%s8563_s1 + $0x160] sm:$0xff] }
  0x1e   : > { %679 = vmatprep.subr.bf16.mxu0 %v525_v26  ;;  %4440 = vmatprep.subr.bf16.mxu1 %v525_v26  ;;  %v539_v10 = vpack.c.bf16 %v507_v8, %v505_v7  ;;  %v506_v12 = vld [vmem:[%s8563_s1 + $0x170] sm:$0xff]  ;;  %v509_v13 = vld [vmem:[%s8563_s1 + $0x188] sm:$0xff]  ;;  %v511_v14 = vld [vmem:[%s8563_s1 + $0x198] sm:$0xff] }
  0x1f   : > { %v538_v15 = vpack.c.bf16 %v506_v12, %v504_v11  ;;  %v541_v16 = vpack.c.bf16 %v511_v14, %v509_v13  ;;  %v508_v17 = vld [vmem:[%s8563_s1 + $0x180] sm:$0xff]  ;;  %v510_v18 = vld [vmem:[%s8563_s1 + $0x190] sm:$0xff]  ;;  %v513_v19 = vld [vmem:[%s8563_s1 + $0x1a8] sm:$0xff] }
  0x20   : > { %v515_v20 = vld [vmem:[%s8563_s1 + $0x1b8] sm:$0xff]  ;;  %v540_v21 = vpack.c.bf16 %v510_v18, %v508_v17  ;;  %v512_v23 = vld [vmem:[%s8563_s1 + $0x1a0] sm:$0xff]  ;;  %v514_v24 = vld [vmem:[%s8563_s1 + $0x1b0] sm:$0xff] }
  0x21   : > { %680 = vmatpush1.bf16.msra.mxu0 %v524_v31  ;;  %4454 = vmatpush1.bf16.msra.mxu1 %v524_v31  ;;  %v543_v22 = vpack.c.bf16 %v515_v20, %v513_v19  ;;  %v208_v25 = vld [vmem:[%s4761_s18] sm:$0xff]  ;;  %v210_v26 = vld [vmem:[%s4761_s18 + $0x10] sm:$0xff]  ;;  %v542_v27 = vpack.c.bf16 %v514_v24, %v512_v23  ;;  %v213_v30 = vld [vmem:[%s4761_s18 + $0x28] sm:$0xff] }
  0x22   : > { %681 = vmatprep.subr.bf16.mxu0 %v527_v32  ;;  %4441 = vmatprep.subr.bf16.mxu1 %v527_v32  ;;  %v292_v28 = vld [vmem:[%s4761_s18 + $0x2a0] sm:$0xff]  ;;  %v294_v29 = vld [vmem:[%s4761_s18 + $0x2b0] sm:$0xff]  ;;  %v215_v31 = vld [vmem:[%s4761_s18 + $0x38] sm:$0xff]  ;;  %v376_v34 = vpack.c.bf16 %v210_v26, %v208_v25 }
  0x23   : > { %v297_v32 = vld [vmem:[%s4761_s18 + $0x2c8] sm:$0xff]  ;;  %v299_v33 = vld [vmem:[%s4761_s18 + $0x2d8] sm:$0xff]  ;;  %v418_v35 = vpack.c.bf16 %v294_v29, %v292_v28  ;;  %v379_v36 = vpack.c.bf16 %v215_v31, %v213_v30  ;;  %v212_v38 = vld [vmem:[%s4761_s18 + $0x20] sm:$0xff] }
  0x24   : > { %v421_v37 = vpack.c.bf16 %v299_v33, %v297_v32  ;;  %v214_v39 = vld [vmem:[%s4761_s18 + $0x30] sm:$0xff]  ;;  %v296_v40 = vld [vmem:[%s4761_s18 + $0x2c0] sm:$0xff]  ;;  %v217_v42 = vld [vmem:[%s4761_s18 + $0x48] sm:$0xff] }
  0x25   : > { %682 = vmatpush1.bf16.msra.mxu0 %v526_v41  ;;  %4455 = vmatpush1.bf16.msra.mxu1 %v526_v41  ;;  %v298_v41 = vld [vmem:[%s4761_s18 + $0x2d0] sm:$0xff]  ;;  %v219_v43 = vld [vmem:[%s4761_s18 + $0x58] sm:$0xff]  ;;  %v378_v46 = vpack.c.bf16 %v214_v39, %v212_v38  ;;  %v300_v52 = vld [vmem:[%s4761_s18 + $0x2e0] sm:$0xff] }
  0x26   : > { %683 = vmatprep.subr.bf16.mxu0 %v529_v44  ;;  %4442 = vmatprep.subr.bf16.mxu1 %v529_v44  ;;  %v301_v44 = vld [vmem:[%s4761_s18 + $0x2e8] sm:$0xff]  ;;  %v303_v45 = vld [vmem:[%s4761_s18 + $0x2f8] sm:$0xff]  ;;  %v420_v47 = vpack.c.bf16 %v298_v41, %v296_v40  ;;  %v381_v48 = vpack.c.bf16 %v219_v43, %v217_v42  ;;  %v218_v51 = vld [vmem:[%s4761_s18 + $0x50] sm:$0xff] }
  0x27   : > { %v302_v53 = vld [vmem:[%s4761_s18 + $0x2f0] sm:$0xff]  ;;  %v221_v54 = vld [vmem:[%s4761_s18 + $0x68] sm:$0xff]  ;;  %v307_v57 = vld [vmem:[%s4761_s18 + $0x318] sm:$0xff] }
  0x28   : > { %v422_v59 = vpack.c.bf16 %v302_v53, %v300_v52  ;;  %v222_v63 = vld [vmem:[%s4761_s18 + $0x70] sm:$0xff]  ;;  %v304_v0 = vld [vmem:[%s4761_s18 + $0x300] sm:$0xff]  ;;  %v225_v2 = vld [vmem:[%s4761_s18 + $0x88] sm:$0xff] }
  0x29   : > { %684 = vmatpush1.bf16.msra.mxu0 %v528_v49  ;;  %4456 = vmatpush1.bf16.msra.mxu1 %v528_v49  ;;  %v423_v49 = vpack.c.bf16 %v303_v45, %v301_v44  ;;  %v306_v1 = vld [vmem:[%s4761_s18 + $0x310] sm:$0xff]  ;;  %v311_v5 = vld [vmem:[%s4761_s18 + $0x338] sm:$0xff]  ;;  %v308_v12 = vld [vmem:[%s4761_s18 + $0x320] sm:$0xff] }
  0x2a   : > { %685 = vmatprep.subr.bf16.mxu0 %v531_v50  ;;  %4443 = vmatprep.subr.bf16.mxu1 %v531_v50  ;;  %v216_v50 = vld [vmem:[%s4761_s18 + $0x40] sm:$0xff]  ;;  %v424_v7 = vpack.c.bf16 %v306_v1, %v304_v0  ;;  %v226_v11 = vld [vmem:[%s4761_s18 + $0x90] sm:$0xff]  ;;  %v229_v14 = vld [vmem:[%s4761_s18 + $0xa8] sm:$0xff] }
  0x2b   : > { %v380_v58 = vpack.c.bf16 %v218_v51, %v216_v50  ;;  %v310_v13 = vld [vmem:[%s4761_s18 + $0x330] sm:$0xff]  ;;  %v315_v17 = vld [vmem:[%s4761_s18 + $0x358] sm:$0xff]  ;;  %v312_v24 = vld [vmem:[%s4761_s18 + $0x340] sm:$0xff] }
  0x2c   : > { %v426_v19 = vpack.c.bf16 %v310_v13, %v308_v12  ;;  %v230_v23 = vld [vmem:[%s4761_s18 + $0xb0] sm:$0xff]  ;;  %v233_v26 = vld [vmem:[%s4761_s18 + $0xc8] sm:$0xff]  ;;  %v319_v29 = vld [vmem:[%s4761_s18 + $0x378] sm:$0xff] }
  0x2d   : > { %686 = vmatpush1.bf16.msra.mxu0 %v530_v55  ;;  %4457 = vmatpush1.bf16.msra.mxu1 %v530_v55  ;;  %v223_v55 = vld [vmem:[%s4761_s18 + $0x78] sm:$0xff]  ;;  %v314_v25 = vld [vmem:[%s4761_s18 + $0x350] sm:$0xff]  ;;  %v317_v28 = vld [vmem:[%s4761_s18 + $0x368] sm:$0xff] }
  0x2e   : > { %687 = vmatprep.subr.bf16.mxu0 %v533_v56  ;;  %4444 = vmatprep.subr.bf16.mxu1 %v533_v56  ;;  %v305_v56 = vld [vmem:[%s4761_s18 + $0x308] sm:$0xff]  ;;  %v383_v60 = vpack.c.bf16 %v223_v55, %v221_v54  ;;  %v428_v31 = vpack.c.bf16 %v314_v25, %v312_v24  ;;  %v431_v33 = vpack.c.bf16 %v319_v29, %v317_v28  ;;  %v239_v39 = vld [vmem:[%s4761_s18 + $0xf8] sm:$0xff] }
  0x2f   : > { %v237_v38 = vld [vmem:[%s4761_s18 + $0xe8] sm:$0xff]  ;;  %v323_v41 = vld [vmem:[%s4761_s18 + $0x398] sm:$0xff] }
  0x30   : > { %v321_v40 = vld [vmem:[%s4761_s18 + $0x388] sm:$0xff]  ;;  %v391_v44 = vpack.c.bf16 %v239_v39, %v237_v38  ;;  %v243_v51 = vld [vmem:[%s4761_s18 + $0x118] sm:$0xff] }
  0x31   : > { %688 = vmatpush1.bf16.msra.mxu0 %v532_v61  ;;  %4458 = vmatpush1.bf16.msra.mxu1 %v532_v61  ;;  %v425_v61 = vpack.c.bf16 %v307_v57, %v305_v56  ;;  %v433_v45 = vpack.c.bf16 %v323_v41, %v321_v40  ;;  %v241_v50 = vld [vmem:[%s4761_s18 + $0x108] sm:$0xff]  ;;  %v327_v53 = vld [vmem:[%s4761_s18 + $0x3b8] sm:$0xff] }
  0x32   : > { %689 = vmatprep.subr.bf16.mxu0 %v535_v62  ;;  %4445 = vmatprep.subr.bf16.mxu1 %v535_v62  ;;  %v220_v62 = vld [vmem:[%s4761_s18 + $0x60] sm:$0xff]  ;;  %v325_v52 = vld [vmem:[%s4761_s18 + $0x3a8] sm:$0xff]  ;;  %v393_v56 = vpack.c.bf16 %v243_v51, %v241_v50  ;;  %v331_v1 = vld [vmem:[%s4761_s18 + $0x3d8] sm:$0xff] }
  0x33   : > { %v382_v6 = vpack.c.bf16 %v222_v63, %v220_v62  ;;  %v435_v57 = vpack.c.bf16 %v327_v53, %v325_v52  ;;  %v245_v62 = vld [vmem:[%s4761_s18 + $0x128] sm:$0xff]  ;;  %v247_v63 = vld [vmem:[%s4761_s18 + $0x138] sm:$0xff] }
  0x34   : > { %v329_v0 = vld [vmem:[%s4761_s18 + $0x3c8] sm:$0xff]  ;;  %v335_v13 = vld [vmem:[%s4761_s18 + $0x3f8] sm:$0xff] }
  0x35   : > { %690 = vmatpush1.bf16.msra.mxu0 %v534_v3  ;;  %4459 = vmatpush1.bf16.msra.mxu1 %v534_v3  ;;  %v227_v3 = vld [vmem:[%s4761_s18 + $0x98] sm:$0xff]  ;;  %v333_v12 = vld [vmem:[%s4761_s18 + $0x3e8] sm:$0xff] }
  0x36   : > { %691 = vmatprep.subr.bf16.mxu0 %v537_v4  ;;  %4446 = vmatprep.subr.bf16.mxu1 %v537_v4  ;;  %v309_v4 = vld [vmem:[%s4761_s18 + $0x328] sm:$0xff]  ;;  %v385_v8 = vpack.c.bf16 %v227_v3, %v225_v2  ;;  %v339_v25 = vld [vmem:[%s4761_s18 + $0x418] sm:$0xff] }
  0x37   : > { %v337_v24 = vld [vmem:[%s4761_s18 + $0x408] sm:$0xff] }
  0x38   : > { %v441_v29 = vpack.c.bf16 %v339_v25, %v337_v24  ;;  %v274_v24 = vld [vmem:[%s4761_s18 + $0x210] sm:$0xff] }
  0x39   : > { %692 = vmatpush1.bf16.msra.mxu0 %v536_v9  ;;  %4460 = vmatpush1.bf16.msra.mxu1 %v536_v9  ;;  %v427_v9 = vpack.c.bf16 %v311_v5, %v309_v4  ;;  %v395_v4 = vpack.c.bf16 %v247_v63, %v245_v62  ;;  %v437_v5 = vpack.c.bf16 %v331_v1, %v329_v0 }
  0x3a   : > { %693 = vmatprep.subr.bf16.mxu0 %v539_v10  ;;  %4447 = vmatprep.subr.bf16.mxu1 %v539_v10  ;;  %v224_v10 = vld [vmem:[%s4761_s18 + $0x80] sm:$0xff] }
  0x3b   : > { %v384_v18 = vpack.c.bf16 %v226_v11, %v224_v10  ;;  %v249_v10 = vld [vmem:[%s4761_s18 + $0x148] sm:$0xff]  ;;  %v251_v11 = vld [vmem:[%s4761_s18 + $0x158] sm:$0xff] }
  0x3d   : > { %694 = vmatpush1.bf16.msra.mxu0 %v538_v15  ;;  %4461 = vmatpush1.bf16.msra.mxu1 %v538_v15  ;;  %v231_v15 = vld [vmem:[%s4761_s18 + $0xb8] sm:$0xff] }
  0x3e   : > { %695 = vmatprep.subr.bf16.mxu0 %v541_v16  ;;  %4448 = vmatprep.subr.bf16.mxu1 %v541_v16  ;;  %v313_v16 = vld [vmem:[%s4761_s18 + $0x348] sm:$0xff]  ;;  %v387_v20 = vpack.c.bf16 %v231_v15, %v229_v14 }
  0x41   : > { %696 = vmatpush1.bf16.msra.mxu0 %v540_v21  ;;  %4462 = vmatpush1.bf16.msra.mxu1 %v540_v21  ;;  %v429_v21 = vpack.c.bf16 %v315_v17, %v313_v16  ;;  %v397_v16 = vpack.c.bf16 %v251_v11, %v249_v10  ;;  %v439_v17 = vpack.c.bf16 %v335_v13, %v333_v12  ;;  %v353_v11 = vld [vmem:[%s4761_s18 + $0x488] sm:$0xff]  ;;  %v355_v12 = vld [vmem:[%s4761_s18 + $0x498] sm:$0xff] }
  0x42   : > { %697 = vmatprep.subr.bf16.mxu0 %v543_v22  ;;  %4449 = vmatprep.subr.bf16.mxu1 %v543_v22  ;;  %v228_v22 = vld [vmem:[%s4761_s18 + $0xa0] sm:$0xff]  ;;  %v449_v13 = vpack.c.bf16 %v355_v12, %v353_v11  ;;  %v375_v11 = vld [vmem:[%s4761_s18 + $0x538] sm:$0xff] }
  0x43   : > { %v386_v30 = vpack.c.bf16 %v230_v23, %v228_v22  ;;  %v253_v22 = vld [vmem:[%s4761_s18 + $0x168] sm:$0xff]  ;;  %v255_v23 = vld [vmem:[%s4761_s18 + $0x178] sm:$0xff] }
  0x44   : > { %v399_v28 = vpack.c.bf16 %v255_v23, %v253_v22  ;;  %v272_v23 = vld [vmem:[%s4761_s18 + $0x200] sm:$0xff] }
  0x45   : > { %698 = vmatpush1.bf16.msra.mxu0 %v542_v27  ;;  %4463 = vmatpush1.bf16.msra.mxu1 %v542_v27  ;;  %v235_v27 = vld [vmem:[%s4761_s18 + $0xd8] sm:$0xff]  ;;  %v408_v25 = vpack.c.bf16 %v274_v24, %v272_v23 }
  0x46   : > { %v389_v32 = vpack.c.bf16 %v235_v27, %v233_v26 }
  0x48   : > { %704 = vmatmul.mubr.bf16.vlgmr.msra.gmra.mrb[0].mxu0 %v376_v34  ;;  %914 = vmatmul.mubr.bf16.vlgmr.msra.gmra.mrb[0].mxu1 %v418_v35  ;;  %v232_v34 = vld [vmem:[%s4761_s18 + $0xc0] sm:$0xff]  ;;  %v234_v35 = vld [vmem:[%s4761_s18 + $0xd0] sm:$0xff] }
  0x49   : > { %4391 = vmatprep.mubr.msk.bf16.mxu0 %vm544_vm0, %v379_v36  ;;  %4412 = vmatprep.mubr.msk.bf16.mxu1 %vm544_vm0, %v421_v37  ;;  %v316_v36 = vld [vmem:[%s4761_s18 + $0x360] sm:$0xff]  ;;  %v318_v37 = vld [vmem:[%s4761_s18 + $0x370] sm:$0xff]  ;;  %v388_v42 = vpack.c.bf16 %v234_v35, %v232_v34  ;;  %v257_v34 = vld [vmem:[%s4761_s18 + $0x188] sm:$0xff] }
  0x4a   : > { %v430_v43 = vpack.c.bf16 %v318_v37, %v316_v36  ;;  %v259_v35 = vld [vmem:[%s4761_s18 + $0x198] sm:$0xff]  ;;  %v341_v36 = vld [vmem:[%s4761_s18 + $0x428] sm:$0xff] }
  0x4b   : > { %v343_v37 = vld [vmem:[%s4761_s18 + $0x438] sm:$0xff]  ;;  %v401_v40 = vpack.c.bf16 %v259_v35, %v257_v34  ;;  %v276_v35 = vld [vmem:[%s4761_s18 + $0x220] sm:$0xff] }
  0x4c   : > { %v443_v41 = vpack.c.bf16 %v343_v37, %v341_v36  ;;  %v278_v36 = vld [vmem:[%s4761_s18 + $0x230] sm:$0xff] }
  0x4d   : > { %v410_v37 = vpack.c.bf16 %v278_v36, %v276_v35 }
  0x50   : > { %714 = vmatmul.mubr.bf16.gmra.mrb[4].mxu0 %v378_v46  ;;  %924 = vmatmul.mubr.bf16.gmra.mrb[4].mxu1 %v420_v47  ;;  %v236_v46 = vld [vmem:[%s4761_s18 + $0xe0] sm:$0xff]  ;;  %v238_v47 = vld [vmem:[%s4761_s18 + $0xf0] sm:$0xff] }
  0x51   : > { %4392 = vmatprep.mubr.msk.bf16.mxu0 %vm544_vm0, %v381_v48  ;;  %4413 = vmatprep.mubr.msk.bf16.mxu1 %vm544_vm0, %v423_v49  ;;  %v320_v48 = vld [vmem:[%s4761_s18 + $0x380] sm:$0xff]  ;;  %v322_v49 = vld [vmem:[%s4761_s18 + $0x390] sm:$0xff]  ;;  %v390_v54 = vpack.c.bf16 %v238_v47, %v236_v46  ;;  %v261_v46 = vld [vmem:[%s4761_s18 + $0x1a8] sm:$0xff] }
  0x52   : > { %v432_v55 = vpack.c.bf16 %v322_v49, %v320_v48  ;;  %v263_v47 = vld [vmem:[%s4761_s18 + $0x1b8] sm:$0xff]  ;;  %v345_v48 = vld [vmem:[%s4761_s18 + $0x448] sm:$0xff] }
  0x53   : > { %v347_v49 = vld [vmem:[%s4761_s18 + $0x458] sm:$0xff]  ;;  %v403_v52 = vpack.c.bf16 %v263_v47, %v261_v46  ;;  %v280_v47 = vld [vmem:[%s4761_s18 + $0x240] sm:$0xff] }
  0x54   : > { %v445_v53 = vpack.c.bf16 %v347_v49, %v345_v48  ;;  %v282_v48 = vld [vmem:[%s4761_s18 + $0x250] sm:$0xff] }
  0x55   : > { %v412_v49 = vpack.c.bf16 %v282_v48, %v280_v47 }
  0x58   : > { %724 = vmatmul.mubr.bf16.gmra.mrb[8].mxu0 %v380_v58  ;;  %934 = vmatmul.mubr.bf16.gmra.mrb[8].mxu1 %v422_v59  ;;  %v240_v58 = vld [vmem:[%s4761_s18 + $0x100] sm:$0xff]  ;;  %v242_v59 = vld [vmem:[%s4761_s18 + $0x110] sm:$0xff] }
  0x59   : > { %4393 = vmatprep.mubr.msk.bf16.mxu0 %vm544_vm0, %v383_v60  ;;  %4414 = vmatprep.mubr.msk.bf16.mxu1 %vm544_vm0, %v425_v61  ;;  %v324_v60 = vld [vmem:[%s4761_s18 + $0x3a0] sm:$0xff]  ;;  %v326_v61 = vld [vmem:[%s4761_s18 + $0x3b0] sm:$0xff]  ;;  %v392_v2 = vpack.c.bf16 %v242_v59, %v240_v58  ;;  %v265_v58 = vld [vmem:[%s4761_s18 + $0x1c8] sm:$0xff] }
  0x5a   : > { %v434_v3 = vpack.c.bf16 %v326_v61, %v324_v60  ;;  %v267_v59 = vld [vmem:[%s4761_s18 + $0x1d8] sm:$0xff]  ;;  %v349_v60 = vld [vmem:[%s4761_s18 + $0x468] sm:$0xff] }
  0x5b   : > { %v351_v61 = vld [vmem:[%s4761_s18 + $0x478] sm:$0xff]  ;;  %v405_v0 = vpack.c.bf16 %v267_v59, %v265_v58  ;;  %v284_v59 = vld [vmem:[%s4761_s18 + $0x260] sm:$0xff] }
  0x5c   : > { %v447_v1 = vpack.c.bf16 %v351_v61, %v349_v60  ;;  %v286_v60 = vld [vmem:[%s4761_s18 + $0x270] sm:$0xff] }
  0x5d   : > { %v414_v61 = vpack.c.bf16 %v286_v60, %v284_v59 }
  0x60   : > { %734 = vmatmul.mubr.bf16.gmra.mrb[12].mxu0 %v382_v6  ;;  %944 = vmatmul.mubr.bf16.gmra.mrb[12].mxu1 %v424_v7  ;;  %v244_v6 = vld [vmem:[%s4761_s18 + $0x120] sm:$0xff]  ;;  %v246_v7 = vld [vmem:[%s4761_s18 + $0x130] sm:$0xff] }
  0x61   : > { %4394 = vmatprep.mubr.msk.bf16.mxu0 %vm544_vm0, %v385_v8  ;;  %4415 = vmatprep.mubr.msk.bf16.mxu1 %vm544_vm0, %v427_v9  ;;  %v328_v8 = vld [vmem:[%s4761_s18 + $0x3c0] sm:$0xff]  ;;  %v330_v9 = vld [vmem:[%s4761_s18 + $0x3d0] sm:$0xff]  ;;  %v394_v14 = vpack.c.bf16 %v246_v7, %v244_v6  ;;  %v269_v6 = vld [vmem:[%s4761_s18 + $0x1e8] sm:$0xff] }
  0x62   : > { %v436_v15 = vpack.c.bf16 %v330_v9, %v328_v8  ;;  %v271_v7 = vld [vmem:[%s4761_s18 + $0x1f8] sm:$0xff] }
  0x63   : > { %v407_v10 = vpack.c.bf16 %v271_v7, %v269_v6  ;;  %v288_v7 = vld [vmem:[%s4761_s18 + $0x280] sm:$0xff] }
  0x68   : > { %744 = vmatmul.mubr.bf16.gmra.mrb[16].mxu0 %v384_v18  ;;  %954 = vmatmul.mubr.bf16.gmra.mrb[16].mxu1 %v426_v19  ;;  %v248_v18 = vld [vmem:[%s4761_s18 + $0x140] sm:$0xff]  ;;  %v250_v19 = vld [vmem:[%s4761_s18 + $0x150] sm:$0xff] }
  0x69   : > { %4395 = vmatprep.mubr.msk.bf16.mxu0 %vm544_vm0, %v387_v20  ;;  %4416 = vmatprep.mubr.msk.bf16.mxu1 %vm544_vm0, %v429_v21  ;;  %v332_v20 = vld [vmem:[%s4761_s18 + $0x3e0] sm:$0xff]  ;;  %v334_v21 = vld [vmem:[%s4761_s18 + $0x3f0] sm:$0xff]  ;;  %v396_v26 = vpack.c.bf16 %v250_v19, %v248_v18 }
  0x6a   : > { %v438_v27 = vpack.c.bf16 %v334_v21, %v332_v20  ;;  %v273_v20 = vld [vmem:[%s4761_s18 + $0x208] sm:$0xff]  ;;  %v275_v21 = vld [vmem:[%s4761_s18 + $0x218] sm:$0xff] }
  0x6b   : > { %v409_v22 = vpack.c.bf16 %v275_v21, %v273_v20 }
  0x70   : > { %754 = vmatmul.mubr.bf16.gmra.mrb[20].mxu0 %v386_v30  ;;  %964 = vmatmul.mubr.bf16.gmra.mrb[20].mxu1 %v428_v31  ;;  %v252_v30 = vld [vmem:[%s4761_s18 + $0x160] sm:$0xff]  ;;  %v254_v31 = vld [vmem:[%s4761_s18 + $0x170] sm:$0xff] }
  0x71   : > { %4396 = vmatprep.mubr.msk.bf16.mxu0 %vm544_vm0, %v389_v32  ;;  %4417 = vmatprep.mubr.msk.bf16.mxu1 %vm544_vm0, %v431_v33  ;;  %v336_v32 = vld [vmem:[%s4761_s18 + $0x400] sm:$0xff]  ;;  %v338_v33 = vld [vmem:[%s4761_s18 + $0x410] sm:$0xff]  ;;  %v398_v38 = vpack.c.bf16 %v254_v31, %v252_v30 }
  0x72   : > { %v440_v39 = vpack.c.bf16 %v338_v33, %v336_v32  ;;  %v358_v30 = vld [vmem:[%s4761_s18 + $0x4b0] sm:$0xff]  ;;  %v277_v32 = vld [vmem:[%s4761_s18 + $0x228] sm:$0xff]  ;;  %v279_v33 = vld [vmem:[%s4761_s18 + $0x238] sm:$0xff] }
  0x73   : > { %v411_v34 = vpack.c.bf16 %v279_v33, %v277_v32 }
  0x78   : > { %764 = vmatmul.mubr.bf16.gmra.mrb[24].mxu0 %v388_v42  ;;  %974 = vmatmul.mubr.bf16.gmra.mrb[24].mxu1 %v430_v43  ;;  %v256_v42 = vld [vmem:[%s4761_s18 + $0x180] sm:$0xff]  ;;  %v258_v43 = vld [vmem:[%s4761_s18 + $0x190] sm:$0xff] }
  0x79   : > { %4397 = vmatprep.mubr.msk.bf16.mxu0 %vm544_vm0, %v391_v44  ;;  %4418 = vmatprep.mubr.msk.bf16.mxu1 %vm544_vm0, %v433_v45  ;;  %v340_v44 = vld [vmem:[%s4761_s18 + $0x420] sm:$0xff]  ;;  %v342_v45 = vld [vmem:[%s4761_s18 + $0x430] sm:$0xff]  ;;  %v400_v50 = vpack.c.bf16 %v258_v43, %v256_v42 }
  0x7a   : > { %v442_v51 = vpack.c.bf16 %v342_v45, %v340_v44  ;;  %v362_v42 = vld [vmem:[%s4761_s18 + $0x4d0] sm:$0xff]  ;;  %v281_v44 = vld [vmem:[%s4761_s18 + $0x248] sm:$0xff]  ;;  %v283_v45 = vld [vmem:[%s4761_s18 + $0x258] sm:$0xff] }
  0x7b   : > { %v413_v46 = vpack.c.bf16 %v283_v45, %v281_v44 }
  0x80   : > { %774 = vmatmul.mubr.bf16.gmra.mrb[28].mxu0 %v390_v54  ;;  %984 = vmatmul.mubr.bf16.gmra.mrb[28].mxu1 %v432_v55  ;;  %v260_v54 = vld [vmem:[%s4761_s18 + $0x1a0] sm:$0xff]  ;;  %v262_v55 = vld [vmem:[%s4761_s18 + $0x1b0] sm:$0xff] }
  0x81   : > { %4398 = vmatprep.mubr.msk.bf16.mxu0 %vm544_vm0, %v393_v56  ;;  %4419 = vmatprep.mubr.msk.bf16.mxu1 %vm544_vm0, %v435_v57  ;;  %v344_v56 = vld [vmem:[%s4761_s18 + $0x440] sm:$0xff]  ;;  %v346_v57 = vld [vmem:[%s4761_s18 + $0x450] sm:$0xff]  ;;  %v402_v62 = vpack.c.bf16 %v262_v55, %v260_v54 }
  0x82   : > { %v444_v63 = vpack.c.bf16 %v346_v57, %v344_v56  ;;  %v366_v54 = vld [vmem:[%s4761_s18 + $0x4f0] sm:$0xff]  ;;  %v285_v56 = vld [vmem:[%s4761_s18 + $0x268] sm:$0xff]  ;;  %v287_v57 = vld [vmem:[%s4761_s18 + $0x278] sm:$0xff] }
  0x83   : > { %v415_v58 = vpack.c.bf16 %v287_v57, %v285_v56 }
  0x88   : > { %784 = vmatmul.mubr.bf16.gmra.mrb[32].mxu0 %v392_v2  ;;  %994 = vmatmul.mubr.bf16.gmra.mrb[32].mxu1 %v434_v3  ;;  %v264_v2 = vld [vmem:[%s4761_s18 + $0x1c0] sm:$0xff]  ;;  %v266_v3 = vld [vmem:[%s4761_s18 + $0x1d0] sm:$0xff] }
  0x89   : > { %4399 = vmatprep.mubr.msk.bf16.mxu0 %vm544_vm0, %v395_v4  ;;  %4420 = vmatprep.mubr.msk.bf16.mxu1 %vm544_vm0, %v437_v5  ;;  %v348_v4 = vld [vmem:[%s4761_s18 + $0x460] sm:$0xff]  ;;  %v350_v5 = vld [vmem:[%s4761_s18 + $0x470] sm:$0xff]  ;;  %v404_v8 = vpack.c.bf16 %v266_v3, %v264_v2 }
  0x8a   : > { %v446_v9 = vpack.c.bf16 %v350_v5, %v348_v4  ;;  %v370_v2 = vld [vmem:[%s4761_s18 + $0x510] sm:$0xff]  ;;  %v289_v4 = vld [vmem:[%s4761_s18 + $0x288] sm:$0xff]  ;;  %v291_v5 = vld [vmem:[%s4761_s18 + $0x298] sm:$0xff] }
  0x8b   : > { %v417_v6 = vpack.c.bf16 %v291_v5, %v289_v4 }
  0x90   : > { %794 = vmatmul.mubr.bf16.gmra.mrb[36].mxu0 %v394_v14  ;;  %1004 = vmatmul.mubr.bf16.gmra.mrb[36].mxu1 %v436_v15  ;;  %v268_v14 = vld [vmem:[%s4761_s18 + $0x1e0] sm:$0xff]  ;;  %v270_v15 = vld [vmem:[%s4761_s18 + $0x1f0] sm:$0xff] }
  0x91   : > { %4400 = vmatprep.mubr.msk.bf16.mxu0 %vm544_vm0, %v397_v16  ;;  %4421 = vmatprep.mubr.msk.bf16.mxu1 %vm544_vm0, %v439_v17  ;;  %v352_v16 = vld [vmem:[%s4761_s18 + $0x480] sm:$0xff]  ;;  %v354_v17 = vld [vmem:[%s4761_s18 + $0x490] sm:$0xff]  ;;  %v406_v18 = vpack.c.bf16 %v270_v15, %v268_v14 }
  0x92   : > { %v448_v19 = vpack.c.bf16 %v354_v17, %v352_v16  ;;  %v374_v14 = vld [vmem:[%s4761_s18 + $0x530] sm:$0xff] }
  0x98   : > { %804 = vmatmul.mubr.bf16.gmra.mrb[40].mxu0 %v396_v26  ;;  %1014 = vmatmul.mubr.bf16.gmra.mrb[40].mxu1 %v438_v27  ;;  %v357_v26 = vld [vmem:[%s4761_s18 + $0x4a8] sm:$0xff]  ;;  %v359_v27 = vld [vmem:[%s4761_s18 + $0x4b8] sm:$0xff] }
  0x99   : > { %4401 = vmatprep.mubr.msk.bf16.mxu0 %vm544_vm0, %v399_v28  ;;  %4422 = vmatprep.mubr.msk.bf16.mxu1 %vm544_vm0, %v441_v29  ;;  %v451_v28 = vpack.c.bf16 %v359_v27, %v357_v26  ;;  %v356_v29 = vld [vmem:[%s4761_s18 + $0x4a0] sm:$0xff] }
  0x9a   : > { %v450_v31 = vpack.c.bf16 %v358_v30, %v356_v29 }
  0xa0   : > { %814 = vmatmul.mubr.bf16.gmra.mrb[44].mxu0 %v398_v38  ;;  %1024 = vmatmul.mubr.bf16.gmra.mrb[44].mxu1 %v440_v39  ;;  %v361_v38 = vld [vmem:[%s4761_s18 + $0x4c8] sm:$0xff]  ;;  %v363_v39 = vld [vmem:[%s4761_s18 + $0x4d8] sm:$0xff] }
  0xa1   : > { %4402 = vmatprep.mubr.msk.bf16.mxu0 %vm544_vm0, %v401_v40  ;;  %4423 = vmatprep.mubr.msk.bf16.mxu1 %vm544_vm0, %v443_v41  ;;  %v453_v40 = vpack.c.bf16 %v363_v39, %v361_v38  ;;  %v360_v41 = vld [vmem:[%s4761_s18 + $0x4c0] sm:$0xff] }
  0xa2   : > { %v452_v43 = vpack.c.bf16 %v362_v42, %v360_v41 }
  0xa8   : > { %824 = vmatmul.mubr.bf16.gmra.mrb[48].mxu0 %v400_v50  ;;  %1034 = vmatmul.mubr.bf16.gmra.mrb[48].mxu1 %v442_v51  ;;  %v365_v50 = vld [vmem:[%s4761_s18 + $0x4e8] sm:$0xff]  ;;  %v367_v51 = vld [vmem:[%s4761_s18 + $0x4f8] sm:$0xff] }
  0xa9   : > { %4403 = vmatprep.mubr.msk.bf16.mxu0 %vm544_vm0, %v403_v52  ;;  %4424 = vmatprep.mubr.msk.bf16.mxu1 %vm544_vm0, %v445_v53  ;;  %v455_v52 = vpack.c.bf16 %v367_v51, %v365_v50  ;;  %v364_v53 = vld [vmem:[%s4761_s18 + $0x4e0] sm:$0xff] }
  0xaa   : > { %v454_v55 = vpack.c.bf16 %v366_v54, %v364_v53 }
  0xb0   : > { %834 = vmatmul.mubr.bf16.gmra.mrb[52].mxu0 %v402_v62  ;;  %1044 = vmatmul.mubr.bf16.gmra.mrb[52].mxu1 %v444_v63  ;;  %v369_v62 = vld [vmem:[%s4761_s18 + $0x508] sm:$0xff]  ;;  %v371_v63 = vld [vmem:[%s4761_s18 + $0x518] sm:$0xff] }
  0xb1   : > { %4404 = vmatprep.mubr.msk.bf16.mxu0 %vm544_vm0, %v405_v0  ;;  %4425 = vmatprep.mubr.msk.bf16.mxu1 %vm544_vm0, %v447_v1  ;;  %v457_v0 = vpack.c.bf16 %v371_v63, %v369_v62  ;;  %v368_v1 = vld [vmem:[%s4761_s18 + $0x500] sm:$0xff] }
  0xb2   : > { %v456_v3 = vpack.c.bf16 %v370_v2, %v368_v1 }
  0xb8   : > { %844 = vmatmul.mubr.bf16.gmra.mrb[56].mxu0 %v404_v8  ;;  %1054 = vmatmul.mubr.bf16.gmra.mrb[56].mxu1 %v446_v9  ;;  %v290_v8 = vld [vmem:[%s4761_s18 + $0x290] sm:$0xff] }
  0xb9   : > { %4405 = vmatprep.mubr.msk.bf16.mxu0 %vm544_vm0, %v407_v10  ;;  %4426 = vmatprep.mubr.msk.bf16.mxu1 %vm544_vm0, %v449_v13  ;;  %v416_v9 = vpack.c.bf16 %v290_v8, %v288_v7  ;;  %v373_v10 = vld [vmem:[%s4761_s18 + $0x528] sm:$0xff]  ;;  %v372_v13 = vld [vmem:[%s4761_s18 + $0x520] sm:$0xff]  ;;  %s6330_s18 = smul.u32 672, %s4381_s16 }
  0xba   : > { %v459_v12 = vpack.c.bf16 %v375_v11, %v373_v10  ;;  %v458_v15 = vpack.c.bf16 %v374_v14, %v372_v13 }
  0xbb   : > { %s6369_s26 = scalar_lea.vmem %s8564_s2, %s6330_s18  ;;  %s7011_s29 = scalar_lea.vmem %s8565_s3, %s6330_s18 }
  0xc0   : > { %854 = vmatmul.mubr.bf16.gmra.mrb[60].mxu0 %v406_v18  ;;  %1064 = vmatmul.mubr.bf16.gmra.mrb[60].mxu1 %v448_v19 }
  0xc1   : > { %4406 = vmatprep.mubr.msk.bf16.mxu0 %vm544_vm0, %v409_v22  ;;  %4427 = vmatprep.mubr.msk.bf16.mxu1 %vm544_vm0, %v451_v28 }
  0xc8   : > { %864 = vmatmul.mubr.bf16.gmra.mrb[64].mxu0 %v408_v25  ;;  %1074 = vmatmul.mubr.bf16.gmra.mrb[64].mxu1 %v450_v31 }
  0xc9   : > { %4407 = vmatprep.mubr.msk.bf16.mxu0 %vm544_vm0, %v411_v34  ;;  %4428 = vmatprep.mubr.msk.bf16.mxu1 %vm544_vm0, %v453_v40 }
  0xd0   : > { %874 = vmatmul.mubr.bf16.gmra.mrb[68].mxu0 %v410_v37  ;;  %1084 = vmatmul.mubr.bf16.gmra.mrb[68].mxu1 %v452_v43 }
  0xd1   : > { %4408 = vmatprep.mubr.msk.bf16.mxu0 %vm544_vm0, %v413_v46  ;;  %4429 = vmatprep.mubr.msk.bf16.mxu1 %vm544_vm0, %v455_v52 }
  0xd8   : > { %884 = vmatmul.mubr.bf16.gmra.mrb[72].mxu0 %v412_v49  ;;  %1094 = vmatmul.mubr.bf16.gmra.mrb[72].mxu1 %v454_v55 }
  0xd9   : > { %4409 = vmatprep.mubr.msk.bf16.mxu0 %vm544_vm0, %v415_v58  ;;  %4430 = vmatprep.mubr.msk.bf16.mxu1 %vm544_vm0, %v457_v0 }
  0xe0   : > { %894 = vmatmul.mubr.bf16.gmra.mrb[76].mxu0 %v414_v61  ;;  %1104 = vmatmul.mubr.bf16.gmra.mrb[76].mxu1 %v456_v3 }
  0xe1   : > { %4410 = vmatprep.mubr.msk.bf16.mxu0 %vm544_vm0, %v417_v6  ;;  %4431 = vmatprep.mubr.msk.bf16.mxu1 %vm544_vm0, %v459_v12 }
  0xe8   : > { %904 = vmatmul.mubr.bf16.gmra.mrb[80].mxu0 %v416_v9  ;;  %1114 = vmatmul.mubr.bf16.gmra.mrb[80].mxu1 %v458_v15 }
 0x11b   : > { %v5075_v16 = vpop.f32.mrb[0].mxu0  ;;  %v5077_v17 = vpop.f32.mrb[0].mxu1 }
 0x11c   : > { %8832 = vst [vmem:[#allocation2_spill] sm:$0xff] %v5075_v16  ;;  %8833 = vst [vmem:[#allocation3_spill] sm:$0xff] %v5077_v17  ;;  %v5079_v18 = vpop.f32.mrb[1].mxu0  ;;  %v5081_v19 = vpop.f32.mrb[1].mxu1  ;;  %v1461_v20 = vmul.f32 %v5075_v16, %v5075_v16  ;;  %v1545_v21 = vmul.f32 %v5077_v17, %v5077_v17 }
 0x11d   : > { %8834 = vst [vmem:[#allocation4_spill] sm:$0xff] %v5079_v18  ;;  %8835 = vst [vmem:[#allocation5_spill] sm:$0xff] %v5081_v19  ;;  %v1462_v22 = vmul.f32 %v5079_v18, %v5079_v18  ;;  %v1546_v23 = vmul.f32 %v5081_v19, %v5081_v19  ;;  %v5091_v24 = vpop.f32.mrb[2].mxu0  ;;  %v5093_v25 = vpop.f32.mrb[2].mxu1  ;;  %v1125_v26 = vsel %vm1124_vm1, %v5079_v18, 0.0  ;;  %v1293_v27 = vsel %vm1124_vm1, %v5081_v19, 0.0 }
 0x11e   : > { %8836 = vst [vmem:[#allocation6_spill] sm:$0xff] %v5091_v24  ;;  %8837 = vst [vmem:[#allocation7_spill] sm:$0xff] %v5093_v25  ;;  %v5099_v28 = vpop.f32.mrb[3].mxu0  ;;  %v5101_v29 = vpop.f32.mrb[3].mxu1  ;;  %v1126_v30 = vadd.f32 %v1125_v26, %v5075_v16  ;;  %v1294_v31 = vadd.f32 %v1293_v27, %v5077_v17  ;;  %v1463_v32 = vmul.f32 %v5091_v24, %v5091_v24 }
 0x11f   : > { %8838 = vst [vmem:[#allocation8_spill] sm:$0xff] %v5099_v28  ;;  %8839 = vst [vmem:[#allocation9_spill] sm:$0xff] %v5101_v29  ;;  %v1547_v33 = vmul.f32 %v5093_v25, %v5093_v25  ;;  %v1464_v34 = vmul.f32 %v5099_v28, %v5099_v28  ;;  %v1548_v35 = vmul.f32 %v5101_v29, %v5101_v29  ;;  %v1297_v36 = vsel %vm1124_vm1, %v5101_v29, 0.0 }
 0x120   : > { %v1129_v37 = vsel %vm1124_vm1, %v5099_v28, 0.0  ;;  %1127 = vadd.xlane.f32.xlu0 %v1126_v30  ;;  %v1298_v38 = vadd.f32 %v1297_v36, %v5093_v25  ;;  %v1629_v40 = vsel %vm1124_vm1, %v1462_v22, 0.0  ;;  %v1797_v41 = vsel %vm1124_vm1, %v1546_v23, 0.0 }
 0x121   : > { %v1130_v39 = vadd.f32 %v1129_v37, %v5091_v24  ;;  %v1633_v42 = vsel %vm1124_vm1, %v1464_v34, 0.0  ;;  %v1801_v43 = vsel %vm1124_vm1, %v1548_v35, 0.0  ;;  %v1630_v44 = vadd.f32 %v1629_v40, %v1461_v20 }
 0x122   : > { %v5123_v45 = vadd.f32 %v1797_v41, %v1545_v21  ;;  %1299 = vadd.xlane.f32.xlu1 %v1298_v38  ;;  %v1634_v46 = vadd.f32 %v1633_v42, %v1463_v32  ;;  %v1802_v47 = vadd.f32 %v1801_v43, %v1547_v33 }
 0x123   : > { %v5125_v48 = vpop.f32.mrb[4].mxu0  ;;  %v5127_v49 = vpop.f32.mrb[4].mxu1 }
 0x124   : > { %8840 = vst [vmem:[#allocation10_spill] sm:$0xff] %v5125_v48  ;;  %8841 = vst [vmem:[#allocation11_spill] sm:$0xff] %v5127_v49  ;;  %1295 = vadd.xlane.f32.xlu0 %v1294_v31  ;;  %v5129_v50 = vpop.f32.mrb[5].mxu0  ;;  %v5131_v51 = vpop.f32.mrb[5].mxu1  ;;  %v1465_v52 = vmul.f32 %v5125_v48, %v5125_v48  ;;  %v1549_v53 = vmul.f32 %v5127_v49, %v5127_v49 }
 0x125   : > { %8842 = vst [vmem:[#allocation12_spill] sm:$0xff] %v5129_v50  ;;  %8843 = vst [vmem:[#allocation13_spill] sm:$0xff] %v5131_v51  ;;  %v1466_v54 = vmul.f32 %v5129_v50, %v5129_v50  ;;  %v5139_v55 = vpop.f32.mrb[6].mxu0  ;;  %v1550_v56 = vmul.f32 %v5131_v51, %v5131_v51  ;;  %v5143_v57 = vpop.f32.mrb[6].mxu1  ;;  %v1133_v58 = vsel %vm1124_vm1, %v5129_v50, 0.0  ;;  %v1301_v59 = vsel %vm1124_vm1, %v5131_v51, 0.0 }
 0x126   : > { %8844 = vst [vmem:[#allocation14_spill] sm:$0xff] %v5139_v55  ;;  %8845 = vst [vmem:[#allocation15_spill] sm:$0xff] %v5143_v57  ;;  %1635 = vadd.xlane.f32.xlu1 %v1634_v46  ;;  %v5149_v60 = vpop.f32.mrb[7].mxu0  ;;  %v5151_v61 = vpop.f32.mrb[7].mxu1  ;;  %v1134_v62 = vadd.f32 %v1133_v58, %v5125_v48  ;;  %v1302_v63 = vadd.f32 %v1301_v59, %v5127_v49  ;;  %v1467_v0 = vmul.f32 %v5139_v55, %v5139_v55 }
 0x127   : > { %8846 = vst [vmem:[#allocation16_spill] sm:$0xff] %v5149_v60  ;;  %8847 = vst [vmem:[#allocation17_spill] sm:$0xff] %v5151_v61  ;;  %v1551_v1 = vmul.f32 %v5143_v57, %v5143_v57  ;;  %v1468_v2 = vmul.f32 %v5149_v60, %v5149_v60  ;;  %v1552_v3 = vmul.f32 %v5151_v61, %v5151_v61  ;;  %v1137_v4 = vsel %vm1124_vm1, %v5149_v60, 0.0 }
 0x128   : > { %v1305_v5 = vsel %vm1124_vm1, %v5151_v61, 0.0  ;;  %1131 = vadd.xlane.f32.xlu0 %v1130_v39  ;;  %v1138_v6 = vadd.f32 %v1137_v4, %v5139_v55  ;;  %v1637_v8 = vsel %vm1124_vm1, %v1466_v54, 0.0  ;;  %v1805_v9 = vsel %vm1124_vm1, %v1550_v56, 0.0 }
 0x129   : > { %v1306_v7 = vadd.f32 %v1305_v5, %v5143_v57  ;;  %v5171_v10 = vadd.f32 %v1637_v8, %v1465_v52  ;;  %v1641_v11 = vsel %vm1124_vm1, %v1468_v2, 0.0  ;;  %v5174_v12 = vadd.f32 %v1805_v9, %v1549_v53 }
 0x12a   : > { %v1809_v13 = vsel %vm1124_vm1, %v1552_v3, 0.0  ;;  %1803 = vadd.xlane.f32.xlu1 %v1802_v47  ;;  %v5177_v14 = vadd.f32 %v1641_v11, %v1467_v0 }
 0x12b   : > { %v5179_v15 = vadd.f32 %v1809_v13, %v1551_v1  ;;  %v5181_v20 = vpop.f32.mrb[8].mxu0  ;;  %v5183_v21 = vpop.f32.mrb[8].mxu1 }
 0x12c   : > { %8848 = vst [vmem:[#allocation18_spill] sm:$0xff] %v5181_v20  ;;  %8849 = vst [vmem:[#allocation19_spill] sm:$0xff] %v5183_v21  ;;  %1631 = vadd.xlane.f32.xlu0 %v1630_v44  ;;  %v5185_v22 = vpop.f32.mrb[9].mxu0  ;;  %v5187_v23 = vpop.f32.mrb[9].mxu1  ;;  %v1469_v26 = vmul.f32 %v5181_v20, %v5181_v20  ;;  %v1553_v27 = vmul.f32 %v5183_v21, %v5183_v21 }
 0x12d   : > { %8850 = vst [vmem:[#allocation20_spill] sm:$0xff] %v5185_v22  ;;  %8851 = vst [vmem:[#allocation21_spill] sm:$0xff] %v5187_v23  ;;  %v1470_v30 = vmul.f32 %v5185_v22, %v5185_v22  ;;  %v5195_v31 = vpop.f32.mrb[10].mxu0  ;;  %v1554_v32 = vmul.f32 %v5187_v23, %v5187_v23  ;;  %v5199_v33 = vpop.f32.mrb[10].mxu1  ;;  %v1141_v34 = vsel %vm1124_vm1, %v5185_v22, 0.0  ;;  %v1309_v35 = vsel %vm1124_vm1, %v5187_v23, 0.0 }
 0x12e   : > { %8852 = vst [vmem:[#allocation22_spill] sm:$0xff] %v5195_v31  ;;  %8853 = vst [vmem:[#allocation23_spill] sm:$0xff] %v5199_v33  ;;  %1135 = vadd.xlane.f32.xlu1 %v1134_v62  ;;  %v5205_v36 = vpop.f32.mrb[11].mxu0  ;;  %v5207_v37 = vpop.f32.mrb[11].mxu1  ;;  %v5210_v38 = vadd.f32 %v1141_v34, %v5181_v20  ;;  %v5213_v39 = vadd.f32 %v1309_v35, %v5183_v21  ;;  %v1471_v40 = vmul.f32 %v5195_v31, %v5195_v31 }
 0x12f   : > { %8854 = vst [vmem:[#allocation24_spill] sm:$0xff] %v5205_v36  ;;  %8855 = vst [vmem:[#allocation25_spill] sm:$0xff] %v5207_v37  ;;  %v1555_v41 = vmul.f32 %v5199_v33, %v5199_v33  ;;  %v1472_v42 = vmul.f32 %v5205_v36, %v5205_v36  ;;  %v1556_v43 = vmul.f32 %v5207_v37, %v5207_v37  ;;  %v1145_v44 = vsel %vm1124_vm1, %v5205_v36, 0.0 }
 0x130   : > { %v1313_v46 = vsel %vm1124_vm1, %v5207_v37, 0.0  ;;  %1799 = vadd.xlane.f32.xlu0 %v5123_v45  ;;  %v5229_v47 = vadd.f32 %v1145_v44, %v5195_v31  ;;  %v1645_v53 = vsel %vm1124_vm1, %v1470_v30, 0.0  ;;  %v1813_v54 = vsel %vm1124_vm1, %v1554_v32, 0.0 }
 0x131   : > { %v5232_v52 = vadd.f32 %v1313_v46, %v5199_v33  ;;  %v5236_v56 = vadd.f32 %v1645_v53, %v1469_v26  ;;  %v1649_v58 = vsel %vm1124_vm1, %v1472_v42, 0.0  ;;  %v5239_v59 = vadd.f32 %v1813_v54, %v1553_v27 }
 0x132   : > { %v1817_v62 = vsel %vm1124_vm1, %v1556_v43, 0.0  ;;  %1139 = vadd.xlane.f32.xlu1 %v1138_v6  ;;  %v5242_v45 = vadd.f32 %v1649_v58, %v1471_v40 }
 0x133   : > { %v5244_v0 = vadd.f32 %v1817_v62, %v1555_v41  ;;  %v5246_v1 = vpop.f32.mrb[12].mxu0  ;;  %v5248_v2 = vpop.f32.mrb[12].mxu1 }
 0x134   : > { %8856 = vst [vmem:[#allocation26_spill] sm:$0xff] %v5246_v1  ;;  %8857 = vst [vmem:[#allocation27_spill] sm:$0xff] %v5248_v2  ;;  %1303 = vadd.xlane.f32.xlu0 %v1302_v63  ;;  %v5250_v3 = vpop.f32.mrb[13].mxu0  ;;  %v5252_v4 = vpop.f32.mrb[13].mxu1  ;;  %v1473_v5 = vmul.f32 %v5246_v1, %v5246_v1  ;;  %v1557_v8 = vmul.f32 %v5248_v2, %v5248_v2 }
 0x135   : > { %8858 = vst [vmem:[#allocation28_spill] sm:$0xff] %v5250_v3  ;;  %8859 = vst [vmem:[#allocation29_spill] sm:$0xff] %v5252_v4  ;;  %v1474_v6 = vmul.f32 %v5250_v3, %v5250_v3  ;;  %v5260_v9 = vpop.f32.mrb[14].mxu0  ;;  %v1558_v11 = vmul.f32 %v5252_v4, %v5252_v4  ;;  %v5264_v13 = vpop.f32.mrb[14].mxu1  ;;  %v1149_v63 = vsel %vm1124_vm1, %v5250_v3, 0.0  ;;  %v1317_v26 = vsel %vm1124_vm1, %v5252_v4, 0.0 }
 0x136   : > { %8860 = vst [vmem:[#allocation30_spill] sm:$0xff] %v5260_v9  ;;  %8861 = vst [vmem:[#allocation31_spill] sm:$0xff] %v5264_v13  ;;  %1307 = vadd.xlane.f32.xlu1 %v1306_v7  ;;  %v5270_v27 = vpop.f32.mrb[15].mxu0  ;;  %v5272_v30 = vpop.f32.mrb[15].mxu1  ;;  %v5275_v32 = vadd.f32 %v1149_v63, %v5246_v1  ;;  %v5278_v34 = vadd.f32 %v1317_v26, %v5248_v2  ;;  %v1475_v35 = vmul.f32 %v5260_v9, %v5260_v9 }
 0x137   : > { %8862 = vst [vmem:[#allocation32_spill] sm:$0xff] %v5270_v27  ;;  %8863 = vst [vmem:[#allocation33_spill] sm:$0xff] %v5272_v30  ;;  %v1559_v40 = vmul.f32 %v5264_v13, %v5264_v13  ;;  %v1476_v41 = vmul.f32 %v5270_v27, %v5270_v27  ;;  %v1560_v7 = vmul.f32 %v5272_v30, %v5272_v30  ;;  %v1153_v42 = vsel %vm1124_vm1, %v5270_v27, 0.0 }
 0x138   : > { %v1321_v43 = vsel %vm1124_vm1, %v5272_v30, 0.0  ;;  %1639 = vadd.xlane.f32.xlu0 %v5171_v10  ;;  %v5294_v44 = vadd.f32 %v1153_v42, %v5260_v9  ;;  %v1653_v53 = vsel %vm1124_vm1, %v1474_v6, 0.0  ;;  %v1821_v54 = vsel %vm1124_vm1, %v1558_v11, 0.0 }
 0x139   : > { %v5297_v46 = vadd.f32 %v1321_v43, %v5264_v13  ;;  %v5301_v58 = vadd.f32 %v1653_v53, %v1473_v5  ;;  %v1657_v62 = vsel %vm1124_vm1, %v1476_v41, 0.0  ;;  %v5304_v63 = vadd.f32 %v1821_v54, %v1557_v8 }
 0x13a   : > { %v1825_v26 = vsel %vm1124_vm1, %v1560_v7, 0.0  ;;  %1643 = vadd.xlane.f32.xlu1 %v5177_v14  ;;  %v5308_v10 = vadd.f32 %v1657_v62, %v1475_v35 }
 0x13b   : > { %v5310_v42 = vadd.f32 %v1825_v26, %v1559_v40  ;;  %v5312_v43 = vpop.f32.mrb[16].mxu0  ;;  %v5314_v4 = vpop.f32.mrb[16].mxu1 }
 0x13c   : > { %8864 = vst [vmem:[#allocation34_spill] sm:$0xff] %v5312_v43  ;;  %8865 = vst [vmem:[#allocation35_spill] sm:$0xff] %v5314_v4  ;;  %1807 = vadd.xlane.f32.xlu0 %v5174_v12  ;;  %v5317_v5 = vpop.f32.mrb[17].mxu0  ;;  %v5319_v6 = vpop.f32.mrb[17].mxu1  ;;  %v1477_v8 = vmul.f32 %v5312_v43, %v5312_v43  ;;  %v1561_v14 = vmul.f32 %v5314_v4, %v5314_v4 }
 0x13d   : > { %8866 = vst [vmem:[#allocation36_spill] sm:$0xff] %v5317_v5  ;;  %8867 = vst [vmem:[#allocation37_spill] sm:$0xff] %v5319_v6  ;;  %v1478_v11 = vmul.f32 %v5317_v5, %v5317_v5  ;;  %v5327_v35 = vpop.f32.mrb[18].mxu0  ;;  %v1562_v40 = vmul.f32 %v5319_v6, %v5319_v6  ;;  %v5331_v41 = vpop.f32.mrb[18].mxu1  ;;  %v1157_v12 = vsel %vm1124_vm1, %v5317_v5, 0.0  ;;  %v1325_v7 = vsel %vm1124_vm1, %v5319_v6, 0.0 }
 0x13e   : > { %8868 = vst [vmem:[#allocation38_spill] sm:$0xff] %v5327_v35  ;;  %8869 = vst [vmem:[#allocation39_spill] sm:$0xff] %v5331_v41  ;;  %1811 = vadd.xlane.f32.xlu1 %v5179_v15  ;;  %v5338_v53 = vpop.f32.mrb[19].mxu0  ;;  %v5340_v54 = vpop.f32.mrb[19].mxu1  ;;  %v5343_v62 = vadd.f32 %v1157_v12, %v5312_v43  ;;  %v5346_v26 = vadd.f32 %v1325_v7, %v5314_v4  ;;  %v1479_v2 = vmul.f32 %v5327_v35, %v5327_v35 }
 0x13f   : > { %8870 = vst [vmem:[#allocation40_spill] sm:$0xff] %v5338_v53  ;;  %8871 = vst [vmem:[#allocation41_spill] sm:$0xff] %v5340_v54  ;;  %v1563_v23 = vmul.f32 %v5331_v41, %v5331_v41  ;;  %v1480_v6 = vmul.f32 %v5338_v53, %v5338_v53  ;;  %v1564_v15 = vmul.f32 %v5340_v54, %v5340_v54  ;;  %v1161_v21 = vsel %vm1124_vm1, %v5338_v53, 0.0 }
 0x140   : > { %v1329_v12 = vsel %vm1124_vm1, %v5340_v54, 0.0  ;;  %1143 = vadd.xlane.f32.xlu0 %v5210_v38  ;;  %v5362_v7 = vadd.f32 %v1161_v21, %v5327_v35  ;;  %v1661_v51 = vsel %vm1124_vm1, %v1478_v11, 0.0  ;;  %v1829_v49 = vsel %vm1124_vm1, %v1562_v40, 0.0 }
 0x141   : > { %v5365_v4 = vadd.f32 %v1329_v12, %v5331_v41  ;;  %v5369_v19 = vadd.f32 %v1661_v51, %v1477_v8  ;;  %v1665_v17 = vsel %vm1124_vm1, %v1480_v6, 0.0  ;;  %v5372_v30 = vadd.f32 %v1829_v49, %v1561_v14 }
 0x142   : > { %v1833_v54 = vsel %vm1124_vm1, %v1564_v15, 0.0  ;;  %1147 = vadd.xlane.f32.xlu1 %v5229_v47  ;;  %v5376_v38 = vadd.f32 %v1665_v17, %v1479_v2 }
 0x143   : > { %v5378_v21 = vadd.f32 %v1833_v54, %v1563_v23  ;;  %v5380_v12 = vpop.f32.mrb[20].mxu0  ;;  %v5382_v41 = vpop.f32.mrb[20].mxu1 }
 0x144   : > { %8872 = vst [vmem:[#allocation42_spill] sm:$0xff] %v5380_v12  ;;  %8873 = vst [vmem:[#allocation43_spill] sm:$0xff] %v5382_v41  ;;  %1311 = vadd.xlane.f32.xlu0 %v5213_v39  ;;  %v5385_v51 = vpop.f32.mrb[21].mxu0  ;;  %v5387_v8 = vpop.f32.mrb[21].mxu1  ;;  %v1481_v49 = vmul.f32 %v5380_v12, %v5380_v12  ;;  %v1565_v47 = vmul.f32 %v5382_v41, %v5382_v41 }
 0x145   : > { %8874 = vst [vmem:[#allocation44_spill] sm:$0xff] %v5385_v51  ;;  %8875 = vst [vmem:[#allocation45_spill] sm:$0xff] %v5387_v8  ;;  %v1482_v17 = vmul.f32 %v5385_v51, %v5385_v51  ;;  %v5395_v23 = vpop.f32.mrb[22].mxu0  ;;  %v1566_v2 = vmul.f32 %v5387_v8, %v5387_v8  ;;  %v5399_v6 = vpop.f32.mrb[22].mxu1  ;;  %v1165_v39 = vsel %vm1124_vm1, %v5385_v51, 0.0  ;;  %v1333_v14 = vsel %vm1124_vm1, %v5387_v8, 0.0 }
 0x146   : > { %8876 = vst [vmem:[#allocation46_spill] sm:$0xff] %v5395_v23  ;;  %8877 = vst [vmem:[#allocation47_spill] sm:$0xff] %v5399_v6  ;;  %1315 = vadd.xlane.f32.xlu1 %v5232_v52  ;;  %v5406_v11 = vpop.f32.mrb[23].mxu0  ;;  %v5408_v40 = vpop.f32.mrb[23].mxu1  ;;  %v5411_v54 = vadd.f32 %v1165_v39, %v5380_v12  ;;  %v5414_v15 = vadd.f32 %v1333_v14, %v5382_v41  ;;  %v1483_v13 = vmul.f32 %v5395_v23, %v5395_v23 }
 0x147   : > { %8878 = vst [vmem:[#allocation48_spill] sm:$0xff] %v5406_v11  ;;  %8879 = vst [vmem:[#allocation49_spill] sm:$0xff] %v5408_v40  ;;  %v1567_v37 = vmul.f32 %v5399_v6, %v5399_v6  ;;  %v1484_v8 = vmul.f32 %v5406_v11, %v5406_v11  ;;  %v1568_v52 = vmul.f32 %v5408_v40, %v5408_v40  ;;  %v1169_v33 = vsel %vm1124_vm1, %v5406_v11, 0.0 }
 0x148   : > { %v1337_v39 = vsel %vm1124_vm1, %v5408_v40, 0.0  ;;  %1647 = vadd.xlane.f32.xlu0 %v5236_v56  ;;  %v5430_v14 = vadd.f32 %v1169_v33, %v5395_v23  ;;  %v1669_v61 = vsel %vm1124_vm1, %v1482_v17, 0.0  ;;  %v1837_v57 = vsel %vm1124_vm1, %v1566_v2, 0.0 }
 0x149   : > { %v5433_v41 = vadd.f32 %v1337_v39, %v5399_v6  ;;  %v5437_v29 = vadd.f32 %v1669_v61, %v1481_v49  ;;  %v1673_v25 = vsel %vm1124_vm1, %v1484_v8, 0.0  ;;  %v5440_v51 = vadd.f32 %v1837_v57, %v1565_v47 }
 0x14a   : > { %v1841_v40 = vsel %vm1124_vm1, %v1568_v52, 0.0  ;;  %1651 = vadd.xlane.f32.xlu1 %v5242_v45  ;;  %v5444_v56 = vadd.f32 %v1673_v25, %v1483_v13 }
 0x14b   : > { %v5446_v33 = vadd.f32 %v1841_v40, %v1567_v37  ;;  %v5448_v39 = vpop.f32.mrb[24].mxu0  ;;  %v5450_v6 = vpop.f32.mrb[24].mxu1 }
 0x14c   : > { %8880 = vst [vmem:[#allocation50_spill] sm:$0xff] %v5448_v39  ;;  %8881 = vst [vmem:[#allocation51_spill] sm:$0xff] %v5450_v6  ;;  %1815 = vadd.xlane.f32.xlu0 %v5239_v59  ;;  %v5453_v61 = vpop.f32.mrb[25].mxu0  ;;  %v5455_v49 = vpop.f32.mrb[25].mxu1  ;;  %v1485_v57 = vmul.f32 %v5448_v39, %v5448_v39  ;;  %v1569_v45 = vmul.f32 %v5450_v6, %v5450_v6 }
 0x14d   : > { %8882 = vst [vmem:[#allocation52_spill] sm:$0xff] %v5453_v61  ;;  %8883 = vst [vmem:[#allocation53_spill] sm:$0xff] %v5455_v49  ;;  %v1486_v25 = vmul.f32 %v5453_v61, %v5453_v61  ;;  %v5463_v37 = vpop.f32.mrb[26].mxu0  ;;  %v1570_v13 = vmul.f32 %v5455_v49, %v5455_v49  ;;  %v5467_v8 = vpop.f32.mrb[26].mxu1  ;;  %v1173_v59 = vsel %vm1124_vm1, %v5453_v61, 0.0  ;;  %v1341_v47 = vsel %vm1124_vm1, %v5455_v49, 0.0 }
 0x14e   : > { %8884 = vst [vmem:[#allocation54_spill] sm:$0xff] %v5463_v37  ;;  %8885 = vst [vmem:[#allocation55_spill] sm:$0xff] %v5467_v8  ;;  %1819 = vadd.xlane.f32.xlu1 %v5244_v0  ;;  %v5474_v17 = vpop.f32.mrb[27].mxu0  ;;  %v5476_v2 = vpop.f32.mrb[27].mxu1  ;;  %v5479_v40 = vadd.f32 %v1173_v59, %v5448_v39  ;;  %v5482_v52 = vadd.f32 %v1341_v47, %v5450_v6  ;;  %v1487_v12 = vmul.f32 %v5463_v37, %v5463_v37 }
 0x14f   : > { %8886 = vst [vmem:[#allocation56_spill] sm:$0xff] %v5474_v17  ;;  %8887 = vst [vmem:[#allocation57_spill] sm:$0xff] %v5476_v2  ;;  %v1571_v61 = vmul.f32 %v5467_v8, %v5467_v8  ;;  %v1488_v49 = vmul.f32 %v5474_v17, %v5474_v17  ;;  %v1572_v0 = vmul.f32 %v5476_v2, %v5476_v2  ;;  %v1177_v5 = vsel %vm1124_vm1, %v5474_v17, 0.0 }
 0x150   : > { %v1345_v59 = vsel %vm1124_vm1, %v5476_v2, 0.0  ;;  %1151 = vadd.xlane.f32.xlu0 %v5275_v32  ;;  %v5498_v47 = vadd.f32 %v1177_v5, %v5463_v37  ;;  %v1677_v39 = vsel %vm1124_vm1, %v1486_v25, 0.0  ;;  %v1845_v43 = vsel %vm1124_vm1, %v1570_v13, 0.0 }
 0x151   : > { %v5501_v6 = vadd.f32 %v1345_v59, %v5467_v8  ;;  %v5505_v11 = vadd.f32 %v1677_v39, %v1485_v57  ;;  %v1681_v23 = vsel %vm1124_vm1, %v1488_v49, 0.0  ;;  %v5508_v17 = vadd.f32 %v1845_v43, %v1569_v45 }
 0x152   : > { %v1849_v2 = vsel %vm1124_vm1, %v1572_v0, 0.0  ;;  %1155 = vadd.xlane.f32.xlu1 %v5294_v44  ;;  %v5512_v32 = vadd.f32 %v1681_v23, %v1487_v12 }
 0x153   : > { %v5514_v5 = vadd.f32 %v1849_v2, %v1571_v61  ;;  %v5516_v59 = vpop.f32.mrb[28].mxu0  ;;  %v5518_v8 = vpop.f32.mrb[28].mxu1 }
 0x154   : > { %8888 = vst [vmem:[#allocation58_spill] sm:$0xff] %v5516_v59  ;;  %8889 = vst [vmem:[#allocation59_spill] sm:$0xff] %v5518_v8  ;;  %1319 = vadd.xlane.f32.xlu0 %v5278_v34  ;;  %v5521_v39 = vpop.f32.mrb[29].mxu0  ;;  %v5523_v57 = vpop.f32.mrb[29].mxu1  ;;  %v1489_v43 = vmul.f32 %v5516_v59, %v5516_v59  ;;  %v1573_v44 = vmul.f32 %v5518_v8, %v5518_v8 }
 0x155   : > { %8890 = vst [vmem:[#allocation60_spill] sm:$0xff] %v5521_v39  ;;  %8891 = vst [vmem:[#allocation61_spill] sm:$0xff] %v5523_v57  ;;  %v1490_v12 = vmul.f32 %v5521_v39, %v5521_v39  ;;  %v5531_v23 = vpop.f32.mrb[30].mxu0  ;;  %v1574_v61 = vmul.f32 %v5523_v57, %v5523_v57  ;;  %v5535_v49 = vpop.f32.mrb[30].mxu1  ;;  %v1181_v34 = vsel %vm1124_vm1, %v5521_v39, 0.0  ;;  %v1349_v45 = vsel %vm1124_vm1, %v5523_v57, 0.0 }
 0x156   : > { %8892 = vst [vmem:[#allocation62_spill] sm:$0xff] %v5531_v23  ;;  %8893 = vst [vmem:[#allocation63_spill] sm:$0xff] %v5535_v49  ;;  %1323 = vadd.xlane.f32.xlu1 %v5297_v46  ;;  %v5542_v25 = vpop.f32.mrb[31].mxu0  ;;  %v5544_v13 = vpop.f32.mrb[31].mxu1  ;;  %v5547_v2 = vadd.f32 %v1181_v34, %v5516_v59  ;;  %v5550_v0 = vadd.f32 %v1349_v45, %v5518_v8  ;;  %v1491_v37 = vmul.f32 %v5531_v23, %v5531_v23 }
 0x157   : > { %8894 = vst [vmem:[#allocation64_spill] sm:$0xff] %v5542_v25  ;;  %8895 = vst [vmem:[#allocation65_spill] sm:$0xff] %v5544_v13  ;;  %v1575_v39 = vmul.f32 %v5535_v49, %v5535_v49  ;;  %v1492_v57 = vmul.f32 %v5542_v25, %v5542_v25  ;;  %v1576_v46 = vmul.f32 %v5544_v13, %v5544_v13  ;;  %v1185_v3 = vsel %vm1124_vm1, %v5542_v25, 0.0 }
 0x158   : > { %v1353_v34 = vsel %vm1124_vm1, %v5544_v13, 0.0  ;;  %1655 = vadd.xlane.f32.xlu0 %v5301_v58  ;;  %v5566_v45 = vadd.f32 %v1185_v3, %v5531_v23  ;;  %v1685_v59 = vsel %vm1124_vm1, %v1490_v12, 0.0  ;;  %v1853_v1 = vsel %vm1124_vm1, %v1574_v61, 0.0 }
 0x159   : > { %v5569_v8 = vadd.f32 %v1353_v34, %v5535_v49  ;;  %v5573_v27 = vadd.f32 %v1685_v59, %v1489_v43  ;;  %v1689_v9 = vsel %vm1124_vm1, %v1492_v57, 0.0  ;;  %v5576_v25 = vadd.f32 %v1853_v1, %v1573_v44 }
 0x15a   : > { %v1857_v13 = vsel %vm1124_vm1, %v1576_v46, 0.0  ;;  %1659 = vadd.xlane.f32.xlu1 %v5308_v10  ;;  %v5580_v58 = vadd.f32 %v1689_v9, %v1491_v37 }
 0x15b   : > { %v5582_v3 = vadd.f32 %v1857_v13, %v1575_v39  ;;  %v5584_v34 = vpop.f32.mrb[32].mxu0  ;;  %v5586_v49 = vpop.f32.mrb[32].mxu1 }
 0x15c   : > { %8896 = vst [vmem:[#allocation66_spill] sm:$0xff] %v5584_v34  ;;  %8897 = vst [vmem:[#allocation67_spill] sm:$0xff] %v5586_v49  ;;  %1823 = vadd.xlane.f32.xlu0 %v5304_v63  ;;  %v5589_v59 = vpop.f32.mrb[33].mxu0  ;;  %v5591_v43 = vpop.f32.mrb[33].mxu1  ;;  %v1493_v1 = vmul.f32 %v5584_v34, %v5584_v34  ;;  %v1577_v10 = vmul.f32 %v5586_v49, %v5586_v49 }
 0x15d   : > { %8898 = vst [vmem:[#allocation68_spill] sm:$0xff] %v5589_v59  ;;  %8899 = vst [vmem:[#allocation69_spill] sm:$0xff] %v5591_v43  ;;  %v1494_v9 = vmul.f32 %v5589_v59, %v5589_v59  ;;  %v5599_v37 = vpop.f32.mrb[34].mxu0  ;;  %v1578_v39 = vmul.f32 %v5591_v43, %v5591_v43  ;;  %v5603_v57 = vpop.f32.mrb[34].mxu1  ;;  %v1189_v63 = vsel %vm1124_vm1, %v5589_v59, 0.0  ;;  %v1357_v44 = vsel %vm1124_vm1, %v5591_v43, 0.0 }
 0x15e   : > { %8900 = vst [vmem:[#allocation70_spill] sm:$0xff] %v5599_v37  ;;  %8901 = vst [vmem:[#allocation71_spill] sm:$0xff] %v5603_v57  ;;  %1827 = vadd.xlane.f32.xlu1 %v5310_v42  ;;  %v5610_v12 = vpop.f32.mrb[35].mxu0  ;;  %v5612_v61 = vpop.f32.mrb[35].mxu1  ;;  %v5615_v13 = vadd.f32 %v1189_v63, %v5584_v34  ;;  %v5618_v46 = vadd.f32 %v1357_v44, %v5586_v49  ;;  %v1495_v23 = vmul.f32 %v5599_v37, %v5599_v37 }
 0x15f   : > { %8902 = vst [vmem:[#allocation72_spill] sm:$0xff] %v5610_v12  ;;  %8903 = vst [vmem:[#allocation73_spill] sm:$0xff] %v5612_v61  ;;  %v1579_v59 = vmul.f32 %v5603_v57, %v5603_v57  ;;  %v1496_v43 = vmul.f32 %v5610_v12, %v5610_v12  ;;  %v1580_v42 = vmul.f32 %v5612_v61, %v5612_v61  ;;  %v1193_v53 = vsel %vm1124_vm1, %v5610_v12, 0.0 }
 0x160   : > { %v1361_v63 = vsel %vm1124_vm1, %v5612_v61, 0.0  ;;  %1159 = vadd.xlane.f32.xlu0 %v5343_v62  ;;  %v5634_v44 = vadd.f32 %v1193_v53, %v5599_v37  ;;  %v1693_v34 = vsel %vm1124_vm1, %v1494_v9, 0.0  ;;  %v1861_v35 = vsel %vm1124_vm1, %v1578_v39, 0.0 }
 0x161   : > { %v5637_v49 = vadd.f32 %v1361_v63, %v5603_v57  ;;  %v5641_v22 = vadd.f32 %v1693_v34, %v1493_v1  ;;  %v1697_v20 = vsel %vm1124_vm1, %v1496_v43, 0.0  ;;  %v5644_v12 = vadd.f32 %v1861_v35, %v1577_v10 }
 0x162   : > { %v1865_v61 = vsel %vm1124_vm1, %v1580_v42, 0.0  ;;  %1163 = vadd.xlane.f32.xlu1 %v5362_v7  ;;  %v5648_v62 = vadd.f32 %v1697_v20, %v1495_v23 }
 0x163   : > { %v5650_v53 = vadd.f32 %v1865_v61, %v1579_v59  ;;  %v5652_v63 = vpop.f32.mrb[36].mxu0  ;;  %v5654_v57 = vpop.f32.mrb[36].mxu1 }
 0x164   : > { %8904 = vst [vmem:[#allocation74_spill] sm:$0xff] %v5652_v63  ;;  %8905 = vst [vmem:[#allocation75_spill] sm:$0xff] %v5654_v57  ;;  %1327 = vadd.xlane.f32.xlu0 %v5346_v26  ;;  %v5657_v34 = vpop.f32.mrb[37].mxu0  ;;  %v5659_v1 = vpop.f32.mrb[37].mxu1  ;;  %v1497_v35 = vmul.f32 %v5652_v63, %v5652_v63  ;;  %v1581_v7 = vmul.f32 %v5654_v57, %v5654_v57 }
 0x165   : > { %8906 = vst [vmem:[#allocation76_spill] sm:$0xff] %v5657_v34  ;;  %8907 = vst [vmem:[#allocation77_spill] sm:$0xff] %v5659_v1  ;;  %v1498_v20 = vmul.f32 %v5657_v34, %v5657_v34  ;;  %v5667_v23 = vpop.f32.mrb[38].mxu0  ;;  %v1582_v59 = vmul.f32 %v5659_v1, %v5659_v1  ;;  %v5671_v43 = vpop.f32.mrb[38].mxu1  ;;  %v1197_v26 = vsel %vm1124_vm1, %v5657_v34, 0.0  ;;  %v1365_v10 = vsel %vm1124_vm1, %v5659_v1, 0.0 }
 0x166   : > { %8908 = vst [vmem:[#allocation78_spill] sm:$0xff] %v5667_v23  ;;  %8909 = vst [vmem:[#allocation79_spill] sm:$0xff] %v5671_v43  ;;  %1331 = vadd.xlane.f32.xlu1 %v5365_v4  ;;  %v5678_v9 = vpop.f32.mrb[39].mxu0  ;;  %v5680_v39 = vpop.f32.mrb[39].mxu1  ;;  %v5683_v61 = vadd.f32 %v1197_v26, %v5652_v63  ;;  %v5686_v42 = vadd.f32 %v1365_v10, %v5654_v57  ;;  %v1499_v37 = vmul.f32 %v5667_v23, %v5667_v23 }
 0x167   : > { %8910 = vst [vmem:[#allocation80_spill] sm:$0xff] %v5678_v9  ;;  %8911 = vst [vmem:[#allocation81_spill] sm:$0xff] %v5680_v39  ;;  %v1583_v34 = vmul.f32 %v5671_v43, %v5671_v43  ;;  %v1500_v1 = vmul.f32 %v5678_v9, %v5678_v9  ;;  %v1584_v4 = vmul.f32 %v5680_v39, %v5680_v39  ;;  %v1201_v36 = vsel %vm1124_vm1, %v5678_v9, 0.0 }
 0x168   : > { %v1369_v26 = vsel %vm1124_vm1, %v5680_v39, 0.0  ;;  %1663 = vadd.xlane.f32.xlu0 %v5369_v19  ;;  %v5702_v10 = vadd.f32 %v1201_v36, %v5667_v23  ;;  %v1701_v63 = vsel %vm1124_vm1, %v1498_v20, 0.0  ;;  %v1869_v31 = vsel %vm1124_vm1, %v1582_v59, 0.0 }
 0x169   : > { %v5705_v57 = vadd.f32 %v1369_v26, %v5671_v43  ;;  %v5709_v50 = vadd.f32 %v1701_v63, %v1497_v35  ;;  %v1705_v48 = vsel %vm1124_vm1, %v1500_v1, 0.0  ;;  %v5712_v9 = vadd.f32 %v1869_v31, %v1581_v7 }
 0x16a   : > { %v1873_v39 = vsel %vm1124_vm1, %v1584_v4, 0.0  ;;  %1667 = vadd.xlane.f32.xlu1 %v5376_v38  ;;  %v5716_v19 = vadd.f32 %v1705_v48, %v1499_v37 }
 0x16b   : > { %v5718_v36 = vadd.f32 %v1873_v39, %v1583_v34  ;;  %v5720_v26 = vpop.f32.mrb[40].mxu0  ;;  %v5722_v43 = vpop.f32.mrb[40].mxu1 }
 0x16c   : > { %8912 = vst [vmem:[#allocation82_spill] sm:$0xff] %v5720_v26  ;;  %8913 = vst [vmem:[#allocation83_spill] sm:$0xff] %v5722_v43  ;;  %1831 = vadd.xlane.f32.xlu0 %v5372_v30  ;;  %v5725_v63 = vpop.f32.mrb[41].mxu0  ;;  %v5727_v35 = vpop.f32.mrb[41].mxu1  ;;  %v1501_v31 = vmul.f32 %v5720_v26, %v5720_v26  ;;  %v1585_v38 = vmul.f32 %v5722_v43, %v5722_v43 }
 0x16d   : > { %8914 = vst [vmem:[#allocation84_spill] sm:$0xff] %v5725_v63  ;;  %8915 = vst [vmem:[#allocation85_spill] sm:$0xff] %v5727_v35  ;;  %v1502_v48 = vmul.f32 %v5725_v63, %v5725_v63  ;;  %v5735_v37 = vpop.f32.mrb[42].mxu0  ;;  %v1586_v34 = vmul.f32 %v5727_v35, %v5727_v35  ;;  %v5739_v1 = vpop.f32.mrb[42].mxu1  ;;  %v1205_v30 = vsel %vm1124_vm1, %v5725_v63, 0.0  ;;  %v1373_v7 = vsel %vm1124_vm1, %v5727_v35, 0.0 }
 0x16e   : > { %8916 = vst [vmem:[#allocation86_spill] sm:$0xff] %v5735_v37  ;;  %8917 = vst [vmem:[#allocation87_spill] sm:$0xff] %v5739_v1  ;;  %1835 = vadd.xlane.f32.xlu1 %v5378_v21  ;;  %v5746_v20 = vpop.f32.mrb[43].mxu0  ;;  %v5748_v59 = vpop.f32.mrb[43].mxu1  ;;  %v5751_v39 = vadd.f32 %v1205_v30, %v5720_v26  ;;  %v5754_v4 = vadd.f32 %v1373_v7, %v5722_v43  ;;  %v1503_v23 = vmul.f32 %v5735_v37, %v5735_v37 }
 0x16f   : > { %8918 = vst [vmem:[#allocation88_spill] sm:$0xff] %v5746_v20  ;;  %8919 = vst [vmem:[#allocation89_spill] sm:$0xff] %v5748_v59  ;;  %v1587_v63 = vmul.f32 %v5739_v1, %v5739_v1  ;;  %v1504_v35 = vmul.f32 %v5746_v20, %v5746_v20  ;;  %v1588_v21 = vmul.f32 %v5748_v59, %v5748_v59  ;;  %v1209_v60 = vsel %vm1124_vm1, %v5746_v20, 0.0 }
 0x170   : > { %v1377_v30 = vsel %vm1124_vm1, %v5748_v59, 0.0  ;;  %1167 = vadd.xlane.f32.xlu0 %v5411_v54  ;;  %v5770_v7 = vadd.f32 %v1209_v60, %v5735_v37  ;;  %v1709_v26 = vsel %vm1124_vm1, %v1502_v48, 0.0  ;;  %v1877_v55 = vsel %vm1124_vm1, %v1586_v34, 0.0 }
 0x171   : > { %v5773_v43 = vadd.f32 %v1377_v30, %v5739_v1  ;;  %v5777_v28 = vadd.f32 %v1709_v26, %v1501_v31  ;;  %v1713_v24 = vsel %vm1124_vm1, %v1504_v35, 0.0  ;;  %v5780_v20 = vadd.f32 %v1877_v55, %v1585_v38 }
 0x172   : > { %v1881_v59 = vsel %vm1124_vm1, %v1588_v21, 0.0  ;;  %1171 = vadd.xlane.f32.xlu1 %v5430_v14  ;;  %v5784_v54 = vadd.f32 %v1713_v24, %v1503_v23 }
 0x173   : > { %v5786_v60 = vadd.f32 %v1881_v59, %v1587_v63  ;;  %v5788_v30 = vpop.f32.mrb[44].mxu0  ;;  %v5790_v1 = vpop.f32.mrb[44].mxu1 }
 0x174   : > { %8920 = vst [vmem:[#allocation90_spill] sm:$0xff] %v5788_v30  ;;  %8921 = vst [vmem:[#allocation91_spill] sm:$0xff] %v5790_v1  ;;  %1335 = vadd.xlane.f32.xlu0 %v5414_v15  ;;  %v5793_v26 = vpop.f32.mrb[45].mxu0  ;;  %v5795_v31 = vpop.f32.mrb[45].mxu1  ;;  %v1505_v55 = vmul.f32 %v5788_v30, %v5788_v30  ;;  %v1589_v14 = vmul.f32 %v5790_v1, %v5790_v1 }
 0x175   : > { %8922 = vst [vmem:[#allocation92_spill] sm:$0xff] %v5793_v26  ;;  %8923 = vst [vmem:[#allocation93_spill] sm:$0xff] %v5795_v31  ;;  %v1506_v24 = vmul.f32 %v5793_v26, %v5793_v26  ;;  %v5803_v23 = vpop.f32.mrb[46].mxu0  ;;  %v1590_v63 = vmul.f32 %v5795_v31, %v5795_v31  ;;  %v5807_v35 = vpop.f32.mrb[46].mxu1  ;;  %v1213_v15 = vsel %vm1124_vm1, %v5793_v26, 0.0  ;;  %v1381_v38 = vsel %vm1124_vm1, %v5795_v31, 0.0 }
 0x176   : > { %8924 = vst [vmem:[#allocation94_spill] sm:$0xff] %v5803_v23  ;;  %8925 = vst [vmem:[#allocation95_spill] sm:$0xff] %v5807_v35  ;;  %1339 = vadd.xlane.f32.xlu1 %v5433_v41  ;;  %v5814_v48 = vpop.f32.mrb[47].mxu0  ;;  %v5816_v34 = vpop.f32.mrb[47].mxu1  ;;  %v5819_v59 = vadd.f32 %v1213_v15, %v5788_v30  ;;  %v5822_v21 = vadd.f32 %v1381_v38, %v5790_v1  ;;  %v1507_v37 = vmul.f32 %v5803_v23, %v5803_v23 }
 0x177   : > { %8926 = vst [vmem:[#allocation96_spill] sm:$0xff] %v5814_v48  ;;  %8927 = vst [vmem:[#allocation97_spill] sm:$0xff] %v5816_v34  ;;  %v1591_v26 = vmul.f32 %v5807_v35, %v5807_v35  ;;  %v1508_v31 = vmul.f32 %v5814_v48, %v5814_v48  ;;  %v1592_v41 = vmul.f32 %v5816_v34, %v5816_v34  ;;  %v1217_v18 = vsel %vm1124_vm1, %v5814_v48, 0.0 }
 0x178   : > { %8928 = vst [vmem:[#allocation98_spill] sm:$0xff] %v5819_v59  ;;  %8929 = vst [vmem:[#allocation99_spill] sm:$0xff] %v5822_v21  ;;  %v1385_v15 = vsel %vm1124_vm1, %v5816_v34, 0.0  ;;  %1671 = vadd.xlane.f32.xlu0 %v5437_v29  ;;  %v5838_v38 = vadd.f32 %v1217_v18, %v5803_v23  ;;  %v1717_v30 = vsel %vm1124_vm1, %v1506_v24, 0.0  ;;  %v1885_v16 = vsel %vm1124_vm1, %v1590_v63, 0.0 }
 0x179   : > { %v5841_v1 = vadd.f32 %v1385_v15, %v5807_v35  ;;  %v5845_v21 = vadd.f32 %v1717_v30, %v1505_v55  ;;  %v1721_v59 = vsel %vm1124_vm1, %v1508_v31, 0.0  ;;  %v5848_v48 = vadd.f32 %v1885_v16, %v1589_v14 }
 0x17a   : > { %v1889_v34 = vsel %vm1124_vm1, %v1592_v41, 0.0  ;;  %1675 = vadd.xlane.f32.xlu1 %v5444_v56  ;;  %v5852_v29 = vadd.f32 %v1721_v59, %v1507_v37 }
 0x17b   : > { %8930 = vst [vmem:[#allocation100_spill] sm:$0xff] %v5848_v48  ;;  %v5854_v18 = vadd.f32 %v1889_v34, %v1591_v26  ;;  %v5856_v15 = vpop.f32.mrb[48].mxu0  ;;  %v5858_v35 = vpop.f32.mrb[48].mxu1 }
 0x17c   : > { %8932 = vst [vmem:[#allocation102_spill] sm:$0xff] %v5856_v15  ;;  %8933 = vst [vmem:[#allocation103_spill] sm:$0xff] %v5858_v35  ;;  %1839 = vadd.xlane.f32.xlu0 %v5440_v51  ;;  %v1509_v30 = vmul.f32 %v5856_v15, %v5856_v15  ;;  %v5863_v31 = vpop.f32.mrb[49].mxu0  ;;  %v1593_v16 = vmul.f32 %v5858_v35, %v5858_v35  ;;  %v5867_v55 = vpop.f32.mrb[49].mxu1 }
 0x17d   : > { %8931 = vst [vmem:[#allocation101_spill] sm:$0xff] %v5854_v18  ;;  %8934 = vst [vmem:[#allocation104_spill] sm:$0xff] %v5863_v31  ;;  %v1510_v56 = vmul.f32 %v5863_v31, %v5863_v31  ;;  %v5871_v37 = vpop.f32.mrb[50].mxu0  ;;  %v1389_v26 = vsel %vm1124_vm1, %v5867_v55, 0.0  ;;  %v1594_v51 = vmul.f32 %v5867_v55, %v5867_v55  ;;  %v5877_v14 = vpop.f32.mrb[50].mxu1  ;;  %v1221_v24 = vsel %vm1124_vm1, %v5863_v31, 0.0 }
 0x17e   : > { %8935 = vst [vmem:[#allocation105_spill] sm:$0xff] %v5867_v55  ;;  %8936 = vst [vmem:[#allocation106_spill] sm:$0xff] %v5871_v37  ;;  %1843 = vadd.xlane.f32.xlu1 %v5446_v33  ;;  %v1511_v63 = vmul.f32 %v5871_v37, %v5871_v37  ;;  %v5884_v34 = vpop.f32.mrb[51].mxu0  ;;  %v1595_v59 = vmul.f32 %v5877_v14, %v5877_v14  ;;  %v5888_v41 = vpop.f32.mrb[51].mxu1  ;;  %v5891_v23 = vadd.f32 %v1221_v24, %v5856_v15 }
 0x17f   : > { %8937 = vst [vmem:[#allocation107_spill] sm:$0xff] %v5877_v14  ;;  %8938 = vst [vmem:[#allocation108_spill] sm:$0xff] %v5884_v34  ;;  %v5894_v55 = vadd.f32 %v1389_v26, %v5858_v35  ;;  %v1512_v31 = vmul.f32 %v5884_v34, %v5884_v34  ;;  %v1393_v33 = vsel %vm1124_vm1, %v5888_v41, 0.0  ;;  %v1596_v18 = vmul.f32 %v5888_v41, %v5888_v41 }
 0x180   : > { %8939 = vst [vmem:[#allocation109_spill] sm:$0xff] %v5888_v41  ;;  %8940 = vst [vmem:[#allocation110_spill] sm:$0xff] %v5891_v23  ;;  %v1225_v48 = vsel %vm1124_vm1, %v5884_v34, 0.0  ;;  %1175 = vadd.xlane.f32.xlu0 %v5479_v40  ;;  %v5909_v26 = vadd.f32 %v1393_v33, %v5877_v14  ;;  %v1725_v15 = vsel %vm1124_vm1, %v1510_v56, 0.0  ;;  %v1893_v35 = vsel %vm1124_vm1, %v1594_v51, 0.0 }
 0x181   : > { %8941 = vst [vmem:[#allocation111_spill] sm:$0xff] %v5894_v55  ;;  %v5906_v24 = vadd.f32 %v1225_v48, %v5871_v37  ;;  %v5913_v55 = vadd.f32 %v1725_v15, %v1509_v30  ;;  %v1729_v23 = vsel %vm1124_vm1, %v1512_v31, 0.0  ;;  %v5916_v41 = vadd.f32 %v1893_v35, %v1593_v16 }
 0x182   : > { %v1897_v34 = vsel %vm1124_vm1, %v1596_v18, 0.0  ;;  %1179 = vadd.xlane.f32.xlu1 %v5498_v47  ;;  %v5920_v40 = vadd.f32 %v1729_v23, %v1511_v63 }
 0x183   : > { %8942 = vst [vmem:[#allocation112_spill] sm:$0xff] %v5916_v41  ;;  %v5922_v48 = vadd.f32 %v1897_v34, %v1595_v59  ;;  %v5924_v33 = vpop.f32.mrb[52].mxu0  ;;  %v5926_v37 = vpop.f32.mrb[52].mxu1 }
 0x184   : > { %8944 = vst [vmem:[#allocation114_spill] sm:$0xff] %v5924_v33  ;;  %8945 = vst [vmem:[#allocation115_spill] sm:$0xff] %v5926_v37  ;;  %1343 = vadd.xlane.f32.xlu0 %v5482_v52  ;;  %v1513_v15 = vmul.f32 %v5924_v33, %v5924_v33  ;;  %v5931_v30 = vpop.f32.mrb[53].mxu0  ;;  %v1597_v35 = vmul.f32 %v5926_v37, %v5926_v37  ;;  %v5935_v18 = vpop.f32.mrb[53].mxu1 }
 0x185   : > { %8943 = vst [vmem:[#allocation113_spill] sm:$0xff] %v5922_v48  ;;  %8946 = vst [vmem:[#allocation116_spill] sm:$0xff] %v5931_v30  ;;  %v1229_v47 = vsel %vm1124_vm1, %v5931_v30, 0.0  ;;  %v1514_v23 = vmul.f32 %v5931_v30, %v5931_v30  ;;  %v5941_v31 = vpop.f32.mrb[54].mxu0  ;;  %v1397_v52 = vsel %vm1124_vm1, %v5935_v18, 0.0  ;;  %v1598_v16 = vmul.f32 %v5935_v18, %v5935_v18  ;;  %v5947_v56 = vpop.f32.mrb[54].mxu1 }
 0x186   : > { %8947 = vst [vmem:[#allocation117_spill] sm:$0xff] %v5935_v18  ;;  %8948 = vst [vmem:[#allocation118_spill] sm:$0xff] %v5941_v31  ;;  %1347 = vadd.xlane.f32.xlu1 %v5501_v6  ;;  %v1515_v51 = vmul.f32 %v5941_v31, %v5941_v31  ;;  %v5952_v63 = vpop.f32.mrb[55].mxu0  ;;  %v1599_v34 = vmul.f32 %v5947_v56, %v5947_v56  ;;  %v5956_v59 = vpop.f32.mrb[55].mxu1  ;;  %v5959_v30 = vadd.f32 %v1229_v47, %v5924_v33 }
 0x187   : > { %8949 = vst [vmem:[#allocation119_spill] sm:$0xff] %v5947_v56  ;;  %8950 = vst [vmem:[#allocation120_spill] sm:$0xff] %v5952_v63  ;;  %v5962_v14 = vadd.f32 %v1397_v52, %v5926_v37  ;;  %v1233_v18 = vsel %vm1124_vm1, %v5952_v63, 0.0  ;;  %v1516_v6 = vmul.f32 %v5952_v63, %v5952_v63  ;;  %v1401_v48 = vsel %vm1124_vm1, %v5956_v59, 0.0 }
 0x188   : > { %8951 = vst [vmem:[#allocation121_spill] sm:$0xff] %v5956_v59  ;;  %8952 = vst [vmem:[#allocation122_spill] sm:$0xff] %v5959_v30  ;;  %v1600_v41 = vmul.f32 %v5956_v59, %v5956_v59  ;;  %1679 = vadd.xlane.f32.xlu0 %v5505_v11  ;;  %v5974_v47 = vadd.f32 %v1233_v18, %v5941_v31  ;;  %v5977_v52 = vadd.f32 %v1401_v48, %v5947_v56 }
 0x189   : > { %8953 = vst [vmem:[#allocation123_spill] sm:$0xff] %v5962_v14  ;;  %v1733_v33 = vsel %vm1124_vm1, %v1514_v23, 0.0  ;;  %v1901_v37 = vsel %vm1124_vm1, %v1598_v16, 0.0  ;;  %v1737_v63 = vsel %vm1124_vm1, %v1516_v6, 0.0 }
 0x18a   : > { %v5981_v14 = vadd.f32 %v1733_v33, %v1513_v15  ;;  %v5984_v30 = vadd.f32 %v1901_v37, %v1597_v35  ;;  %v1905_v59 = vsel %vm1124_vm1, %v1600_v41, 0.0  ;;  %1683 = vadd.xlane.f32.xlu1 %v5512_v32  ;;  %v5988_v11 = vadd.f32 %v1737_v63, %v1515_v51 }
 0x18b   : > { %v5990_v18 = vadd.f32 %v1905_v59, %v1599_v34  ;;  %v5992_v48 = vpop.f32.mrb[56].mxu0  ;;  %v5994_v31 = vpop.f32.mrb[56].mxu1 }
 0x18c   : > { %8954 = vst [vmem:[#allocation124_spill] sm:$0xff] %v5984_v30  ;;  %8956 = vst [vmem:[#allocation126_spill] sm:$0xff] %v5992_v48  ;;  %1847 = vadd.xlane.f32.xlu0 %v5508_v17  ;;  %v1517_v33 = vmul.f32 %v5992_v48, %v5992_v48  ;;  %v5999_v15 = vpop.f32.mrb[57].mxu0  ;;  %v1601_v37 = vmul.f32 %v5994_v31, %v5994_v31  ;;  %v6003_v41 = vpop.f32.mrb[57].mxu1 }
 0x18d   : > { %8955 = vst [vmem:[#allocation125_spill] sm:$0xff] %v5990_v18  ;;  %8957 = vst [vmem:[#allocation127_spill] sm:$0xff] %v5994_v31  ;;  %v1237_v32 = vsel %vm1124_vm1, %v5999_v15, 0.0  ;;  %v1518_v35 = vmul.f32 %v5999_v15, %v5999_v15  ;;  %v6009_v23 = vpop.f32.mrb[58].mxu0  ;;  %v1405_v17 = vsel %vm1124_vm1, %v6003_v41, 0.0  ;;  %v1602_v16 = vmul.f32 %v6003_v41, %v6003_v41  ;;  %v6015_v51 = vpop.f32.mrb[58].mxu1 }
 0x18e   : > { %8958 = vst [vmem:[#allocation128_spill] sm:$0xff] %v5999_v15  ;;  %8959 = vst [vmem:[#allocation129_spill] sm:$0xff] %v6003_v41  ;;  %1851 = vadd.xlane.f32.xlu1 %v5514_v5  ;;  %v1519_v63 = vmul.f32 %v6009_v23, %v6009_v23  ;;  %v6020_v34 = vpop.f32.mrb[59].mxu0  ;;  %v1603_v59 = vmul.f32 %v6015_v51, %v6015_v51  ;;  %v6024_v6 = vpop.f32.mrb[59].mxu1  ;;  %v6027_v15 = vadd.f32 %v1237_v32, %v5992_v48 }
 0x18f   : > { %8960 = vst [vmem:[#allocation130_spill] sm:$0xff] %v6009_v23  ;;  %8961 = vst [vmem:[#allocation131_spill] sm:$0xff] %v6015_v51  ;;  %v6030_v56 = vadd.f32 %v1405_v17, %v5994_v31  ;;  %v1241_v41 = vsel %vm1124_vm1, %v6020_v34, 0.0  ;;  %v1520_v5 = vmul.f32 %v6020_v34, %v6020_v34  ;;  %v1409_v18 = vsel %vm1124_vm1, %v6024_v6, 0.0 }
 0x190   : > { %8962 = vst [vmem:[#allocation132_spill] sm:$0xff] %v6020_v34  ;;  %8963 = vst [vmem:[#allocation133_spill] sm:$0xff] %v6024_v6  ;;  %v1604_v30 = vmul.f32 %v6024_v6, %v6024_v6  ;;  %1183 = vadd.xlane.f32.xlu0 %v5547_v2  ;;  %v6042_v32 = vadd.f32 %v1241_v41, %v6009_v23  ;;  %v6045_v17 = vadd.f32 %v1409_v18, %v6015_v51 }
 0x191   : > { %8964 = vst [vmem:[#allocation134_spill] sm:$0xff] %v6027_v15  ;;  %8965 = vst [vmem:[#allocation135_spill] sm:$0xff] %v6030_v56  ;;  %v1741_v48 = vsel %vm1124_vm1, %v1518_v35, 0.0  ;;  %v1909_v31 = vsel %vm1124_vm1, %v1602_v16, 0.0  ;;  %v1745_v34 = vsel %vm1124_vm1, %v1520_v5, 0.0 }
 0x192   : > { %v6049_v56 = vadd.f32 %v1741_v48, %v1517_v33  ;;  %v6052_v15 = vadd.f32 %v1909_v31, %v1601_v37  ;;  %v1913_v6 = vsel %vm1124_vm1, %v1604_v30, 0.0  ;;  %1187 = vadd.xlane.f32.xlu1 %v5566_v45  ;;  %v6056_v2 = vadd.f32 %v1745_v34, %v1519_v63 }
 0x193   : > { %v6058_v41 = vadd.f32 %v1913_v6, %v1603_v59  ;;  %v6060_v18 = vpop.f32.mrb[60].mxu0  ;;  %v6062_v23 = vpop.f32.mrb[60].mxu1 }
 0x194   : > { %8966 = vst [vmem:[#allocation136_spill] sm:$0xff] %v6052_v15  ;;  %8968 = vst [vmem:[#allocation138_spill] sm:$0xff] %v6060_v18  ;;  %1351 = vadd.xlane.f32.xlu0 %v5550_v0  ;;  %v1521_v48 = vmul.f32 %v6060_v18, %v6060_v18  ;;  %v6067_v33 = vpop.f32.mrb[61].mxu0  ;;  %v1605_v30 = vmul.f32 %v6062_v23, %v6062_v23  ;;  %v6071_v31 = vpop.f32.mrb[61].mxu1 }
 0x195   : > { %8967 = vst [vmem:[#allocation137_spill] sm:$0xff] %v6058_v41  ;;  %8969 = vst [vmem:[#allocation139_spill] sm:$0xff] %v6062_v23  ;;  %v1245_v45 = vsel %vm1124_vm1, %v6067_v33, 0.0  ;;  %v1522_v37 = vmul.f32 %v6067_v33, %v6067_v33  ;;  %v6077_v35 = vpop.f32.mrb[62].mxu0  ;;  %v1413_v0 = vsel %vm1124_vm1, %v6071_v31, 0.0  ;;  %v1606_v16 = vmul.f32 %v6071_v31, %v6071_v31  ;;  %v6083_v63 = vpop.f32.mrb[62].mxu1 }
 0x196   : > { %8970 = vst [vmem:[#allocation140_spill] sm:$0xff] %v6067_v33  ;;  %8971 = vst [vmem:[#allocation141_spill] sm:$0xff] %v6071_v31  ;;  %1355 = vadd.xlane.f32.xlu1 %v5569_v8  ;;  %v1523_v34 = vmul.f32 %v6077_v35, %v6077_v35  ;;  %v6088_v59 = vpop.f32.mrb[63].mxu0  ;;  %v1607_v6 = vmul.f32 %v6083_v63, %v6083_v63  ;;  %v6092_v5 = vpop.f32.mrb[63].mxu1  ;;  %v6095_v33 = vadd.f32 %v1245_v45, %v6060_v18 }
 0x197   : > { %8972 = vst [vmem:[#allocation142_spill] sm:$0xff] %v6077_v35  ;;  %8973 = vst [vmem:[#allocation143_spill] sm:$0xff] %v6083_v63  ;;  %v6098_v51 = vadd.f32 %v1413_v0, %v6062_v23  ;;  %v1249_v31 = vsel %vm1124_vm1, %v6088_v59, 0.0  ;;  %v1524_v8 = vmul.f32 %v6088_v59, %v6088_v59  ;;  %v1417_v41 = vsel %vm1124_vm1, %v6092_v5, 0.0 }
 0x198   : > { %8974 = vst [vmem:[#allocation144_spill] sm:$0xff] %v6088_v59  ;;  %8975 = vst [vmem:[#allocation145_spill] sm:$0xff] %v6092_v5  ;;  %v1608_v15 = vmul.f32 %v6092_v5, %v6092_v5  ;;  %1687 = vadd.xlane.f32.xlu0 %v5573_v27  ;;  %v6110_v45 = vadd.f32 %v1249_v31, %v6077_v35  ;;  %v6113_v0 = vadd.f32 %v1417_v41, %v6083_v63 }
 0x199   : > { %8976 = vst [vmem:[#allocation146_spill] sm:$0xff] %v6095_v33  ;;  %8977 = vst [vmem:[#allocation147_spill] sm:$0xff] %v6098_v51  ;;  %v1749_v18 = vsel %vm1124_vm1, %v1522_v37, 0.0  ;;  %v1917_v23 = vsel %vm1124_vm1, %v1606_v16, 0.0  ;;  %v1753_v59 = vsel %vm1124_vm1, %v1524_v8, 0.0 }
 0x19a   : > { %v6117_v51 = vadd.f32 %v1749_v18, %v1521_v48  ;;  %v6120_v33 = vadd.f32 %v1917_v23, %v1605_v30  ;;  %v1921_v5 = vsel %vm1124_vm1, %v1608_v15, 0.0  ;;  %1691 = vadd.xlane.f32.xlu1 %v5580_v58  ;;  %v6124_v27 = vadd.f32 %v1753_v59, %v1523_v34 }
 0x19b   : > { %v6126_v31 = vadd.f32 %v1921_v5, %v1607_v6  ;;  %v6128_v41 = vpop.f32.mrb[64].mxu0  ;;  %v6133_v18 = vpop.f32.mrb[64].mxu1 }
 0x19c   : > { %8978 = vst [vmem:[#allocation148_spill] sm:$0xff] %v6120_v33  ;;  %8979 = vst [vmem:[#allocation149_spill] sm:$0xff] %v6124_v27  ;;  %1855 = vadd.xlane.f32.xlu0 %v5576_v25  ;;  %v6131_v37 = vpop.f32.mrb[65].mxu0  ;;  %v6141_v58 = vpop.f32.mrb[65].mxu1  ;;  %v1525_v30 = vmul.f32 %v6128_v41, %v6128_v41 }
 0x19d   : > { %8980 = vst [vmem:[#allocation150_spill] sm:$0xff] %v6126_v31  ;;  %8981 = vst [vmem:[#allocation151_spill] sm:$0xff] %v6128_v41  ;;  %v1253_v23 = vsel %vm1124_vm1, %v6131_v37, 0.0  ;;  %v1526_v15 = vmul.f32 %v6131_v37, %v6131_v37  ;;  %v6139_v48 = vpop.f32.mrb[66].mxu0  ;;  %v6148_v16 = vpop.f32.mrb[66].mxu1 }
 0x19e   : > { %8982 = vst [vmem:[#allocation152_spill] sm:$0xff] %v6131_v37  ;;  %8983 = vst [vmem:[#allocation153_spill] sm:$0xff] %v6133_v18  ;;  %1859 = vadd.xlane.f32.xlu1 %v5582_v3  ;;  %v6146_v25 = vpop.f32.mrb[67].mxu0  ;;  %v6151_v34 = vadd.f32 %v1253_v23, %v6128_v41  ;;  %v1527_v59 = vmul.f32 %v6139_v48, %v6139_v48  ;;  %v6159_v3 = vpop.f32.mrb[67].mxu1  ;;  %v1421_v37 = vsel %vm1124_vm1, %v6141_v58, 0.0 }
 0x19f   : > { %8984 = vst [vmem:[#allocation154_spill] sm:$0xff] %v6139_v48  ;;  %8985 = vst [vmem:[#allocation155_spill] sm:$0xff] %v6141_v58  ;;  %v1257_v6 = vsel %vm1124_vm1, %v6146_v25, 0.0  ;;  %v1528_v5 = vmul.f32 %v6146_v25, %v6146_v25  ;;  %v1757_v8 = vsel %vm1124_vm1, %v1526_v15, 0.0  ;;  %v1610_v23 = vmul.f32 %v6141_v58, %v6141_v58 }
 0x1a0   : > { %8986 = vst [vmem:[#allocation156_spill] sm:$0xff] %v6146_v25  ;;  %8987 = vst [vmem:[#allocation157_spill] sm:$0xff] %v6148_v16  ;;  %1191 = vadd.xlane.f32.xlu0 %v5615_v13  ;;  %v1425_v41 = vsel %vm1124_vm1, %v6159_v3, 0.0  ;;  %v1612_v35 = vmul.f32 %v6159_v3, %v6159_v3  ;;  %v1609_v25 = vmul.f32 %v6133_v18, %v6133_v18 }
 0x1a1   : > { %8988 = vst [vmem:[#allocation158_spill] sm:$0xff] %v6151_v34  ;;  %8989 = vst [vmem:[#allocation159_spill] sm:$0xff] %v6159_v3  ;;  %v1611_v15 = vmul.f32 %v6148_v16, %v6148_v16  ;;  %v6176_v13 = vadd.f32 %v1257_v6, %v6139_v48  ;;  %v6179_v63 = vadd.f32 %v1421_v37, %v6133_v18  ;;  %v1761_v3 = vsel %vm1124_vm1, %v1528_v5, 0.0 }
 0x1a2   : > { %1195 = vadd.xlane.f32.xlu1 %v5634_v44  ;;  %v6183_v58 = vadd.f32 %v1425_v41, %v6148_v16  ;;  %v6185_v34 = vadd.f32 %v1757_v8, %v1525_v30  ;;  %v1925_v31 = vsel %vm1124_vm1, %v1610_v23, 0.0  ;;  %v6189_v33 = vadd.f32 %v1761_v3, %v1527_v59 }
 0x1a3   : > { %v6191_v27 = vadd.f32 %v1925_v31, %v1609_v25  ;;  %v1929_v6 = vsel %vm1124_vm1, %v1612_v35, 0.0  ;;  %v6199_v44 = vpop.f32.mrb[68].mxu0  ;;  %v6217_v25 = vpop.f32.mrb[68].mxu1 }
 0x1a4   : > { %1359 = vadd.xlane.f32.xlu0 %v5618_v46  ;;  %v6195_v37 = vadd.f32 %v1929_v6, %v1611_v15  ;;  %8990 = vst [vmem:[#allocation160_spill] sm:$0xff] %v6199_v44  ;;  %v6201_v41 = vpop.f32.mrb[69].mxu0  ;;  %8994 = vst [vmem:[#allocation164_spill] sm:$0xff] %v6217_v25  ;;  %v1529_v59 = vmul.f32 %v6199_v44, %v6199_v44  ;;  %v6223_v5 = vpop.f32.mrb[69].mxu1 }
 0x1a5   : > { %8991 = vst [vmem:[#allocation161_spill] sm:$0xff] %v6201_v41  ;;  %v6204_v30 = vpop.f32.mrb[70].mxu0  ;;  %v1261_v46 = vsel %vm1124_vm1, %v6201_v41, 0.0  ;;  %8995 = vst [vmem:[#allocation165_spill] sm:$0xff] %v6223_v5  ;;  %v6232_v23 = vpop.f32.mrb[70].mxu1 }
 0x1a6   : > { %1363 = vadd.xlane.f32.xlu1 %v5637_v49  ;;  %8992 = vst [vmem:[#allocation162_spill] sm:$0xff] %v6204_v30  ;;  %v6206_v31 = vpop.f32.mrb[71].mxu0  ;;  %v1530_v49 = vmul.f32 %v6201_v41, %v6201_v41  ;;  %v6226_v3 = vadd.f32 %v1261_v46, %v6199_v44  ;;  %8996 = vst [vmem:[#allocation166_spill] sm:$0xff] %v6232_v23  ;;  %v6236_v18 = vpop.f32.mrb[71].mxu1  ;;  %v1429_v46 = vsel %vm1124_vm1, %v6223_v5, 0.0 }
 0x1a7   : > { %8993 = vst [vmem:[#allocation163_spill] sm:$0xff] %v6206_v31  ;;  %v1532_v35 = vmul.f32 %v6206_v31, %v6206_v31  ;;  %8997 = vst [vmem:[#allocation167_spill] sm:$0xff] %v6236_v18 }
 0x1a8   : > { %1695 = vadd.xlane.f32.xlu0 %v5641_v22  ;;  %v1265_v22 = vsel %vm1124_vm1, %v6206_v31, 0.0  ;;  %v1765_v15 = vsel %vm1124_vm1, %v1530_v49, 0.0  ;;  %v1613_v49 = vmul.f32 %v6217_v25, %v6217_v25 }
 0x1a9   : > { %v6229_v8 = vadd.f32 %v1265_v22, %v6204_v30  ;;  %v1769_v6 = vsel %vm1124_vm1, %v1532_v35, 0.0  ;;  %v6238_v31 = vadd.f32 %v1765_v15, %v1529_v59  ;;  %v1615_v35 = vmul.f32 %v6232_v23, %v6232_v23 }
 0x1aa   : > { %1699 = vadd.xlane.f32.xlu1 %v5648_v62  ;;  %v1433_v59 = vsel %vm1124_vm1, %v6236_v18, 0.0 }
 0x1ab   : > { %8998 = vst [vmem:[#allocation168_spill] sm:$0xff] %v6238_v31  ;;  %v6260_v15 = vadd.f32 %v1433_v59, %v6232_v23 }
 0x1ac   : > { %1863 = vadd.xlane.f32.xlu0 %v5644_v12  ;;  %v1531_v12 = vmul.f32 %v6204_v30, %v6204_v30 }
 0x1ad   : > { %v1128_v62 = vpop.xlane.xlu0 %1127 }
 0x1ae   : > { %1867 = vadd.xlane.f32.xlu1 %v5650_v53  ;;  %v6240_v48 = vadd.f32 %v1769_v6, %v1531_v12  ;;  %v1614_v53 = vmul.f32 %v6223_v5, %v6223_v5  ;;  %v1616_v12 = vmul.f32 %v6236_v18, %v6236_v18 }
 0x1af   : > { %v1300_v41 = vpop.xlane.xlu1 %1299 }
 0x1b0   : > { %8999 = vst [vmem:[#allocation169_spill] sm:$0xff] %v6240_v48  ;;  %1199 = vadd.xlane.f32.xlu0 %v5683_v61  ;;  %v6257_v61 = vadd.f32 %v1429_v46, %v6217_v25  ;;  %v1933_v44 = vsel %vm1124_vm1, %v1614_v53, 0.0  ;;  %v1937_v5 = vsel %vm1124_vm1, %v1616_v12, 0.0  ;;  %v6264_v30 = vmul.f32 0.0051020407, %v1300_v41 }
 0x1b1   : > { %v1296_v22 = vpop.xlane.xlu0 %1295  ;;  %v6267_v16 = vadd.f32 %v1933_v44, %v1613_v49  ;;  %v6269_v18 = vadd.f32 %v1937_v5, %v1615_v35  ;;  %v6271_v48 = vmul.f32 0.0051020407, %v1128_v62  ;;  %v6285_v5 = vpop.f32.mrb[72].mxu0 }
 0x1b2   : > { %1203 = vadd.xlane.f32.xlu1 %v5702_v10  ;;  %9000 = vst [vmem:[#allocation170_spill] sm:$0xff] %v6264_v30  ;;  %v6278_v53 = vmul.f32 %v6264_v30, %v6264_v30  ;;  %9005 = vst [vmem:[#allocation175_spill] sm:$0xff] %v6285_v5  ;;  %v6287_v49 = vpop.f32.mrb[73].mxu0 }
 0x1b3   : > { %v1636_v6 = vpop.xlane.xlu1 %1635  ;;  %9001 = vst [vmem:[#allocation171_spill] sm:$0xff] %v6267_v16  ;;  %9002 = vst [vmem:[#allocation172_spill] sm:$0xff] %v6269_v18  ;;  %v6301_v18 = vpop.f32.mrb[72].mxu1 }
 0x1b4   : > { %1367 = vadd.xlane.f32.xlu0 %v5686_v42  ;;  %9003 = vst [vmem:[#allocation173_spill] sm:$0xff] %v6278_v53  ;;  %v2050_v41 = vmul.f32 0.0051020407, %v1636_v6  ;;  %9006 = vst [vmem:[#allocation176_spill] sm:$0xff] %v6287_v49 }
 0x1b5   : > { %v1132_v10 = vpop.xlane.xlu0 %1131  ;;  %9010 = vst [vmem:[#allocation180_spill] sm:$0xff] %v6301_v18 }
 0x1b6   : > { %v6273_v46 = vmul.f32 0.0051020407, %v1132_v10  ;;  %1371 = vadd.xlane.f32.xlu1 %v5705_v57  ;;  %v2133_v57 = vmul.f32 %v6271_v48, %v6271_v48  ;;  %v6294_v10 = vpop.f32.mrb[74].mxu0 }
 0x1b7   : > { %v1804_v59 = vpop.xlane.xlu1 %1803  ;;  %9007 = vst [vmem:[#allocation177_spill] sm:$0xff] %v6294_v10  ;;  %v6298_v25 = vpop.f32.mrb[75].mxu0 }
 0x1b8   : > { %v2134_v42 = vmul.f32 %v6273_v46, %v6273_v46  ;;  %v6282_v44 = vmul.f32 0.0051020407, %v1804_v59  ;;  %1703 = vadd.xlane.f32.xlu0 %v5709_v50  ;;  %v6296_v59 = vmul.f32 0.0051020407, %v1296_v22  ;;  %9009 = vst [vmem:[#allocation179_spill] sm:$0xff] %v6298_v25 }
 0x1b9   : > { %v1632_v62 = vpop.xlane.xlu0 %1631 }
 0x1ba   : > { %9004 = vst [vmem:[#allocation174_spill] sm:$0xff] %v6282_v44  ;;  %v2218_v35 = vsub.f32 %v2050_v41, %v2134_v42  ;;  %v2049_v6 = vmul.f32 0.0051020407, %v1632_v62  ;;  %1707 = vadd.xlane.f32.xlu1 %v5716_v19  ;;  %9008 = vst [vmem:[#allocation178_spill] sm:$0xff] %v6296_v59  ;;  %v1269_v42 = vsel %vm1124_vm1, %v6287_v49, 0.0  ;;  %v6305_v62 = vpop.f32.mrb[73].mxu1 }
 0x1bb   : > { %v1136_v50 = vpop.xlane.xlu1 %1135  ;;  %9011 = vst [vmem:[#allocation181_spill] sm:$0xff] %v6305_v62  ;;  %v6308_v22 = vpop.f32.mrb[74].mxu1  ;;  %v6319_v12 = vadd.f32 %v1269_v42, %v6285_v5  ;;  %v1536_v42 = vmul.f32 %v6298_v25, %v6298_v25 }
 0x1bc   : > { %v2302_v23 = vmax.f32 %v2218_v35, 0.0  ;;  %v2217_v30 = vsub.f32 %v2049_v6, %v2133_v57  ;;  %1871 = vadd.xlane.f32.xlu0 %v5712_v9  ;;  %9012 = vst [vmem:[#allocation182_spill] sm:$0xff] %v6308_v22  ;;  %v6312_v35 = vmul.f32 %v6296_v59, %v6296_v59  ;;  %v6316_v6 = vpop.f32.mrb[75].mxu1  ;;  %v6321_v53 = vmul.f32 0.0051020407, %v1136_v50 }
 0x1bd   : > { %v1800_v41 = vpop.xlane.xlu0 %1799  ;;  %9015 = vst [vmem:[#allocation185_spill] sm:$0xff] %v6316_v6  ;;  %9016 = vst [vmem:[#allocation186_spill] sm:$0xff] %v6319_v12  ;;  %v1437_v50 = vsel %vm1124_vm1, %v6305_v62, 0.0 }
 0x1be   : > { %v2386_v19 = vadd.f32 0.001, %v2302_v23  ;;  %1875 = vadd.xlane.f32.xlu1 %v5718_v36  ;;  %9013 = vst [vmem:[#allocation183_spill] sm:$0xff] %v6312_v35  ;;  %v6314_v57 = vmul.f32 0.0051020407, %v1800_v41  ;;  %v1534_v36 = vmul.f32 %v6287_v49, %v6287_v49  ;;  %v1273_v23 = vsel %vm1124_vm1, %v6298_v25, 0.0 }
 0x1bf   : > { %v1140_v9 = vpop.xlane.xlu1 %1139  ;;  %v1533_v49 = vmul.f32 %v6285_v5, %v6285_v5  ;;  %v1535_v41 = vmul.f32 %v6294_v10, %v6294_v10  ;;  %v1617_v25 = vmul.f32 %v6301_v18, %v6301_v18  ;;  %v1441_v35 = vsel %vm1124_vm1, %v6316_v6, 0.0 }
 0x1c0   : > { %9014 = vst [vmem:[#allocation184_spill] sm:$0xff] %v6314_v57  ;;  %4475 = vrsqrt.f32 %v2386_v19  ;;  %1207 = vadd.xlane.f32.xlu0 %v5751_v39  ;;  %v1618_v39 = vmul.f32 %v6305_v62, %v6305_v62  ;;  %v2301_v19 = vmax.f32 %v2217_v30, 0.0  ;;  %v1620_v57 = vmul.f32 %v6316_v6, %v6316_v6 }
 0x1c1   : > { %v1304_v59 = vpop.xlane.xlu0 %1303  ;;  %v6352_v30 = vadd.f32 %v1273_v23, %v6294_v10  ;;  %v1619_v5 = vmul.f32 %v6308_v22, %v6308_v22  ;;  %v6360_v62 = vadd.f32 %v1437_v50, %v6301_v18  ;;  %v6363_v12 = vadd.f32 %v1441_v35, %v6308_v22 }
 0x1c2   : > { %1211 = vadd.xlane.f32.xlu1 %v5770_v7  ;;  %v6354_v7 = vmul.f32 0.0051020407, %v1140_v9  ;;  %v2135_v9 = vmul.f32 %v6321_v53, %v6321_v53  ;;  %v1777_v10 = vsel %vm1124_vm1, %v1536_v42, 0.0  ;;  %v1941_v50 = vsel %vm1124_vm1, %v1618_v39, 0.0  ;;  %v2555_v42 = vld [vmem:[%s6369_s26 + $0x8] sm:$0xff] }
 0x1c3   : > { %v1308_v44 = vpop.xlane.xlu1 %1307  ;;  %9017 = vst [vmem:[#allocation187_spill] sm:$0xff] %v6352_v30  ;;  %9018 = vst [vmem:[#allocation188_spill] sm:$0xff] %v6360_v62  ;;  %v6376_v18 = vmul.f32 0.0051020407, %v1304_v59  ;;  %v6381_v22 = vadd.f32 %v1777_v10, %v1535_v41  ;;  %v6385_v16 = vadd.f32 %v1941_v50, %v1617_v25 }
 0x1c4   : > { %1375 = vadd.xlane.f32.xlu0 %v5754_v4  ;;  %9019 = vst [vmem:[#allocation189_spill] sm:$0xff] %v6363_v12  ;;  %v1773_v4 = vsel %vm1124_vm1, %v1534_v36, 0.0  ;;  %v2385_v12 = vadd.f32 0.001, %v2301_v19  ;;  %v6383_v62 = vmul.f32 0.0051020407, %v1308_v44  ;;  %v2136_v59 = vmul.f32 %v6354_v7, %v6354_v7 }
 0x1c5   : > { %v1640_v23 = vpop.xlane.xlu0 %1639  ;;  %9020 = vst [vmem:[#allocation190_spill] sm:$0xff] %v6376_v18  ;;  %v6379_v6 = vadd.f32 %v1773_v4, %v1533_v49  ;;  %9022 = vst [vmem:[#allocation192_spill] sm:$0xff] %v6381_v22  ;;  %v1945_v36 = vsel %vm1124_vm1, %v1620_v57, 0.0  ;;  %v6400_v25 = vmul.f32 %v6376_v18, %v6376_v18  ;;  %v2554_v22 = vld [vmem:[%s6369_s26] sm:$0xff] }
 0x1c6   : > { %v2051_v35 = vmul.f32 0.0051020407, %v1640_v23  ;;  %1379 = vadd.xlane.f32.xlu1 %v5773_v43  ;;  %9023 = vst [vmem:[#allocation193_spill] sm:$0xff] %v6383_v62  ;;  %9024 = vst [vmem:[#allocation194_spill] sm:$0xff] %v6385_v16  ;;  %v6392_v43 = vpop.f32.mrb[76].mxu0  ;;  %v6394_v49 = vadd.f32 %v1945_v36, %v1619_v5  ;;  %4477 = vrsqrt.f32 %v2385_v12  ;;  %v6411_v5 = vmul.f32 %v6383_v62, %v6383_v62 }
 0x1c7   : > { %9021 = vst [vmem:[#allocation191_spill] sm:$0xff] %v6379_v6  ;;  %v1644_v30 = vpop.xlane.xlu1 %1643  ;;  %9025 = vst [vmem:[#allocation195_spill] sm:$0xff] %v6392_v43  ;;  %v6396_v44 = vpop.f32.mrb[77].mxu0 }
 0x1c8   : > { %v2219_v39 = vsub.f32 %v2051_v35, %v2135_v9  ;;  %v2052_v23 = vmul.f32 0.0051020407, %v1644_v30  ;;  %1711 = vadd.xlane.f32.xlu0 %v5777_v28  ;;  %9026 = vst [vmem:[#allocation196_spill] sm:$0xff] %v6394_v49  ;;  %9027 = vst [vmem:[#allocation197_spill] sm:$0xff] %v6396_v44  ;;  %v6405_v30 = vpop.f32.mrb[78].mxu0 }
 0x1c9   : > { %v1808_v10 = vpop.xlane.xlu0 %1807  ;;  %9028 = vst [vmem:[#allocation198_spill] sm:$0xff] %v6400_v25  ;;  %9030 = vst [vmem:[#allocation200_spill] sm:$0xff] %v6405_v30  ;;  %v6413_v50 = vpop.f32.mrb[79].mxu0 }
 0x1ca   : > { %v4476_v41 = vpop.eup %4475  ;;  %v2303_v57 = vmax.f32 %v2219_v39, 0.0  ;;  %v2220_v19 = vsub.f32 %v2052_v23, %v2136_v59  ;;  %v6402_v4 = vmul.f32 0.0051020407, %v1808_v10  ;;  %1715 = vadd.xlane.f32.xlu1 %v5784_v54  ;;  %9032 = vst [vmem:[#allocation202_spill] sm:$0xff] %v6411_v5  ;;  %9033 = vst [vmem:[#allocation203_spill] sm:$0xff] %v6413_v50  ;;  %v6420_v54 = vpop.f32.mrb[76].mxu1 }
 0x1cb   : > { %v6407_v28 = vmul.f32 %v4476_v41, %v2555_v42  ;;  %v1812_v9 = vpop.xlane.xlu1 %1811  ;;  %9035 = vst [vmem:[#allocation205_spill] sm:$0xff] %v6420_v54  ;;  %v6426_v23 = vpop.f32.mrb[77].mxu1  ;;  %v1621_v25 = vmul.f32 %v6420_v54, %v6420_v54 }
 0x1cc   : > { %9029 = vst [vmem:[#allocation199_spill] sm:$0xff] %v6402_v4  ;;  %v2387_v35 = vadd.f32 0.001, %v2303_v57  ;;  %v2304_v36 = vmax.f32 %v2220_v19, 0.0  ;;  %v6417_v39 = vmul.f32 0.0051020407, %v1812_v9  ;;  %1879 = vadd.xlane.f32.xlu0 %v5780_v20 }
 0x1cd   : > { %9031 = vst [vmem:[#allocation201_spill] sm:$0xff] %v6407_v28  ;;  %v6424_v12 = vmul.f32 %v6407_v28, %v6273_v46  ;;  %v1144_v42 = vpop.xlane.xlu0 %1143  ;;  %9037 = vst [vmem:[#allocation207_spill] sm:$0xff] %v6426_v23  ;;  %v6431_v57 = vpop.f32.mrb[78].mxu1  ;;  %v9040_v46 = vld [vmem:[#allocation98_spill] sm:$0xff]  ;;  %v1445_v41 = vsel %vm1124_vm1, %v6426_v23, 0.0  ;;  %v9041_v28 = vld [vmem:[#allocation99_spill] sm:$0xff] }
 0x1ce   : > { %9034 = vst [vmem:[#allocation204_spill] sm:$0xff] %v6417_v39  ;;  %4479 = vrsqrt.f32 %v2387_v35  ;;  %v2388_v10 = vadd.f32 0.001, %v2304_v36  ;;  %1883 = vadd.xlane.f32.xlu1 %v5786_v60  ;;  %9038 = vst [vmem:[#allocation208_spill] sm:$0xff] %v6431_v57  ;;  %v6433_v19 = vmul.f32 0.0051020407, %v1144_v42  ;;  %v1537_v35 = vmul.f32 %v6392_v43, %v6392_v43 }
 0x1cf   : > { %9036 = vst [vmem:[#allocation206_spill] sm:$0xff] %v6424_v12  ;;  %v1148_v20 = vpop.xlane.xlu1 %1147  ;;  %v6435_v9 = vpop.f32.mrb[79].mxu1  ;;  %v1277_v36 = vsel %vm1124_vm1, %v6396_v44, 0.0  ;;  %v1538_v60 = vmul.f32 %v6396_v44, %v6396_v44  ;;  %v1539_v42 = vmul.f32 %v6405_v30, %v6405_v30  ;;  %v1622_v12 = vmul.f32 %v6426_v23, %v6426_v23 }
 0x1d0   : > { %9039 = vst [vmem:[#allocation209_spill] sm:$0xff] %v6435_v9  ;;  %v6437_v59 = vmul.f32 0.0051020407, %v1148_v20  ;;  %1215 = vadd.xlane.f32.xlu0 %v9040_v46  ;;  %4481 = vrsqrt.f32 %v2388_v10  ;;  %v1281_v20 = vsel %vm1124_vm1, %v6413_v50, 0.0  ;;  %v1540_v46 = vmul.f32 %v6413_v50, %v6413_v50  ;;  %v4478_v5 = vpop.eup %4477 }
 0x1d1   : > { %v1312_v18 = vpop.xlane.xlu0 %1311  ;;  %v2137_v62 = vmul.f32 %v6433_v19, %v6433_v19  ;;  %v1624_v10 = vmul.f32 %v6435_v9, %v6435_v9  ;;  %v1623_v4 = vmul.f32 %v6431_v57, %v6431_v57  ;;  %v6471_v23 = vadd.f32 %v1277_v36, %v6392_v43 }
 0x1d2   : > { %1219 = vadd.xlane.f32.xlu1 %v5838_v38  ;;  %v1449_v38 = vsel %vm1124_vm1, %v6435_v9, 0.0  ;;  %v2138_v50 = vmul.f32 %v6437_v59, %v6437_v59  ;;  %v6474_v49 = vadd.f32 %v1281_v20, %v6405_v30  ;;  %v6477_v9 = vadd.f32 %v1445_v41, %v6420_v54  ;;  %v2556_v20 = vld [vmem:[%s6369_s26 + $0x10] sm:$0xff] }
 0x1d3   : > { %v1316_v44 = vpop.xlane.xlu1 %1315  ;;  %v1781_v16 = vsel %vm1124_vm1, %v1538_v60, 0.0  ;;  %v6484_v6 = vmul.f32 0.0051020407, %v1312_v18  ;;  %v1785_v43 = vsel %vm1124_vm1, %v1540_v46, 0.0  ;;  %v1953_v60 = vsel %vm1124_vm1, %v1624_v10, 0.0 }
 0x1d4   : > { %1383 = vadd.xlane.f32.xlu0 %v9041_v28  ;;  %v6480_v28 = vadd.f32 %v1449_v38, %v6431_v57  ;;  %v6487_v36 = vadd.f32 %v1781_v16, %v1537_v35  ;;  %v6491_v30 = vmul.f32 0.0051020407, %v1316_v44  ;;  %v6493_v54 = vadd.f32 %v1785_v43, %v1539_v42 }
 0x1d5   : > { %v1648_v39 = vpop.xlane.xlu0 %1647  ;;  %9043 = vst [vmem:[#allocation99_spill] sm:$0xff] %v6484_v6  ;;  %v1949_v38 = vsel %vm1124_vm1, %v1622_v12, 0.0  ;;  %v6506_v43 = vmul.f32 %v4478_v5, %v2554_v22  ;;  %v6512_v12 = vmul.f32 %v6484_v6, %v6484_v6 }
 0x1d6   : > { %9042 = vst [vmem:[#allocation98_spill] sm:$0xff] %v6480_v28  ;;  %v2053_v31 = vmul.f32 0.0051020407, %v1648_v39  ;;  %1387 = vadd.xlane.f32.xlu1 %v5841_v1  ;;  %9044 = vst [vmem:[#allocation210_spill] sm:$0xff] %v6491_v30  ;;  %v6498_v1 = vpop.f32.mrb[80].mxu0  ;;  %v6500_v16 = vadd.f32 %v1949_v38, %v1621_v25  ;;  %v6502_v39 = vadd.f32 %v1953_v60, %v1623_v4  ;;  %v6538_v38 = vpop.f32.mrb[80].mxu1 }
 0x1d7   : > { %v1652_v41 = vpop.xlane.xlu1 %1651  ;;  %9045 = vst [vmem:[#allocation211_spill] sm:$0xff] %v6498_v1  ;;  %v6504_v35 = vpop.f32.mrb[81].mxu0  ;;  %9047 = vst [vmem:[#allocation213_spill] sm:$0xff] %v6506_v43  ;;  %v6521_v4 = vmul.f32 %v6491_v30, %v6491_v30 }
 0x1d8   : > { %v4480_v57 = vpop.eup %4479  ;;  %v2221_v18 = vsub.f32 %v2053_v31, %v2137_v62  ;;  %v2054_v28 = vmul.f32 0.0051020407, %v1652_v41  ;;  %1719 = vadd.xlane.f32.xlu0 %v5845_v21  ;;  %9046 = vst [vmem:[#allocation212_spill] sm:$0xff] %v6504_v35  ;;  %9049 = vst [vmem:[#allocation215_spill] sm:$0xff] %v6512_v12  ;;  %v6517_v25 = vpop.f32.mrb[82].mxu0  ;;  %v9057_v41 = vld [vmem:[#allocation100_spill] sm:$0xff]  ;;  %v1625_v12 = vmul.f32 %v6538_v38, %v6538_v38 }
 0x1d9   : > { %v1816_v44 = vpop.xlane.xlu0 %1815  ;;  %v6508_v42 = vmul.f32 %v4480_v57, %v2556_v20  ;;  %9051 = vst [vmem:[#allocation217_spill] sm:$0xff] %v6517_v25  ;;  %9052 = vst [vmem:[#allocation218_spill] sm:$0xff] %v6521_v4  ;;  %v6523_v5 = vpop.f32.mrb[83].mxu0  ;;  %v6527_v57 = vmul.f32 %v6506_v43, %v6271_v48  ;;  %v1285_v48 = vsel %vm1124_vm1, %v6504_v35, 0.0 }
 0x1da   : > { %v2305_v31 = vmax.f32 %v2221_v18, 0.0  ;;  %v2222_v62 = vsub.f32 %v2054_v28, %v2138_v50  ;;  %v6514_v21 = vmul.f32 0.0051020407, %v1816_v44  ;;  %1723 = vadd.xlane.f32.xlu1 %v5852_v29  ;;  %9053 = vst [vmem:[#allocation219_spill] sm:$0xff] %v6523_v5  ;;  %v4482_v46 = vpop.eup %4481  ;;  %9058 = vst [vmem:[#allocation100_spill] sm:$0xff] %v6538_v38  ;;  %v6542_v18 = vpop.f32.mrb[81].mxu1  ;;  %v1544_v28 = vmul.f32 %v6523_v5, %v6523_v5 }
 0x1db   : > { %9048 = vst [vmem:[#allocation214_spill] sm:$0xff] %v6508_v42  ;;  %v1820_v22 = vpop.xlane.xlu1 %1819  ;;  %9054 = vst [vmem:[#allocation220_spill] sm:$0xff] %v6527_v57  ;;  %v6531_v50 = vmul.f32 %v6508_v42, %v6321_v53  ;;  %v6556_v30 = vadd.f32 %v1285_v48, %v6498_v1  ;;  %v9063_v44 = vld [vmem:[#allocation110_spill] sm:$0xff]  ;;  %v1543_v42 = vmul.f32 %v6517_v25, %v6517_v25 }
 0x1dc   : > { %9050 = vst [vmem:[#allocation216_spill] sm:$0xff] %v6514_v21  ;;  %v2389_v10 = vadd.f32 0.001, %v2305_v31  ;;  %v2306_v29 = vmax.f32 %v2222_v62, 0.0  ;;  %v6535_v20 = vmul.f32 0.0051020407, %v1820_v22  ;;  %1887 = vadd.xlane.f32.xlu0 %v9057_v41  ;;  %v1541_v48 = vmul.f32 %v6498_v1, %v6498_v1 }
 0x1dd   : > { %9055 = vst [vmem:[#allocation221_spill] sm:$0xff] %v6531_v50  ;;  %v1152_v60 = vpop.xlane.xlu0 %1151  ;;  %9059 = vst [vmem:[#allocation223_spill] sm:$0xff] %v6542_v18  ;;  %v9060_v31 = vld [vmem:[#allocation101_spill] sm:$0xff]  ;;  %v6547_v62 = vpop.f32.mrb[82].mxu1  ;;  %v1289_v41 = vsel %vm1124_vm1, %v6523_v5, 0.0  ;;  %v1542_v50 = vmul.f32 %v6504_v35, %v6504_v35  ;;  %v1453_v35 = vsel %vm1124_vm1, %v6542_v18, 0.0 }
 0x1de   : > { %9056 = vst [vmem:[#allocation222_spill] sm:$0xff] %v6535_v20  ;;  %4483 = vrsqrt.f32 %v2389_v10  ;;  %v2390_v53 = vadd.f32 0.001, %v2306_v29  ;;  %1891 = vadd.xlane.f32.xlu1 %v9060_v31  ;;  %9061 = vst [vmem:[#allocation101_spill] sm:$0xff] %v6547_v62  ;;  %v6553_v6 = vpop.f32.mrb[83].mxu1  ;;  %v2557_v10 = vld [vmem:[%s6369_s26 + $0x18] sm:$0xff]  ;;  %v6567_v5 = vadd.f32 %v1289_v41, %v6517_v25  ;;  %v1626_v41 = vmul.f32 %v6542_v18, %v6542_v18 }
 0x1df   : > { %v1156_v22 = vpop.xlane.xlu1 %1155  ;;  %9062 = vst [vmem:[#allocation224_spill] sm:$0xff] %v6553_v6  ;;  %v6559_v29 = vmul.f32 0.0051020407, %v1152_v60  ;;  %v1793_v60 = vsel %vm1124_vm1, %v1544_v28, 0.0  ;;  %v1628_v18 = vmul.f32 %v6553_v6, %v6553_v6  ;;  %v6596_v57 = vadd.f32 %v1453_v35, %v6538_v38 }
 0x1e0   : > { %4485 = vrsqrt.f32 %v2390_v53  ;;  %1223 = vadd.xlane.f32.xlu0 %v9063_v44  ;;  %v6573_v53 = vmul.f32 %v4482_v46, %v2557_v10  ;;  %v6585_v28 = vmul.f32 0.0051020407, %v1156_v22  ;;  %v9064_v46 = vld [vmem:[#allocation111_spill] sm:$0xff]  ;;  %v1627_v10 = vmul.f32 %v6547_v62, %v6547_v62 }
 0x1e1   : > { %v1320_v31 = vpop.xlane.xlu0 %1319  ;;  %v2139_v1 = vmul.f32 %v6559_v29, %v6559_v29  ;;  %v1789_v43 = vsel %vm1124_vm1, %v1542_v50, 0.0  ;;  %v6599_v4 = vadd.f32 %v1793_v60, %v1543_v42  ;;  %v1961_v35 = vsel %vm1124_vm1, %v1628_v18, 0.0 }
 0x1e2   : > { %1227 = vadd.xlane.f32.xlu1 %v5906_v24  ;;  %v1457_v24 = vsel %vm1124_vm1, %v6553_v6, 0.0  ;;  %v6601_v22 = vmul.f32 0.0051020407, %v1320_v31  ;;  %v6604_v20 = vadd.f32 %v1789_v43, %v1541_v48  ;;  %v2140_v50 = vmul.f32 %v6585_v28, %v6585_v28  ;;  %v2559_v43 = vld [vmem:[%s6369_s26 + $0x28] sm:$0xff] }
 0x1e3   : > { %v1324_v44 = vpop.xlane.xlu1 %1323  ;;  %v6591_v25 = vadd.f32 %v1457_v24, %v6547_v62  ;;  %v1957_v24 = vsel %vm1124_vm1, %v1626_v41, 0.0  ;;  %v2558_v62 = vld [vmem:[%s6369_s26 + $0x20] sm:$0xff]  ;;  %v6621_v60 = vmul.f32 %v6573_v53, %v6354_v7 }
 0x1e4   : > { %1391 = vadd.xlane.f32.xlu0 %v9064_v46  ;;  %9066 = vst [vmem:[#allocation111_spill] sm:$0xff] %v6601_v22  ;;  %v6611_v38 = vadd.f32 %v1957_v24, %v1625_v12  ;;  %v6627_v18 = vmul.f32 %v6601_v22, %v6601_v22 }
 0x1e5   : > { %9065 = vst [vmem:[#allocation110_spill] sm:$0xff] %v6591_v25  ;;  %v1656_v21 = vpop.xlane.xlu0 %1655  ;;  %v6608_v25 = vmul.f32 0.0051020407, %v1324_v44 }
 0x1e6   : > { %v2055_v46 = vmul.f32 0.0051020407, %v1656_v21  ;;  %1395 = vadd.xlane.f32.xlu1 %v5909_v26  ;;  %v6616_v26 = vadd.f32 %v1961_v35, %v1627_v10 }
 0x1e7   : > { %9067 = vst [vmem:[#allocation225_spill] sm:$0xff] %v6608_v25  ;;  %v1660_v6 = vpop.xlane.xlu1 %1659 }
 0x1e8   : > { %v4484_v42 = vpop.eup %4483  ;;  %v2223_v31 = vsub.f32 %v2055_v46, %v2139_v1  ;;  %v2056_v21 = vmul.f32 0.0051020407, %v1660_v6  ;;  %1727 = vadd.xlane.f32.xlu0 %v5913_v55  ;;  %v6634_v55 = vmul.f32 %v6608_v25, %v6608_v25 }
 0x1e9   : > { %v1824_v48 = vpop.xlane.xlu0 %1823  ;;  %v6623_v44 = vmul.f32 %v4484_v42, %v2558_v62 }
 0x1ea   : > { %v4486_v12 = vpop.eup %4485  ;;  %v2307_v41 = vmax.f32 %v2223_v31, 0.0  ;;  %v2224_v1 = vsub.f32 %v2056_v21, %v2140_v50  ;;  %v6629_v6 = vmul.f32 0.0051020407, %v1824_v48  ;;  %1731 = vadd.xlane.f32.xlu1 %v5920_v40  ;;  %v9070_v50 = vld [vmem:[#allocation112_spill] sm:$0xff] }
 0x1eb   : > { %v1828_v10 = vpop.xlane.xlu1 %1827  ;;  %v6636_v7 = vmul.f32 %v4486_v12, %v2559_v43  ;;  %v6640_v62 = vmul.f32 %v6623_v44, %v6433_v19  ;;  %v9071_v43 = vld [vmem:[#allocation113_spill] sm:$0xff]  ;;  %v9072_v12 = vld [vmem:[#allocation122_spill] sm:$0xff] }
 0x1ec   : > { %v2391_v46 = vadd.f32 0.001, %v2307_v41  ;;  %v2308_v24 = vmax.f32 %v2224_v1, 0.0  ;;  %v6644_v42 = vmul.f32 0.0051020407, %v1828_v10  ;;  %1895 = vadd.xlane.f32.xlu0 %v9070_v50 }
 0x1ed   : > { %9068 = vst [vmem:[#allocation226_spill] sm:$0xff] %v6636_v7  ;;  %9069 = vst [vmem:[#allocation227_spill] sm:$0xff] %v6640_v62  ;;  %v1160_v40 = vpop.xlane.xlu0 %1159  ;;  %v6649_v31 = vmul.f32 %v6636_v7, %v6437_v59 }
 0x1ee   : > { %4487 = vrsqrt.f32 %v2391_v46  ;;  %v2392_v21 = vadd.f32 0.001, %v2308_v24  ;;  %1899 = vadd.xlane.f32.xlu1 %v9071_v43  ;;  %v6655_v1 = vmul.f32 0.0051020407, %v1160_v40  ;;  %v9073_v46 = vld [vmem:[#allocation123_spill] sm:$0xff] }
 0x1ef   : > { %v1164_v48 = vpop.xlane.xlu1 %1163 }
 0x1f0   : > { %4489 = vrsqrt.f32 %v2392_v21  ;;  %1231 = vadd.xlane.f32.xlu0 %v9072_v12  ;;  %v6658_v59 = vmul.f32 0.0051020407, %v1164_v48  ;;  %v2141_v50 = vmul.f32 %v6655_v1, %v6655_v1  ;;  %v2560_v12 = vld [vmem:[%s6369_s26 + $0x30] sm:$0xff] }
 0x1f1   : > { %v1328_v41 = vpop.xlane.xlu0 %1327 }
 0x1f2   : > { %1235 = vadd.xlane.f32.xlu1 %v5974_v47  ;;  %v6663_v43 = vmul.f32 0.0051020407, %v1328_v41  ;;  %v2142_v48 = vmul.f32 %v6658_v59, %v6658_v59 }
 0x1f3   : > { %v1332_v10 = vpop.xlane.xlu1 %1331 }
 0x1f4   : > { %1399 = vadd.xlane.f32.xlu0 %v9073_v46  ;;  %9074 = vst [vmem:[#allocation112_spill] sm:$0xff] %v6663_v43  ;;  %v6667_v40 = vmul.f32 0.0051020407, %v1332_v10  ;;  %v2561_v46 = vld [vmem:[%s6369_s26 + $0x38] sm:$0xff] }
 0x1f5   : > { %v1664_v24 = vpop.xlane.xlu0 %1663 }
 0x1f6   : > { %v2057_v21 = vmul.f32 0.0051020407, %v1664_v24  ;;  %1403 = vadd.xlane.f32.xlu1 %v5977_v52  ;;  %9075 = vst [vmem:[#allocation113_spill] sm:$0xff] %v6667_v40  ;;  %v6677_v52 = vmul.f32 %v6663_v43, %v6663_v43 }
 0x1f7   : > { %v1668_v35 = vpop.xlane.xlu1 %1667 }
 0x1f8   : > { %v4488_v47 = vpop.eup %4487  ;;  %v2225_v19 = vsub.f32 %v2057_v21, %v2141_v50  ;;  %v2058_v22 = vmul.f32 0.0051020407, %v1668_v35  ;;  %1735 = vadd.xlane.f32.xlu0 %v5981_v14  ;;  %9077 = vst [vmem:[#allocation123_spill] sm:$0xff] %v6677_v52  ;;  %v6684_v35 = vmul.f32 %v6667_v40, %v6667_v40 }
 0x1f9   : > { %v1832_v25 = vpop.xlane.xlu0 %1831  ;;  %v6673_v62 = vmul.f32 %v4488_v47, %v2560_v12 }
 0x1fa   : > { %v4490_v41 = vpop.eup %4489  ;;  %v2309_v10 = vmax.f32 %v2225_v19, 0.0  ;;  %v2226_v24 = vsub.f32 %v2058_v22, %v2142_v48  ;;  %v6679_v7 = vmul.f32 0.0051020407, %v1832_v25  ;;  %1739 = vadd.xlane.f32.xlu1 %v5988_v11  ;;  %v9080_v19 = vld [vmem:[#allocation124_spill] sm:$0xff] }
 0x1fb   : > { %9076 = vst [vmem:[#allocation122_spill] sm:$0xff] %v6673_v62  ;;  %v1836_v14 = vpop.xlane.xlu1 %1835  ;;  %v6686_v50 = vmul.f32 %v4490_v41, %v2561_v46  ;;  %v6690_v21 = vmul.f32 %v6673_v62, %v6559_v29  ;;  %v9081_v41 = vld [vmem:[#allocation125_spill] sm:$0xff] }
 0x1fc   : > { %v2393_v12 = vadd.f32 0.001, %v2309_v10  ;;  %v2310_v47 = vmax.f32 %v2226_v24, 0.0  ;;  %v6694_v25 = vmul.f32 0.0051020407, %v1836_v14  ;;  %1903 = vadd.xlane.f32.xlu0 %v9080_v19  ;;  %v9082_v24 = vld [vmem:[#allocation134_spill] sm:$0xff] }
 0x1fd   : > { %9078 = vst [vmem:[#allocation228_spill] sm:$0xff] %v6686_v50  ;;  %9079 = vst [vmem:[#allocation229_spill] sm:$0xff] %v6690_v21  ;;  %v1168_v11 = vpop.xlane.xlu0 %1167  ;;  %v6699_v48 = vmul.f32 %v6686_v50, %v6585_v28  ;;  %v4651_v14 = vmov 0  }
 0x1fe   : > { %4491 = vrsqrt.f32 %v2393_v12  ;;  %v2394_v46 = vadd.f32 0.001, %v2310_v47  ;;  %1907 = vadd.xlane.f32.xlu1 %v9081_v41  ;;  %4473 = vset.pattern.permute.xlu0 %v4651_v14  ;;  %v6705_v22 = vmul.f32 0.0051020407, %v1168_v11  ;;  %v9083_v47 = vld [vmem:[#allocation135_spill] sm:$0xff] }
 0x1ff   : > { %v1172_v10 = vpop.xlane.xlu1 %1171  ;;  %4474 = vset.pattern.permute.xlu1 %v4651_v14  ;;  %v2562_v14 = vld [vmem:[%s6369_s26 + $0x40] sm:$0xff] }
 0x200   : > { %4493 = vrsqrt.f32 %v2394_v46  ;;  %1239 = vadd.xlane.f32.xlu0 %v9082_v24  ;;  %v6708_v12 = vmul.f32 0.0051020407, %v1172_v10  ;;  %v2143_v46 = vmul.f32 %v6705_v22, %v6705_v22 }
 0x201   : > { %v1336_v19 = vpop.xlane.xlu0 %1335 }
 0x202   : > { %1243 = vadd.xlane.f32.xlu1 %v6042_v32  ;;  %v6713_v29 = vmul.f32 0.0051020407, %v1336_v19  ;;  %v2144_v10 = vmul.f32 %v6708_v12, %v6708_v12 }
 0x203   : > { %v1340_v28 = vpop.xlane.xlu1 %1339 }
 0x204   : > { %1407 = vadd.xlane.f32.xlu0 %v9083_v47  ;;  %9084 = vst [vmem:[#allocation124_spill] sm:$0xff] %v6713_v29  ;;  %v6717_v11 = vmul.f32 0.0051020407, %v1340_v28  ;;  %v2563_v47 = vld [vmem:[%s6369_s26 + $0x48] sm:$0xff] }
 0x205   : > { %v1672_v41 = vpop.xlane.xlu0 %1671 }
 0x206   : > { %v2059_v24 = vmul.f32 0.0051020407, %v1672_v41  ;;  %1411 = vadd.xlane.f32.xlu1 %v6045_v17  ;;  %9085 = vst [vmem:[#allocation125_spill] sm:$0xff] %v6717_v11  ;;  %v6727_v17 = vmul.f32 %v6713_v29, %v6713_v29 }
 0x207   : > { %v1676_v43 = vpop.xlane.xlu1 %1675 }
 0x208   : > { %v4492_v32 = vpop.eup %4491  ;;  %v2227_v40 = vsub.f32 %v2059_v24, %v2143_v46  ;;  %v2060_v21 = vmul.f32 0.0051020407, %v1676_v43  ;;  %1743 = vadd.xlane.f32.xlu0 %v6049_v56  ;;  %9087 = vst [vmem:[#allocation135_spill] sm:$0xff] %v6727_v17  ;;  %v6734_v43 = vmul.f32 %v6717_v11, %v6717_v11 }
 0x209   : > { %v1840_v50 = vpop.xlane.xlu0 %1839  ;;  %v6723_v62 = vmul.f32 %v4492_v32, %v2562_v14 }
 0x20a   : > { %v4494_v19 = vpop.eup %4493  ;;  %v2311_v28 = vmax.f32 %v2227_v40, 0.0  ;;  %v2228_v41 = vsub.f32 %v2060_v21, %v2144_v10  ;;  %v6729_v52 = vmul.f32 0.0051020407, %v1840_v50  ;;  %1747 = vadd.xlane.f32.xlu1 %v6056_v2  ;;  %v9090_v21 = vld [vmem:[#allocation136_spill] sm:$0xff] }
 0x20b   : > { %9086 = vst [vmem:[#allocation134_spill] sm:$0xff] %v6723_v62  ;;  %v1844_v56 = vpop.xlane.xlu1 %1843  ;;  %v6736_v46 = vmul.f32 %v4494_v19, %v2563_v47  ;;  %v6740_v24 = vmul.f32 %v6723_v62, %v6655_v1  ;;  %v9092_v19 = vld [vmem:[#allocation137_spill] sm:$0xff] }
 0x20c   : > { %9088 = vst [vmem:[#allocation230_spill] sm:$0xff] %v6729_v52  ;;  %v2395_v14 = vadd.f32 0.001, %v2311_v28  ;;  %v2312_v32 = vmax.f32 %v2228_v41, 0.0  ;;  %v6744_v50 = vmul.f32 0.0051020407, %v1844_v56  ;;  %1911 = vadd.xlane.f32.xlu0 %v9090_v21 }
 0x20d   : > { %9089 = vst [vmem:[#allocation231_spill] sm:$0xff] %v6740_v24  ;;  %v1176_v2 = vpop.xlane.xlu0 %1175  ;;  %v6749_v10 = vmul.f32 %v6736_v46, %v6658_v59  ;;  %v9093_v41 = vld [vmem:[#allocation146_spill] sm:$0xff] }
 0x20e   : > { %4495 = vrsqrt.f32 %v2395_v14  ;;  %v2396_v47 = vadd.f32 0.001, %v2312_v32  ;;  %1915 = vadd.xlane.f32.xlu1 %v9092_v19  ;;  %v6755_v40 = vmul.f32 0.0051020407, %v1176_v2  ;;  %v9094_v14 = vld [vmem:[#allocation147_spill] sm:$0xff] }
 0x20f   : > { %9091 = vst [vmem:[#allocation136_spill] sm:$0xff] %v6749_v10  ;;  %v1180_v28 = vpop.xlane.xlu1 %1179  ;;  %v9099_v10 = vld [vmem:[#allocation149_spill] sm:$0xff] }
 0x210   : > { %4497 = vrsqrt.f32 %v2396_v47  ;;  %1247 = vadd.xlane.f32.xlu0 %v9093_v41  ;;  %v6758_v59 = vmul.f32 0.0051020407, %v1180_v28  ;;  %v2145_v1 = vmul.f32 %v6755_v40, %v6755_v40  ;;  %v2564_v41 = vld [vmem:[%s6369_s26 + $0x50] sm:$0xff] }
 0x211   : > { %v1344_v56 = vpop.xlane.xlu0 %1343 }
 0x212   : > { %1251 = vadd.xlane.f32.xlu1 %v6110_v45  ;;  %v6763_v19 = vmul.f32 0.0051020407, %v1344_v56  ;;  %v2146_v28 = vmul.f32 %v6758_v59, %v6758_v59 }
 0x213   : > { %v1348_v21 = vpop.xlane.xlu1 %1347 }
 0x214   : > { %1415 = vadd.xlane.f32.xlu0 %v9094_v14  ;;  %9095 = vst [vmem:[#allocation137_spill] sm:$0xff] %v6763_v19  ;;  %v6767_v2 = vmul.f32 0.0051020407, %v1348_v21  ;;  %v2565_v14 = vld [vmem:[%s6369_s26 + $0x58] sm:$0xff] }
 0x215   : > { %v1680_v32 = vpop.xlane.xlu0 %1679 }
 0x216   : > { %v2061_v47 = vmul.f32 0.0051020407, %v1680_v32  ;;  %1419 = vadd.xlane.f32.xlu1 %v6113_v0  ;;  %9096 = vst [vmem:[#allocation146_spill] sm:$0xff] %v6767_v2  ;;  %v6777_v0 = vmul.f32 %v6763_v19, %v6763_v19 }
 0x217   : > { %v1684_v29 = vpop.xlane.xlu1 %1683 }
 0x218   : > { %v4496_v45 = vpop.eup %4495  ;;  %v2229_v11 = vsub.f32 %v2061_v47, %v2145_v1  ;;  %v2062_v24 = vmul.f32 0.0051020407, %v1684_v29  ;;  %1751 = vadd.xlane.f32.xlu0 %v6117_v51  ;;  %9098 = vst [vmem:[#allocation232_spill] sm:$0xff] %v6777_v0  ;;  %v6784_v29 = vmul.f32 %v6767_v2, %v6767_v2 }
 0x219   : > { %v1848_v62 = vpop.xlane.xlu0 %1847  ;;  %v6773_v17 = vmul.f32 %v4496_v45, %v2564_v41 }
 0x21a   : > { %v4498_v56 = vpop.eup %4497  ;;  %v2313_v21 = vmax.f32 %v2229_v11, 0.0  ;;  %v2230_v32 = vsub.f32 %v2062_v24, %v2146_v28  ;;  %v6779_v52 = vmul.f32 0.0051020407, %v1848_v62  ;;  %1755 = vadd.xlane.f32.xlu1 %v9099_v10  ;;  %v9101_v24 = vld [vmem:[#allocation148_spill] sm:$0xff] }
 0x21b   : > { %9097 = vst [vmem:[#allocation147_spill] sm:$0xff] %v6773_v17  ;;  %v1852_v51 = vpop.xlane.xlu1 %1851  ;;  %v6786_v1 = vmul.f32 %v4498_v56, %v2565_v14  ;;  %v6790_v47 = vmul.f32 %v6773_v17, %v6705_v22  ;;  %v9102_v56 = vld [vmem:[#allocation150_spill] sm:$0xff] }
 0x21c   : > { %v2397_v41 = vadd.f32 0.001, %v2313_v21  ;;  %v2314_v45 = vmax.f32 %v2230_v32, 0.0  ;;  %v6794_v62 = vmul.f32 0.0051020407, %v1852_v51  ;;  %1919 = vadd.xlane.f32.xlu0 %v9101_v24  ;;  %v9103_v32 = vld [vmem:[#allocation158_spill] sm:$0xff] }
 0x21d   : > { %9100 = vst [vmem:[#allocation149_spill] sm:$0xff] %v6790_v47  ;;  %v1184_v10 = vpop.xlane.xlu0 %1183  ;;  %v6799_v28 = vmul.f32 %v6786_v1, %v6708_v12 }
 0x21e   : > { %4499 = vrsqrt.f32 %v2397_v41  ;;  %v2398_v14 = vadd.f32 0.001, %v2314_v45  ;;  %1923 = vadd.xlane.f32.xlu1 %v9102_v56  ;;  %v6805_v11 = vmul.f32 0.0051020407, %v1184_v10 }
 0x21f   : > { %v1188_v21 = vpop.xlane.xlu1 %1187 }
 0x220   : > { %4501 = vrsqrt.f32 %v2398_v14  ;;  %1255 = vadd.xlane.f32.xlu0 %v9103_v32  ;;  %v6808_v12 = vmul.f32 0.0051020407, %v1188_v21  ;;  %v2147_v45 = vmul.f32 %v6805_v11, %v6805_v11  ;;  %v2566_v32 = vld [vmem:[%s6369_s26 + $0x60] sm:$0xff] }
 0x221   : > { %v1352_v51 = vpop.xlane.xlu0 %1351 }
 0x222   : > { %1259 = vadd.xlane.f32.xlu1 %v6176_v13  ;;  %v6813_v56 = vmul.f32 0.0051020407, %v1352_v51  ;;  %v2148_v21 = vmul.f32 %v6808_v12, %v6808_v12 }
 0x223   : > { %v1356_v24 = vpop.xlane.xlu1 %1355 }
 0x224   : > { %1423 = vadd.xlane.f32.xlu0 %v6179_v63  ;;  %9104 = vst [vmem:[#allocation148_spill] sm:$0xff] %v6813_v56  ;;  %v6817_v10 = vmul.f32 0.0051020407, %v1356_v24  ;;  %v2567_v63 = vld [vmem:[%s6369_s26 + $0x68] sm:$0xff] }
 0x225   : > { %v1688_v41 = vpop.xlane.xlu0 %1687 }
 0x226   : > { %v2063_v14 = vmul.f32 0.0051020407, %v1688_v41  ;;  %1427 = vadd.xlane.f32.xlu1 %v6183_v58  ;;  %9105 = vst [vmem:[#allocation150_spill] sm:$0xff] %v6817_v10  ;;  %v6827_v58 = vmul.f32 %v6813_v56, %v6813_v56  ;;  %v2569_v56 = vld [vmem:[%s6369_s26 + $0x78] sm:$0xff] }
 0x227   : > { %v1692_v22 = vpop.xlane.xlu1 %1691 }
 0x228   : > { %v4500_v13 = vpop.eup %4499  ;;  %v2231_v19 = vsub.f32 %v2063_v14, %v2147_v45  ;;  %v2064_v2 = vmul.f32 0.0051020407, %v1692_v22  ;;  %1759 = vadd.xlane.f32.xlu0 %v6185_v34  ;;  %v6834_v22 = vmul.f32 %v6817_v10, %v6817_v10 }
 0x229   : > { %v1856_v47 = vpop.xlane.xlu0 %1855  ;;  %v6823_v17 = vmul.f32 %v4500_v13, %v2566_v32 }
 0x22a   : > { %v4502_v51 = vpop.eup %4501  ;;  %v2315_v24 = vmax.f32 %v2231_v19, 0.0  ;;  %v2232_v41 = vsub.f32 %v2064_v2, %v2148_v21  ;;  %v6829_v0 = vmul.f32 0.0051020407, %v1856_v47  ;;  %1763 = vadd.xlane.f32.xlu1 %v6189_v33 }
 0x22b   : > { %9106 = vst [vmem:[#allocation158_spill] sm:$0xff] %v6823_v17  ;;  %v1860_v34 = vpop.xlane.xlu1 %1859  ;;  %v6836_v45 = vmul.f32 %v4502_v51, %v2567_v63  ;;  %v6840_v14 = vmul.f32 %v6823_v17, %v6755_v40  ;;  %v9110_v17 = vld [vmem:[#allocation169_spill] sm:$0xff] }
 0x22c   : > { %v2399_v32 = vadd.f32 0.001, %v2315_v24  ;;  %v2316_v13 = vmax.f32 %v2232_v41, 0.0  ;;  %v6844_v2 = vmul.f32 0.0051020407, %v1860_v34  ;;  %1927 = vadd.xlane.f32.xlu0 %v6191_v27 }
 0x22d   : > { %9107 = vst [vmem:[#allocation233_spill] sm:$0xff] %v6840_v14  ;;  %v1192_v33 = vpop.xlane.xlu0 %1191  ;;  %v6849_v47 = vmul.f32 %v6836_v45, %v6758_v59 }
 0x22e   : > { %4503 = vrsqrt.f32 %v2399_v32  ;;  %v2400_v21 = vadd.f32 0.001, %v2316_v13  ;;  %1931 = vadd.xlane.f32.xlu1 %v6195_v37  ;;  %v1981_v27 = vmul.f32 0.0051020407, %v1192_v33  ;;  %v2568_v37 = vld [vmem:[%s6369_s26 + $0x70] sm:$0xff] }
 0x22f   : > { %v1196_v63 = vpop.xlane.xlu1 %1195  ;;  %v9108_v33 = vld [vmem:[#allocation168_spill] sm:$0xff] }
 0x230   : > { %4505 = vrsqrt.f32 %v2400_v21  ;;  %1263 = vadd.xlane.f32.xlu0 %v6226_v3  ;;  %v1982_v24 = vmul.f32 0.0051020407, %v1196_v63  ;;  %v2149_v34 = vmul.f32 %v1981_v27, %v1981_v27 }
 0x231   : > { %v6855_v51 = vpop.xlane.xlu0 %1359 }
 0x232   : > { %1267 = vadd.xlane.f32.xlu1 %v6229_v8  ;;  %v2150_v3 = vmul.f32 %v1982_v24, %v1982_v24 }
 0x233   : > { %v6858_v59 = vpop.xlane.xlu1 %1363 }
 0x234   : > { %1431 = vadd.xlane.f32.xlu0 %v6257_v61 }
 0x235   : > { %v1696_v41 = vpop.xlane.xlu0 %1695 }
 0x236   : > { %v2065_v32 = vmul.f32 0.0051020407, %v1696_v41  ;;  %1435 = vadd.xlane.f32.xlu1 %v6260_v15 }
 0x237   : > { %v1700_v13 = vpop.xlane.xlu1 %1699 }
 0x238   : > { %v4504_v21 = vpop.eup %4503  ;;  %v2233_v19 = vsub.f32 %v2065_v32, %v2149_v34  ;;  %v2066_v40 = vmul.f32 0.0051020407, %v1700_v13  ;;  %1767 = vadd.xlane.f32.xlu0 %v9108_v33  ;;  %v9112_v33 = vld [vmem:[#allocation171_spill] sm:$0xff] }
 0x239   : > { %v6865_v8 = vpop.xlane.xlu0 %1863  ;;  %v6867_v10 = vmul.f32 %v4504_v21, %v2568_v37  ;;  %v9117_v21 = vld [vmem:[#allocation187_spill] sm:$0xff] }
 0x23a   : > { %v4506_v63 = vpop.eup %4505  ;;  %v2317_v61 = vmax.f32 %v2233_v19, 0.0  ;;  %v2234_v14 = vsub.f32 %v2066_v40, %v2150_v3  ;;  %1771 = vadd.xlane.f32.xlu1 %v9110_v17 }
 0x23b   : > { %9109 = vst [vmem:[#allocation168_spill] sm:$0xff] %v6867_v10  ;;  %v6870_v41 = vpop.xlane.xlu1 %1867  ;;  %v6872_v15 = vmul.f32 %v4506_v63, %v2569_v56  ;;  %v6876_v34 = vmul.f32 %v6867_v10, %v6805_v11  ;;  %v9114_v56 = vld [vmem:[#allocation172_spill] sm:$0xff]  ;;  %v9115_v11 = vld [vmem:[#allocation186_spill] sm:$0xff] }
 0x23c   : > { %v2401_v32 = vadd.f32 0.001, %v2317_v61  ;;  %v2318_v13 = vmax.f32 %v2234_v14, 0.0  ;;  %1935 = vadd.xlane.f32.xlu0 %v9112_v33  ;;  %v9118_v63 = vld [vmem:[#allocation188_spill] sm:$0xff]  ;;  %v9120_v61 = vld [vmem:[#allocation189_spill] sm:$0xff] }
 0x23d   : > { %9111 = vst [vmem:[#allocation169_spill] sm:$0xff] %v6876_v34  ;;  %v6879_v37 = vpop.xlane.xlu0 %1199  ;;  %v6883_v19 = vmul.f32 %v6872_v15, %v6808_v12  ;;  %v9124_v10 = vld [vmem:[#allocation192_spill] sm:$0xff] }
 0x23e   : > { %9113 = vst [vmem:[#allocation171_spill] sm:$0xff] %v6879_v37  ;;  %4507 = vrsqrt.f32 %v2401_v32  ;;  %v2402_v17 = vadd.f32 0.001, %v2318_v13  ;;  %1939 = vadd.xlane.f32.xlu1 %v9114_v56  ;;  %v2570_v32 = vld [vmem:[%s6369_s26 + $0x80] sm:$0xff]  ;;  %v9121_v56 = vld [vmem:[#allocation191_spill] sm:$0xff] }
 0x23f   : > { %v6886_v40 = vpop.xlane.xlu1 %1203 }
 0x240   : > { %4509 = vrsqrt.f32 %v2402_v17  ;;  %1271 = vadd.xlane.f32.xlu0 %v9115_v11  ;;  %v2571_v17 = vld [vmem:[%s6369_s26 + $0x88] sm:$0xff] }
 0x241   : > { %v6889_v14 = vpop.xlane.xlu0 %1367 }
 0x242   : > { %9116 = vst [vmem:[#allocation172_spill] sm:$0xff] %v6889_v14  ;;  %1275 = vadd.xlane.f32.xlu1 %v9117_v21 }
 0x243   : > { %v6892_v3 = vpop.xlane.xlu1 %1371 }
 0x244   : > { %1439 = vadd.xlane.f32.xlu0 %v9118_v63 }
 0x245   : > { %v6895_v12 = vpop.xlane.xlu0 %1703 }
 0x246   : > { %9119 = vst [vmem:[#allocation186_spill] sm:$0xff] %v6895_v12  ;;  %1443 = vadd.xlane.f32.xlu1 %v9120_v61  ;;  %v9126_v12 = vld [vmem:[#allocation194_spill] sm:$0xff] }
 0x247   : > { %v6899_v13 = vpop.xlane.xlu1 %1707 }
 0x248   : > { %v4508_v33 = vpop.eup %4507  ;;  %1775 = vadd.xlane.f32.xlu0 %v9121_v56 }
 0x249   : > { %v6903_v11 = vpop.xlane.xlu0 %1871  ;;  %v6905_v34 = vmul.f32 %v4508_v33, %v2570_v32 }
 0x24a   : > { %9122 = vst [vmem:[#allocation187_spill] sm:$0xff] %v6903_v11  ;;  %v4510_v21 = vpop.eup %4509  ;;  %1779 = vadd.xlane.f32.xlu1 %v9124_v10  ;;  %v9127_v11 = vld [vmem:[#allocation196_spill] sm:$0xff] }
 0x24b   : > { %9123 = vst [vmem:[#allocation188_spill] sm:$0xff] %v6905_v34  ;;  %v6908_v14 = vpop.xlane.xlu1 %1875  ;;  %v6910_v63 = vmul.f32 %v4510_v21, %v2571_v17  ;;  %v6913_v61 = vmul.f32 %v6905_v34, %v1981_v27  ;;  %v9134_v21 = vld [vmem:[#allocation110_spill] sm:$0xff] }
 0x24c   : > { %1943 = vadd.xlane.f32.xlu0 %v9126_v12  ;;  %v9129_v12 = vld [vmem:[#allocation98_spill] sm:$0xff] }
 0x24d   : > { %9125 = vst [vmem:[#allocation189_spill] sm:$0xff] %v6913_v61  ;;  %v6916_v37 = vpop.xlane.xlu0 %1207  ;;  %v6919_v56 = vmul.f32 %v6910_v63, %v1982_v24 }
 0x24e   : > { %1947 = vadd.xlane.f32.xlu1 %v9127_v11 }
 0x24f   : > { %v6922_v32 = vpop.xlane.xlu1 %1211 }
 0x250   : > { %1279 = vadd.xlane.f32.xlu0 %v6471_v23 }
 0x251   : > { %v6925_v10 = vpop.xlane.xlu0 %1375 }
 0x252   : > { %9128 = vst [vmem:[#allocation191_spill] sm:$0xff] %v6925_v10  ;;  %1283 = vadd.xlane.f32.xlu1 %v6474_v49  ;;  %v9152_v10 = vld [vmem:[#allocation199_spill] sm:$0xff] }
 0x253   : > { %v6928_v33 = vpop.xlane.xlu1 %1379 }
 0x254   : > { %1447 = vadd.xlane.f32.xlu0 %v6477_v9 }
 0x255   : > { %v6931_v27 = vpop.xlane.xlu0 %1711 }
 0x256   : > { %1451 = vadd.xlane.f32.xlu1 %v9129_v12  ;;  %v9135_v12 = vld [vmem:[#allocation184_spill] sm:$0xff] }
 0x257   : > { %v6934_v24 = vpop.xlane.xlu1 %1715 }
 0x258   : > { %1783 = vadd.xlane.f32.xlu0 %v6487_v36 }
 0x259   : > { %v6937_v17 = vpop.xlane.xlu0 %1879 }
 0x25a   : > { %9130 = vst [vmem:[#allocation192_spill] sm:$0xff] %v6937_v17  ;;  %1787 = vadd.xlane.f32.xlu1 %v6493_v54 }
 0x25b   : > { %v6940_v23 = vpop.xlane.xlu1 %1883 }
 0x25c   : > { %1951 = vadd.xlane.f32.xlu0 %v6500_v16 }
 0x25d   : > { %v6943_v49 = vpop.xlane.xlu0 %1215 }
 0x25e   : > { %9131 = vst [vmem:[#allocation194_spill] sm:$0xff] %v6943_v49  ;;  %1955 = vadd.xlane.f32.xlu1 %v6502_v39  ;;  %v9136_v39 = vld [vmem:[#allocation183_spill] sm:$0xff]  ;;  %v9149_v49 = vld [vmem:[#allocation202_spill] sm:$0xff] }
 0x25f   : > { %v6946_v9 = vpop.xlane.xlu1 %1219  ;;  %v9137_v61 = vsub.f32 %v9135_v12, %v9136_v39 }
 0x260   : > { %1287 = vadd.xlane.f32.xlu0 %v6556_v30 }
 0x261   : > { %v6949_v11 = vpop.xlane.xlu0 %1383  ;;  %v2343_v34 = vmax.f32 %v9137_v61, 0.0 }
 0x262   : > { %9132 = vst [vmem:[#allocation196_spill] sm:$0xff] %v6949_v11  ;;  %1291 = vadd.xlane.f32.xlu1 %v6567_v5 }
 0x263   : > { %v6952_v36 = vpop.xlane.xlu1 %1387  ;;  %v2427_v11 = vadd.f32 0.001, %v2343_v34 }
 0x264   : > { %1455 = vadd.xlane.f32.xlu0 %v6596_v57 }
 0x265   : > { %v6955_v54 = vpop.xlane.xlu0 %1719  ;;  %4511 = vrsqrt.f32 %v2427_v11 }
 0x266   : > { %9133 = vst [vmem:[#allocation98_spill] sm:$0xff] %v6955_v54  ;;  %1459 = vadd.xlane.f32.xlu1 %v9134_v21  ;;  %v9141_v21 = vld [vmem:[#allocation174_spill] sm:$0xff]  ;;  %v9142_v54 = vld [vmem:[#allocation173_spill] sm:$0xff] }
 0x267   : > { %v6958_v16 = vpop.xlane.xlu1 %1723  ;;  %v9143_v12 = vsub.f32 %v9141_v21, %v9142_v54  ;;  %v9153_v54 = vld [vmem:[#allocation198_spill] sm:$0xff] }
 0x268   : > { %1791 = vadd.xlane.f32.xlu0 %v6604_v20  ;;  %v9154_v21 = vsub.f32 %v9152_v10, %v9153_v54 }
 0x269   : > { %v6964_v30 = vpop.xlane.xlu0 %1887  ;;  %v2344_v61 = vmax.f32 %v9143_v12, 0.0 }
 0x26a   : > { %9138 = vst [vmem:[#allocation110_spill] sm:$0xff] %v6964_v30  ;;  %1795 = vadd.xlane.f32.xlu1 %v6599_v4  ;;  %v2345_v12 = vmax.f32 %v9154_v21, 0.0 }
 0x26b   : > { %v6967_v5 = vpop.xlane.xlu1 %1891  ;;  %v2428_v4 = vadd.f32 0.001, %v2344_v61 }
 0x26c   : > { %9139 = vst [vmem:[#allocation184_spill] sm:$0xff] %v6967_v5  ;;  %1959 = vadd.xlane.f32.xlu0 %v6611_v38  ;;  %v9148_v38 = vld [vmem:[#allocation204_spill] sm:$0xff] }
 0x26d   : > { %v6970_v57 = vpop.xlane.xlu0 %1223  ;;  %4513 = vrsqrt.f32 %v2428_v4  ;;  %v2429_v4 = vadd.f32 0.001, %v2345_v12  ;;  %v2639_v12 = vld [vmem:[%s7011_s29] sm:$0xff] }
 0x26e   : > { %9140 = vst [vmem:[#allocation183_spill] sm:$0xff] %v6970_v57  ;;  %1963 = vadd.xlane.f32.xlu1 %v6616_v26  ;;  %v9150_v57 = vsub.f32 %v9148_v38, %v9149_v49  ;;  %v9160_v38 = vld [vmem:[#allocation218_spill] sm:$0xff] }
 0x26f   : > { %v6976_v39 = vpop.xlane.xlu1 %1227  ;;  %v4512_v61 = vpop.eup %4511 }
 0x270   : > { %9144 = vst [vmem:[#allocation174_spill] sm:$0xff] %v6976_v39  ;;  %v2346_v17 = vmax.f32 %v9150_v57, 0.0  ;;  %v9159_v57 = vld [vmem:[#allocation222_spill] sm:$0xff] }
 0x271   : > { %v6978_v20 = vpop.xlane.xlu0 %1391 }
 0x272   : > { %9145 = vst [vmem:[#allocation173_spill] sm:$0xff] %v6978_v20  ;;  %v2596_v20 = vld [vmem:[%s6369_s26 + $0x150] sm:$0xff] }
 0x273   : > { %v6980_v30 = vpop.xlane.xlu1 %1395  ;;  %v6999_v49 = vmul.f32 %v4512_v61, %v2596_v20  ;;  %v9164_v20 = vld [vmem:[#allocation213_spill] sm:$0xff] }
 0x274   : > { %9146 = vst [vmem:[#allocation234_spill] sm:$0xff] %v6980_v30  ;;  %v2430_v30 = vadd.f32 0.001, %v2346_v17 }
 0x275   : > { %v6982_v34 = vpop.xlane.xlu0 %1727  ;;  %9158 = vst [vmem:[#allocation236_spill] sm:$0xff] %v6999_v49 }
 0x276   : > { %9147 = vst [vmem:[#allocation235_spill] sm:$0xff] %v6982_v34  ;;  %4515 = vrsqrt.f32 %v2430_v30  ;;  %v2597_v30 = vld [vmem:[%s6369_s26 + $0x158] sm:$0xff] }
 0x277   : > { %v6987_v26 = vpop.xlane.xlu1 %1731  ;;  %4517 = vrsqrt.f32 %v2429_v4  ;;  %v4514_v21 = vpop.eup %4513 }
 0x278   : > { %9151 = vst [vmem:[#allocation204_spill] sm:$0xff] %v6987_v26  ;;  %v9161_v26 = vsub.f32 %v9159_v57, %v9160_v38  ;;  %v9166_v57 = vld [vmem:[#allocation201_spill] sm:$0xff]  ;;  %v7021_v4 = vmul.f32 %v4514_v21, %v2597_v30  ;;  %v2640_v38 = vld [vmem:[%s7011_s29 + $0x8] sm:$0xff]  ;;  %v9172_v30 = vld [vmem:[#allocation216_spill] sm:$0xff] }
 0x279   : > { %v6992_v11 = vpop.xlane.xlu0 %1895 }
 0x27a   : > { %9155 = vst [vmem:[#allocation202_spill] sm:$0xff] %v6992_v11  ;;  %v2348_v10 = vmax.f32 %v9161_v26, 0.0  ;;  %9167 = vst [vmem:[#allocation201_spill] sm:$0xff] %v7021_v4  ;;  %v9169_v11 = vld [vmem:[#allocation220_spill] sm:$0xff] }
 0x27b   : > { %v6995_v39 = vpop.xlane.xlu1 %1899 }
 0x27c   : > { %9156 = vst [vmem:[#allocation199_spill] sm:$0xff] %v6995_v39  ;;  %v2432_v26 = vadd.f32 0.001, %v2348_v10 }
 0x27d   : > { %v6997_v34 = vpop.xlane.xlu0 %1231 }
 0x27e   : > { %9157 = vst [vmem:[#allocation198_spill] sm:$0xff] %v6997_v34  ;;  %v2891_v34 = vsub.f32 %v2639_v12, %v9169_v11  ;;  %4519 = vrsqrt.f32 %v2432_v26  ;;  %v2599_v11 = vld [vmem:[%s6369_s26 + $0x168] sm:$0xff]  ;;  %v2598_v26 = vld [vmem:[%s6369_s26 + $0x160] sm:$0xff] }
 0x27f   : > { %v7004_v54 = vpop.xlane.xlu1 %1235  ;;  %3187 = vperm.xlu1 %4474, %v6999_v49  }
 0x280   : > { %9162 = vst [vmem:[#allocation222_spill] sm:$0xff] %v7004_v54 }
 0x281   : > { %v7013_v17 = vpop.xlane.xlu0 %1399 }
 0x282   : > { %9163 = vst [vmem:[#allocation218_spill] sm:$0xff] %v7013_v17  ;;  %2977 = vperm.xlu0 %4473, %v9164_v20   ;;  %v9170_v20 = vsub.f32 %v6644_v42, %v6634_v55  ;;  %v9175_v42 = vld [vmem:[#allocation214_spill] sm:$0xff] }
 0x283   : > { %v7018_v61 = vpop.xlane.xlu1 %1403  ;;  %2982 = vperm.xlu1 %4474, %v9166_v57   ;;  %v9173_v57 = vld [vmem:[#allocation215_spill] sm:$0xff] }
 0x284   : > { %9165 = vst [vmem:[#allocation213_spill] sm:$0xff] %v7018_v61  ;;  %v2350_v10 = vmax.f32 %v9170_v20, 0.0  ;;  %v9171_v61 = vld [vmem:[#allocation206_spill] sm:$0xff]  ;;  %v9174_v54 = vsub.f32 %v9172_v30, %v9173_v57  ;;  %v2642_v20 = vld [vmem:[%s7011_s29 + $0x18] sm:$0xff]  ;;  %v2641_v57 = vld [vmem:[%s7011_s29 + $0x10] sm:$0xff] }
 0x285   : > { %v7024_v49 = vpop.xlane.xlu0 %1735  ;;  %v2892_v21 = vsub.f32 %v2640_v38, %v9171_v61 }
 0x286   : > { %9168 = vst [vmem:[#allocation237_spill] sm:$0xff] %v7024_v49  ;;  %3192 = vperm.xlu0 %4473, %v7021_v4   ;;  %v2347_v39 = vmax.f32 %v9174_v54, 0.0  ;;  %v4516_v49 = vpop.eup %4515  ;;  %v2434_v4 = vadd.f32 0.001, %v2350_v10  ;;  %v2894_v10 = vsub.f32 %v2642_v20, %v6621_v60  ;;  %v9180_v60 = vld [vmem:[#allocation221_spill] sm:$0xff]  ;;  %v2644_v20 = vld [vmem:[%s7011_s29 + $0x28] sm:$0xff] }
 0x287   : > { %v7031_v17 = vpop.xlane.xlu1 %1739  ;;  %3565 = vperm.xlu1 %4474, %v2891_v34   ;;  %v4518_v12 = vpop.eup %4517  ;;  %v7044_v61 = vmul.f32 %v4516_v49, %v2599_v11  ;;  %v2601_v49 = vld [vmem:[%s6369_s26 + $0x178] sm:$0xff]  ;;  %v9178_v11 = vsub.f32 %v6694_v25, %v6684_v35  ;;  %v9181_v35 = vsub.f32 %v6629_v6, %v6627_v18 }
 0x288   : > { %v2431_v34 = vadd.f32 0.001, %v2347_v39  ;;  %v7048_v54 = vmul.f32 %v4518_v12, %v2598_v26  ;;  %4521 = vrsqrt.f32 %v2434_v4  ;;  %v4520_v30 = vpop.eup %4519 }
 0x289   : > { %v7037_v5 = vpop.xlane.xlu0 %1903  ;;  %9176 = vst [vmem:[#allocation220_spill] sm:$0xff] %v7044_v61  ;;  %v2352_v12 = vmax.f32 %v9178_v11, 0.0  ;;  %v7066_v26 = vmul.f32 %v4520_v30, %v2601_v49  ;;  %v2349_v25 = vmax.f32 %v9181_v35, 0.0  ;;  %v2603_v11 = vld [vmem:[%s6369_s26 + $0x188] sm:$0xff] }
 0x28a   : > { %3570 = vperm.xlu0 %4473, %v2892_v21   ;;  %9177 = vst [vmem:[#allocation206_spill] sm:$0xff] %v7048_v54  ;;  %4523 = vrsqrt.f32 %v2431_v34  ;;  %v2893_v34 = vsub.f32 %v2641_v57, %v9180_v60  ;;  %v2600_v57 = vld [vmem:[%s6369_s26 + $0x170] sm:$0xff] }
 0x28b   : > { %v7041_v55 = vpop.xlane.xlu1 %1907  ;;  %2987 = vperm.xlu1 %4474, %v9175_v42   ;;  %9179 = vst [vmem:[#allocation216_spill] sm:$0xff] %v7066_v26  ;;  %v2433_v60 = vadd.f32 0.001, %v2349_v25 }
 0x28d   : > { %v7046_v38 = vpop.xlane.xlu0 %1239 }
 0x28e   : > { %3202 = vperm.xlu0 %4473, %v7044_v61  }
 0x28f   : > { %v7052_v21 = vpop.xlane.xlu1 %1243  ;;  %3197 = vperm.xlu1 %4474, %v7048_v54  }
 0x291   : > { %v7056_v39 = vpop.xlane.xlu0 %1407 }
 0x292   : > { %3580 = vperm.xlu0 %4473, %v2894_v10   ;;  %v2436_v10 = vadd.f32 0.001, %v2352_v12  ;;  %v4522_v30 = vpop.eup %4521 }
 0x293   : > { %v7063_v4 = vpop.xlane.xlu1 %1411  ;;  %2992 = vperm.xlu1 %4474, %v6573_v53   ;;  %v2896_v53 = vsub.f32 %v2644_v20, %v6649_v31  ;;  %v2646_v31 = vld [vmem:[%s7011_s29 + $0x38] sm:$0xff]  ;;  %v9184_v20 = vsub.f32 %v6744_v50, %v6734_v43 }
 0x294   : > { %v4524_v61 = vpop.eup %4523  ;;  %4525 = vrsqrt.f32 %v2436_v10 }
 0x295   : > { %v7068_v42 = vpop.xlane.xlu0 %1743  ;;  %v7090_v6 = vmul.f32 %v4524_v61, %v2600_v57  ;;  %v2354_v10 = vmax.f32 %v9184_v20, 0.0  ;;  %4527 = vrsqrt.f32 %v2433_v60  ;;  %v2643_v61 = vld [vmem:[%s7011_s29 + $0x20] sm:$0xff]  ;;  %v9187_v57 = vld [vmem:[#allocation227_spill] sm:$0xff] }
 0x296   : > { %3212 = vperm.xlu0 %4473, %v7066_v26   ;;  %v2895_v20 = vsub.f32 %v2643_v61, %v9187_v57  ;;  %v9188_v60 = vld [vmem:[#allocation123_spill] sm:$0xff]  ;;  %v2602_v61 = vld [vmem:[%s6369_s26 + $0x180] sm:$0xff] }
 0x297   : > { %v7073_v54 = vpop.xlane.xlu1 %1747  ;;  %3575 = vperm.xlu1 %4474, %v2893_v34   ;;  %v7086_v34 = vmul.f32 %v4522_v30, %v2603_v11  ;;  %9183 = vst [vmem:[#allocation214_spill] sm:$0xff] %v7090_v6  ;;  %v9186_v11 = vld [vmem:[#allocation226_spill] sm:$0xff] }
 0x299   : > { %v7079_v49 = vpop.xlane.xlu0 %1911  ;;  %9182 = vst [vmem:[#allocation215_spill] sm:$0xff] %v7086_v34 }
 0x29a   : > { %3590 = vperm.xlu0 %4473, %v2896_v53   ;;  %v2438_v53 = vadd.f32 0.001, %v2354_v10 }
 0x29b   : > { %v7083_v12 = vpop.xlane.xlu1 %1915  ;;  %2997 = vperm.xlu1 %4474, %v6623_v44   ;;  %v2898_v44 = vsub.f32 %v2646_v31, %v6699_v48  ;;  %v9189_v31 = vsub.f32 %v6679_v7, %v9188_v60 }
 0x29c   : > { %4529 = vrsqrt.f32 %v2438_v53 }
 0x29d   : > { %v7088_v18 = vpop.xlane.xlu0 %1247  ;;  %v2351_v10 = vmax.f32 %v9189_v31, 0.0 }
 0x29e   : > { %3222 = vperm.xlu0 %4473, %v7086_v34   ;;  %v4526_v43 = vpop.eup %4525 }
 0x29f   : > { %v7097_v35 = vpop.xlane.xlu1 %1251  ;;  %3207 = vperm.xlu1 %4474, %v7090_v6   ;;  %v2605_v6 = vld [vmem:[%s6369_s26 + $0x198] sm:$0xff]  ;;  %v4528_v26 = vpop.eup %4527  ;;  %v2435_v7 = vadd.f32 0.001, %v2351_v10  ;;  %v2645_v10 = vld [vmem:[%s7011_s29 + $0x30] sm:$0xff] }
 0x2a0   : > { %v7133_v31 = vmul.f32 %v4528_v26, %v2602_v61  ;;  %v9198_v26 = vld [vmem:[#allocation228_spill] sm:$0xff]  ;;  %v9199_v61 = vld [vmem:[#allocation230_spill] sm:$0xff] }
 0x2a1   : > { %v7101_v25 = vpop.xlane.xlu0 %1415  ;;  %4531 = vrsqrt.f32 %v2435_v7 }
 0x2a2   : > { %9185 = vst [vmem:[#allocation221_spill] sm:$0xff] %v7101_v25  ;;  %3600 = vperm.xlu0 %4473, %v2898_v44   ;;  %v7117_v44 = vmul.f32 %v4526_v43, %v2605_v6  ;;  %v9194_v6 = vld [vmem:[#allocation136_spill] sm:$0xff] }
 0x2a3   : > { %v7104_v30 = vpop.xlane.xlu1 %1419  ;;  %3002 = vperm.xlu1 %4474, %v9186_v11   ;;  %v2648_v11 = vld [vmem:[%s7011_s29 + $0x48] sm:$0xff] }
 0x2a4   : > { %9190 = vst [vmem:[#allocation226_spill] sm:$0xff] %v7117_v44  ;;  %v2900_v43 = vsub.f32 %v2648_v11, %v9194_v6 }
 0x2a5   : > { %v7107_v50 = vpop.xlane.xlu0 %1751 }
 0x2a6   : > { %3022 = vperm.xlu0 %4473, %v6736_v46   ;;  %v9192_v46 = vsub.f32 %v6794_v62, %v6784_v29  ;;  %v4530_v29 = vpop.eup %4529 }
 0x2a7   : > { %v7112_v48 = vpop.xlane.xlu1 %1755  ;;  %3585 = vperm.xlu1 %4474, %v2895_v20   ;;  %v9193_v20 = vld [vmem:[#allocation122_spill] sm:$0xff] }
 0x2a8   : > { %v2356_v53 = vmax.f32 %v9192_v46, 0.0  ;;  %9196 = vst [vmem:[#allocation122_spill] sm:$0xff] %v7133_v31  ;;  %v2607_v46 = vld [vmem:[%s6369_s26 + $0x1a8] sm:$0xff] }
 0x2a9   : > { %v7119_v34 = vpop.xlane.xlu0 %1919 }
 0x2aa   : > { %9191 = vst [vmem:[#allocation227_spill] sm:$0xff] %v7119_v34  ;;  %3232 = vperm.xlu0 %4473, %v7117_v44   ;;  %v2440_v44 = vadd.f32 0.001, %v2356_v53  ;;  %v9200_v53 = vld [vmem:[#allocation135_spill] sm:$0xff] }
 0x2ab   : > { %v7127_v57 = vpop.xlane.xlu1 %1923  ;;  %3007 = vperm.xlu1 %4474, %v9193_v20   ;;  %v9201_v20 = vsub.f32 %v9199_v61, %v9200_v53 }
 0x2ac   : > { %4533 = vrsqrt.f32 %v2440_v44 }
 0x2ad   : > { %v7131_v60 = vpop.xlane.xlu0 %1255  ;;  %v2353_v6 = vmax.f32 %v9201_v20, 0.0  ;;  %v9206_v20 = vld [vmem:[#allocation134_spill] sm:$0xff] }
 0x2ae   : > { %9195 = vst [vmem:[#allocation123_spill] sm:$0xff] %v7131_v60  ;;  %3610 = vperm.xlu0 %4473, %v2900_v43   ;;  %v7149_v43 = vmul.f32 %v4530_v29, %v2607_v46  ;;  %v2650_v60 = vld [vmem:[%s7011_s29 + $0x58] sm:$0xff]  ;;  %v7163_v29 = vmul.f32 0.0051020407, %v6858_v59 }
 0x2af   : > { %v7135_v34 = vpop.xlane.xlu1 %1259  ;;  %3217 = vperm.xlu1 %4474, %v7133_v31   ;;  %v9203_v31 = vld [vmem:[#allocation229_spill] sm:$0xff]  ;;  %v2902_v61 = vsub.f32 %v2650_v60, %v6799_v28 }
 0x2b0   : > { %9202 = vst [vmem:[#allocation228_spill] sm:$0xff] %v7149_v43  ;;  %9205 = vst [vmem:[#allocation230_spill] sm:$0xff] %v7163_v29  ;;  %v2192_v28 = vmul.f32 %v7163_v29, %v7163_v29  ;;  %v7190_v29 = vmul.f32 0.0051020407, %v6886_v40 }
 0x2b1   : > { %v7138_v62 = vpop.xlane.xlu0 %1423 }
 0x2b2   : > { %9197 = vst [vmem:[#allocation136_spill] sm:$0xff] %v7138_v62  ;;  %3032 = vperm.xlu0 %4473, %v6786_v1   ;;  %v2897_v62 = vsub.f32 %v2645_v10, %v9203_v31  ;;  %v9204_v1 = vsub.f32 %v6844_v2, %v6834_v22  ;;  %v4532_v31 = vpop.eup %4531  ;;  %v2604_v10 = vld [vmem:[%s6369_s26 + $0x190] sm:$0xff]  ;;  %v2108_v22 = vmul.f32 0.0051020407, %v6870_v41  ;;  %v2152_v40 = vmul.f32 %v7190_v29, %v7190_v29 }
 0x2b3   : > { %v7143_v11 = vpop.xlane.xlu1 %1427  ;;  %3012 = vperm.xlu1 %4474, %v9198_v26   ;;  %v2437_v26 = vadd.f32 0.001, %v2353_v6  ;;  %v7176_v60 = vmul.f32 %v4532_v31, %v2604_v10  ;;  %v2609_v6 = vld [vmem:[%s6369_s26 + $0x1b8] sm:$0xff] }
 0x2b4   : > { %v2358_v44 = vmax.f32 %v9204_v1, 0.0  ;;  %v2647_v1 = vld [vmem:[%s7011_s29 + $0x40] sm:$0xff]  ;;  %v2276_v41 = vsub.f32 %v2108_v22, %v2192_v28  ;;  %v2068_v28 = vmul.f32 0.0051020407, %v6899_v13 }
 0x2b5   : > { %v7151_v7 = vpop.xlane.xlu0 %1759  ;;  %4535 = vrsqrt.f32 %v2437_v26  ;;  %9207 = vst [vmem:[#allocation135_spill] sm:$0xff] %v7176_v60  ;;  %v9208_v26 = vld [vmem:[#allocation232_spill] sm:$0xff] }
 0x2b6   : > { %3242 = vperm.xlu0 %4473, %v7149_v43   ;;  %v2442_v53 = vadd.f32 0.001, %v2358_v44  ;;  %v2360_v22 = vmax.f32 %v2276_v41, 0.0  ;;  %v2606_v41 = vld [vmem:[%s6369_s26 + $0x1a0] sm:$0xff] }
 0x2b7   : > { %v7159_v25 = vpop.xlane.xlu1 %1763  ;;  %3595 = vperm.xlu1 %4474, %v2897_v62   ;;  %v4534_v62 = vpop.eup %4533 }
 0x2b8   : > { %4537 = vrsqrt.f32 %v2442_v53  ;;  %v7187_v43 = vmul.f32 %v4534_v62, %v2609_v6  ;;  %v2652_v53 = vld [vmem:[%s7011_s29 + $0x68] sm:$0xff]  ;;  %v7204_v6 = vmul.f32 0.0051020407, %v6892_v3  ;;  %v2444_v13 = vadd.f32 0.001, %v2360_v22  ;;  %v2649_v22 = vld [vmem:[%s7011_s29 + $0x50] sm:$0xff] }
 0x2b9   : > { %v7165_v46 = vpop.xlane.xlu0 %1927  ;;  %v2904_v62 = vsub.f32 %v2652_v53, %v6849_v47  ;;  %v9214_v47 = vld [vmem:[#allocation147_spill] sm:$0xff] }
 0x2ba   : > { %3620 = vperm.xlu0 %4473, %v2902_v61   ;;  %v9209_v61 = vsub.f32 %v6779_v52, %v9208_v26  ;;  %9210 = vst [vmem:[#allocation229_spill] sm:$0xff] %v7187_v43  ;;  %9213 = vst [vmem:[#allocation232_spill] sm:$0xff] %v7204_v6  ;;  %v2194_v3 = vmul.f32 %v7204_v6, %v7204_v6 }
 0x2bb   : > { %v7169_v2 = vpop.xlane.xlu1 %1931  ;;  %3017 = vperm.xlu1 %4474, %v9206_v20  }
 0x2bc   : > { %v2355_v20 = vmax.f32 %v9209_v61, 0.0  ;;  %v2236_v61 = vsub.f32 %v2068_v28, %v2152_v40 }
 0x2bd   : > { %v7174_v59 = vpop.xlane.xlu0 %1263 }
 0x2be   : > { %3042 = vperm.xlu0 %4473, %v6836_v45   ;;  %v9212_v45 = vld [vmem:[#allocation231_spill] sm:$0xff]  ;;  %v2439_v52 = vadd.f32 0.001, %v2355_v20 }
 0x2bf   : > { %v7181_v44 = vpop.xlane.xlu1 %1267  ;;  %3227 = vperm.xlu1 %4474, %v7176_v60   ;;  %v2899_v10 = vsub.f32 %v2647_v1, %v9212_v45  ;;  %v4536_v26 = vpop.eup %4535  ;;  %v2110_v45 = vmul.f32 0.0051020407, %v6908_v14  ;;  %v2320_v14 = vmax.f32 %v2236_v61, 0.0  ;;  %v7238_v61 = vmul.f32 0.0051020407, %v6855_v51 }
 0x2c0   : > { %4539 = vrsqrt.f32 %v2439_v52  ;;  %v9217_v52 = vsub.f32 %v6829_v0, %v6827_v58  ;;  %v2070_v0 = vmul.f32 0.0051020407, %v6934_v24  ;;  %v7249_v51 = vmul.f32 0.0051020407, %v6928_v33 }
 0x2c1   : > { %v7192_v31 = vpop.xlane.xlu0 %1431  ;;  %4541 = vrsqrt.f32 %v2444_v13  ;;  %v2278_v28 = vsub.f32 %v2110_v45, %v2194_v3  ;;  %v2654_v13 = vld [vmem:[%s7011_s29 + $0x78] sm:$0xff]  ;;  %v2404_v45 = vadd.f32 0.001, %v2320_v14  ;;  %v2191_v24 = vmul.f32 %v7238_v61, %v7238_v61 }
 0x2c2   : > { %9211 = vst [vmem:[#allocation134_spill] sm:$0xff] %v7192_v31  ;;  %3252 = vperm.xlu0 %4473, %v7187_v43   ;;  %v7217_v43 = vmul.f32 %v4536_v26, %v2606_v41  ;;  %v7231_v26 = vmul.f32 0.0051020407, %v6922_v32  ;;  %9222 = vst [vmem:[#allocation240_spill] sm:$0xff] %v7249_v51 }
 0x2c3   : > { %v7198_v60 = vpop.xlane.xlu1 %1435  ;;  %3605 = vperm.xlu1 %4474, %v2899_v10   ;;  %v4538_v10 = vpop.eup %4537  ;;  %v2362_v3 = vmax.f32 %v2278_v28, 0.0  ;;  %4543 = vrsqrt.f32 %v2404_v45 }
 0x2c4   : > { %9216 = vst [vmem:[#allocation147_spill] sm:$0xff] %v7217_v43 }
 0x2c5   : > { %v7206_v1 = vpop.xlane.xlu0 %1767 }
 0x2c6   : > { %3630 = vperm.xlu0 %4473, %v2904_v62   ;;  %v2611_v62 = vld [vmem:[%s6369_s26 + $0x1c8] sm:$0xff] }
 0x2c7   : > { %v7210_v20 = vpop.xlane.xlu1 %1771  ;;  %3027 = vperm.xlu1 %4474, %v9214_v47   ;;  %v2357_v47 = vmax.f32 %v9217_v52, 0.0  ;;  %v7228_v6 = vmul.f32 %v4538_v10, %v2611_v62  ;;  %v2107_v10 = vmul.f32 0.0051020407, %v6865_v8  ;;  %v2906_v62 = vsub.f32 %v2654_v13, %v6883_v19  ;;  %v9225_v13 = vld [vmem:[#allocation171_spill] sm:$0xff] }
 0x2c8   : > { %v2446_v8 = vadd.f32 0.001, %v2362_v3  ;;  %v2112_v19 = vmul.f32 0.0051020407, %v6940_v23  ;;  %v2613_v3 = vld [vmem:[%s6369_s26 + $0x1d8] sm:$0xff] }
 0x2c9   : > { %v7215_v53 = vpop.xlane.xlu0 %1935  ;;  %9218 = vst [vmem:[#allocation238_spill] sm:$0xff] %v7228_v6  ;;  %v2441_v32 = vadd.f32 0.001, %v2357_v47  ;;  %v2275_v33 = vsub.f32 %v2107_v10, %v2191_v24 }
 0x2ca   : > { %9215 = vst [vmem:[#allocation231_spill] sm:$0xff] %v7215_v53  ;;  %3052 = vperm.xlu0 %4473, %v6872_v15   ;;  %v9220_v15 = vld [vmem:[#allocation149_spill] sm:$0xff]  ;;  %v4540_v14 = vpop.eup %4539 }
 0x2cb   : > { %v7222_v40 = vpop.xlane.xlu1 %1939  ;;  %3237 = vperm.xlu1 %4474, %v7217_v43   ;;  %v2901_v53 = vsub.f32 %v2649_v22, %v9220_v15  ;;  %9221 = vst [vmem:[#allocation149_spill] sm:$0xff] %v7238_v61  ;;  %v2154_v22 = vmul.f32 %v7231_v26, %v7231_v26  ;;  %v9224_v15 = vld [vmem:[#allocation158_spill] sm:$0xff]  ;;  %4545 = vrsqrt.f32 %v2441_v32  ;;  %v7261_v43 = vmul.f32 0.0051020407, %v9225_v13 }
 0x2cc   : > { %4547 = vrsqrt.f32 %v2446_v8  ;;  %v9233_v8 = vld [vmem:[#allocation233_spill] sm:$0xff] }
 0x2cd   : > { %v7233_v41 = vpop.xlane.xlu0 %1271  ;;  %v2238_v28 = vsub.f32 %v2070_v0, %v2154_v22  ;;  %v9228_v0 = vld [vmem:[#allocation186_spill] sm:$0xff]  ;;  %v2151_v13 = vmul.f32 %v7261_v43, %v7261_v43 }
 0x2ce   : > { %9219 = vst [vmem:[#allocation239_spill] sm:$0xff] %v7233_v41  ;;  %3262 = vperm.xlu0 %4473, %v7228_v6   ;;  %v4542_v6 = vpop.eup %4541  ;;  %v2067_v23 = vmul.f32 0.0051020407, %v9228_v0  ;;  %v2651_v22 = vld [vmem:[%s7011_s29 + $0x60] sm:$0xff]  ;;  %v7284_v0 = vmul.f32 0.0051020407, %v6946_v9 }
 0x2cf   : > { %v7242_v58 = vpop.xlane.xlu1 %1275  ;;  %3615 = vperm.xlu1 %4474, %v2901_v53   ;;  %v2608_v53 = vld [vmem:[%s6369_s26 + $0x1b0] sm:$0xff]  ;;  %v2322_v32 = vmax.f32 %v2238_v28, 0.0  ;;  %v2903_v28 = vsub.f32 %v2651_v22, %v9233_v8  ;;  %v4544_v22 = vpop.eup %4543 }
 0x2d0   : > { %v7267_v45 = vmul.f32 %v4540_v14, %v2608_v53  ;;  %v9229_v14 = vld [vmem:[#allocation172_spill] sm:$0xff] }
 0x2d1   : > { %v7251_v52 = vpop.xlane.xlu0 %1439  ;;  %v7279_v53 = vmul.f32 0.0051020407, %v9229_v14  ;;  %v2406_v14 = vadd.f32 0.001, %v2322_v32  ;;  %v7305_v32 = vmul.f32 0.0051020407, %v6952_v36 }
 0x2d2   : > { %9223 = vst [vmem:[#allocation241_spill] sm:$0xff] %v7251_v52  ;;  %3640 = vperm.xlu0 %4473, %v2906_v62   ;;  %v2196_v62 = vmul.f32 %v7249_v51, %v7249_v51  ;;  %9227 = vst [vmem:[#allocation171_spill] sm:$0xff] %v7267_v45  ;;  %v7281_v51 = vmul.f32 %v4542_v6, %v2613_v3  ;;  %v9234_v52 = vld [vmem:[#allocation187_spill] sm:$0xff]  ;;  %v2072_v3 = vmul.f32 0.0051020407, %v6958_v16  ;;  %v9240_v41 = vld [vmem:[#allocation168_spill] sm:$0xff] }
 0x2d3   : > { %v7257_v47 = vpop.xlane.xlu1 %1443  ;;  %3037 = vperm.xlu1 %4474, %v9224_v15   ;;  %v2359_v15 = vmax.f32 %v2275_v33, 0.0  ;;  %9230 = vst [vmem:[#allocation186_spill] sm:$0xff] %v7279_v53  ;;  %v7292_v33 = vmul.f32 0.0051020407, %v6916_v37  ;;  %v2069_v37 = vmul.f32 0.0051020407, %v6931_v27  ;;  %4549 = vrsqrt.f32 %v2406_v14 }
 0x2d4   : > { %v2280_v10 = vsub.f32 %v2112_v19, %v2196_v62  ;;  %9231 = vst [vmem:[#allocation172_spill] sm:$0xff] %v7281_v51  ;;  %v2656_v19 = vld [vmem:[%s7011_s29 + $0x88] sm:$0xff]  ;;  %v2235_v62 = vsub.f32 %v2067_v23, %v2151_v13  ;;  %v2193_v23 = vmul.f32 %v7279_v53, %v7279_v53  ;;  %v2156_v13 = vmul.f32 %v7284_v0, %v7284_v0 }
 0x2d5   : > { %v7265_v61 = vpop.xlane.xlu0 %1775  ;;  %9236 = vst [vmem:[#allocation187_spill] sm:$0xff] %v7305_v32  ;;  %v4546_v8 = vpop.eup %4545  ;;  %v2153_v53 = vmul.f32 %v7292_v33, %v7292_v33  ;;  %v2615_v14 = vld [vmem:[%s6369_s26 + $0x1e8] sm:$0xff] }
 0x2d6   : > { %9226 = vst [vmem:[#allocation158_spill] sm:$0xff] %v7265_v61  ;;  %3062 = vperm.xlu0 %4473, %v6910_v63   ;;  %v2364_v6 = vmax.f32 %v2280_v10, 0.0  ;;  %v2573_v10 = vld [vmem:[%s6369_s26 + $0x98] sm:$0xff] }
 0x2d7   : > { %v7273_v24 = vpop.xlane.xlu1 %1779  ;;  %3247 = vperm.xlu1 %4474, %v7267_v45   ;;  %v2109_v45 = vmul.f32 0.0051020407, %v9234_v52  ;;  %v2908_v52 = vsub.f32 %v2656_v19, %v6919_v56  ;;  %v2610_v56 = vld [vmem:[%s6369_s26 + $0x1c0] sm:$0xff]  ;;  %v2240_v19 = vsub.f32 %v2072_v3, %v2156_v13 }
 0x2d8   : > { %v2448_v27 = vadd.f32 0.001, %v2364_v6  ;;  %v9243_v3 = vld [vmem:[#allocation174_spill] sm:$0xff] }
 0x2d9   : > { %v7286_v63 = vpop.xlane.xlu0 %1943  ;;  %v7325_v13 = vmul.f32 0.0051020407, %v9243_v3 }
 0x2da   : > { %9232 = vst [vmem:[#allocation242_spill] sm:$0xff] %v7286_v63  ;;  %3272 = vperm.xlu0 %4473, %v7281_v51   ;;  %v2443_v63 = vadd.f32 0.001, %v2359_v15  ;;  %v2277_v15 = vsub.f32 %v2109_v45, %v2193_v23  ;;  %v9238_v51 = vld [vmem:[#allocation184_spill] sm:$0xff]  ;;  %v2237_v45 = vsub.f32 %v2069_v37, %v2153_v53  ;;  %v2198_v23 = vmul.f32 %v7305_v32, %v7305_v32  ;;  %v9245_v37 = vld [vmem:[#allocation191_spill] sm:$0xff] }
 0x2db   : > { %v7296_v9 = vpop.xlane.xlu1 %1947  ;;  %3625 = vperm.xlu1 %4474, %v2903_v28   ;;  %v2319_v28 = vmax.f32 %v2235_v62, 0.0  ;;  %v2114_v61 = vmul.f32 0.0051020407, %v9238_v51  ;;  %v4548_v62 = vpop.eup %4547  ;;  %v2653_v51 = vld [vmem:[%s7011_s29 + $0x70] sm:$0xff] }
 0x2dc   : > { %9235 = vst [vmem:[#allocation233_spill] sm:$0xff] %v7296_v9  ;;  %4551 = vrsqrt.f32 %v2443_v63  ;;  %v2324_v63 = vmax.f32 %v2240_v19, 0.0  ;;  %v2321_v32 = vmax.f32 %v2237_v45, 0.0  ;;  %v9251_v19 = vld [vmem:[#allocation192_spill] sm:$0xff] }
 0x2dd   : > { %v7307_v16 = vpop.xlane.xlu0 %1279  ;;  %v2403_v6 = vadd.f32 0.001, %v2319_v28  ;;  %4553 = vrsqrt.f32 %v2448_v27  ;;  %v7335_v28 = vmul.f32 %v4548_v62, %v2615_v14  ;;  %v9252_v14 = vld [vmem:[#allocation234_spill] sm:$0xff] }
 0x2de   : > { %9237 = vst [vmem:[#allocation243_spill] sm:$0xff] %v7307_v16  ;;  %3650 = vperm.xlu0 %4473, %v2908_v52   ;;  %v2742_v16 = vmul.f32 %v4544_v22, %v2573_v10  ;;  %v7321_v52 = vmul.f32 %v4546_v8, %v2610_v56  ;;  %v2282_v22 = vsub.f32 %v2114_v61, %v2198_v23  ;;  %v7332_v10 = vmul.f32 0.0051020407, %v9245_v37  ;;  %v9247_v8 = vld [vmem:[#allocation204_spill] sm:$0xff]  ;;  %v2658_v61 = vld [vmem:[%s7011_s29 + $0x98] sm:$0xff] }
 0x2df   : > { %v7314_v36 = vpop.xlane.xlu1 %1283  ;;  %3047 = vperm.xlu1 %4474, %v9240_v41   ;;  %v2361_v41 = vmax.f32 %v2277_v15, 0.0  ;;  %v2074_v56 = vmul.f32 0.0051020407, %v9247_v8  ;;  %9248 = vst [vmem:[#allocation204_spill] sm:$0xff] %v7335_v28  ;;  %v9250_v15 = vld [vmem:[#allocation169_spill] sm:$0xff]  ;;  %4555 = vrsqrt.f32 %v2403_v6 }
 0x2e0   : > { %9239 = vst [vmem:[#allocation184_spill] sm:$0xff] %v7314_v36  ;;  %9242 = vst [vmem:[#allocation244_spill] sm:$0xff] %v7321_v52  ;;  %v2826_v3 = vmul.f32 %v2742_v16, %v7190_v29  ;;  %v2905_v27 = vsub.f32 %v2653_v51, %v9250_v15  ;;  %v2111_v23 = vmul.f32 0.0051020407, %v9251_v19  ;;  %v2408_v37 = vadd.f32 0.001, %v2324_v63 }
 0x2e1   : > { %v7319_v31 = vpop.xlane.xlu0 %1447  ;;  %9246 = vst [vmem:[#allocation191_spill] sm:$0xff] %v7332_v10  ;;  %v2366_v62 = vmax.f32 %v2282_v22, 0.0  ;;  %v7347_v8 = vmul.f32 0.0051020407, %v9252_v14  ;;  %v2195_v45 = vmul.f32 %v7332_v10, %v7332_v10  ;;  %v2575_v19 = vld [vmem:[%s6369_s26 + $0xa8] sm:$0xff] }
 0x2e2   : > { %9241 = vst [vmem:[#allocation168_spill] sm:$0xff] %v7319_v31  ;;  %3072 = vperm.xlu0 %4473, %v2742_v16   ;;  %v2445_v16 = vadd.f32 0.001, %v2361_v41  ;;  %v2910_v15 = vsub.f32 %v2658_v61, %v2826_v3  ;;  %v9256_v63 = vld [vmem:[#allocation199_spill] sm:$0xff]  ;;  %v9258_v41 = vld [vmem:[#allocation98_spill] sm:$0xff]  ;;  %4557 = vrsqrt.f32 %v2408_v37 }
 0x2e3   : > { %v7328_v53 = vpop.xlane.xlu1 %1451  ;;  %3257 = vperm.xlu1 %4474, %v7321_v52   ;;  %v2158_v52 = vmul.f32 %v7325_v13, %v7325_v13  ;;  %9253 = vst [vmem:[#allocation169_spill] sm:$0xff] %v7347_v8  ;;  %v2116_v22 = vmul.f32 0.0051020407, %v9256_v63  ;;  %v2279_v9 = vsub.f32 %v2111_v23, %v2195_v45 }
 0x2e4   : > { %9244 = vst [vmem:[#allocation174_spill] sm:$0xff] %v7328_v53  ;;  %v2405_v53 = vadd.f32 0.001, %v2321_v32  ;;  %v2200_v32 = vmul.f32 %v7347_v8, %v7347_v8  ;;  %4559 = vrsqrt.f32 %v2445_v16 }
 0x2e5   : > { %v7338_v31 = vpop.xlane.xlu0 %1783  ;;  %v2242_v51 = vsub.f32 %v2074_v56, %v2158_v52  ;;  %v2450_v52 = vadd.f32 0.001, %v2366_v62  ;;  %v2617_v62 = vld [vmem:[%s6369_s26 + $0x1f8] sm:$0xff]  ;;  %v2363_v10 = vmax.f32 %v2279_v9, 0.0 }
 0x2e6   : > { %9249 = vst [vmem:[#allocation245_spill] sm:$0xff] %v7338_v31  ;;  %3282 = vperm.xlu0 %4473, %v7335_v28   ;;  %v4550_v31 = vpop.eup %4549  ;;  %v9255_v28 = vld [vmem:[#allocation194_spill] sm:$0xff]  ;;  %4561 = vrsqrt.f32 %v2405_v53  ;;  %v2284_v45 = vsub.f32 %v2116_v22, %v2200_v32  ;;  %v9264_v53 = vld [vmem:[#allocation196_spill] sm:$0xff] }
 0x2e7   : > { %v7349_v29 = vpop.xlane.xlu1 %1787  ;;  %3635 = vperm.xlu1 %4474, %v2905_v27   ;;  %v7355_v6 = vmul.f32 0.0051020407, %v9255_v28  ;;  %v4552_v36 = vpop.eup %4551  ;;  %v2612_v27 = vld [vmem:[%s6369_s26 + $0x1d0] sm:$0xff]  ;;  %v2326_v3 = vmax.f32 %v2242_v51, 0.0  ;;  %v2744_v61 = vmul.f32 %v4550_v31, %v2575_v19  ;;  %4563 = vrsqrt.f32 %v2450_v52  ;;  %v9267_v32 = vld [vmem:[#allocation222_spill] sm:$0xff] }
 0x2e8   : > { %9254 = vst [vmem:[#allocation192_spill] sm:$0xff] %v7349_v29  ;;  %v2071_v29 = vmul.f32 0.0051020407, %v9258_v41  ;;  %v9260_v28 = vld [vmem:[#allocation188_spill] sm:$0xff]  ;;  %v4554_v63 = vpop.eup %4553  ;;  %v7371_v37 = vmul.f32 %v4552_v36, %v2612_v27  ;;  %v2655_v41 = vld [vmem:[%s7011_s29 + $0x80] sm:$0xff]  ;;  %v2368_v27 = vmax.f32 %v2284_v45, 0.0 }
 0x2e9   : > { %v7358_v14 = vpop.xlane.xlu0 %1951  ;;  %v2155_v23 = vmul.f32 %v7355_v6, %v7355_v6  ;;  %v7379_v16 = vmul.f32 0.0051020407, %v9264_v53  ;;  %v2410_v51 = vadd.f32 0.001, %v2326_v3  ;;  %v7381_v19 = vmul.f32 %v4554_v63, %v2617_v62  ;;  %v4556_v22 = vpop.eup %4555  ;;  %v2572_v3 = vld [vmem:[%s6369_s26 + $0x90] sm:$0xff] }
 0x2ea   : > { %9257 = vst [vmem:[#allocation234_spill] sm:$0xff] %v7358_v14  ;;  %3660 = vperm.xlu0 %4473, %v2910_v15   ;;  %9262 = vst [vmem:[#allocation98_spill] sm:$0xff] %v7371_v37  ;;  %v2828_v36 = vmul.f32 %v2744_v61, %v7231_v26  ;;  %v2447_v63 = vadd.f32 0.001, %v2363_v10  ;;  %v2076_v26 = vmul.f32 0.0051020407, %v7031_v17  ;;  %v2741_v10 = vmul.f32 %v4556_v22, %v2572_v3 }
 0x2eb   : > { %v7364_v56 = vpop.xlane.xlu1 %1955  ;;  %3057 = vperm.xlu1 %4474, %v9260_v28   ;;  %v2239_v8 = vsub.f32 %v2071_v29, %v2155_v23  ;;  %9265 = vst [vmem:[#allocation196_spill] sm:$0xff] %v7379_v16  ;;  %9266 = vst [vmem:[#allocation246_spill] sm:$0xff] %v7381_v19  ;;  %v7385_v28 = vmul.f32 0.0051020407, %v9267_v32  ;;  %v9269_v29 = vld [vmem:[#allocation189_spill] sm:$0xff]  ;;  %v2660_v23 = vld [vmem:[%s7011_s29 + $0xa8] sm:$0xff]  ;;  %v2197_v45 = vmul.f32 %v7379_v16, %v7379_v16  ;;  %4565 = vrsqrt.f32 %v2410_v51 }
 0x2ec   : > { %9259 = vst [vmem:[#allocation194_spill] sm:$0xff] %v7364_v56  ;;  %v2907_v52 = vsub.f32 %v2655_v41, %v9269_v29  ;;  %v2912_v41 = vsub.f32 %v2660_v23, %v2828_v36  ;;  %v4558_v53 = vpop.eup %4557  ;;  %v2452_v32 = vadd.f32 0.001, %v2368_v27  ;;  %v9272_v29 = vld [vmem:[#allocation213_spill] sm:$0xff]  ;;  %v2614_v16 = vld [vmem:[%s6369_s26 + $0x1e0] sm:$0xff]  ;;  %4567 = vrsqrt.f32 %v2447_v63 }
 0x2ed   : > { %v7369_v15 = vpop.xlane.xlu0 %1287  ;;  %v2323_v62 = vmax.f32 %v2239_v8, 0.0  ;;  %v2577_v17 = vld [vmem:[%s6369_s26 + $0xb8] sm:$0xff]  ;;  %v2118_v23 = vmul.f32 0.0051020407, %v7041_v55  ;;  %v2574_v3 = vld [vmem:[%s6369_s26 + $0xa0] sm:$0xff]  ;;  %v2825_v55 = vmul.f32 %v2741_v10, %v7261_v43 }
 0x2ee   : > { %9261 = vst [vmem:[#allocation199_spill] sm:$0xff] %v7369_v15  ;;  %3082 = vperm.xlu0 %4473, %v2744_v61   ;;  %v4560_v8 = vpop.eup %4559  ;;  %4569 = vrsqrt.f32 %v2452_v32  ;;  %v9281_v32 = vld [vmem:[#allocation198_spill] sm:$0xff]  ;;  %v9284_v56 = vld [vmem:[#allocation237_spill] sm:$0xff] }
 0x2ef   : > { %3267 = vperm.xlu1 %4474, %v7371_v37   ;;  %v7376_v31 = vpop.xlane.xlu1 %1291  ;;  %v9270_v37 = vld [vmem:[#allocation110_spill] sm:$0xff]  ;;  %v2407_v36 = vadd.f32 0.001, %v2323_v62  ;;  %v7418_v63 = vmul.f32 %v4560_v8, %v2614_v16  ;;  %v2619_v62 = vld [vmem:[%s6369_s26 + $0x208] sm:$0xff] }
 0x2f0   : > { %9263 = vst [vmem:[#allocation188_spill] sm:$0xff] %v7376_v31  ;;  %v2113_v15 = vmul.f32 0.0051020407, %v9270_v37  ;;  %v2160_v37 = vmul.f32 %v7385_v28, %v7385_v28  ;;  %v4562_v51 = vpop.eup %4561 }
 0x2f1   : > { %v7387_v9 = vpop.xlane.xlu0 %1455  ;;  %4571 = vrsqrt.f32 %v2407_v36  ;;  %v7440_v36 = vmul.f32 0.0051020407, %v7052_v21 }
 0x2f2   : > { %9268 = vst [vmem:[#allocation222_spill] sm:$0xff] %v7387_v9  ;;  %3292 = vperm.xlu0 %4473, %v7381_v19   ;;  %v7402_v19 = vmul.f32 0.0051020407, %v9272_v29  ;;  %v9274_v9 = vld [vmem:[#allocation183_spill] sm:$0xff]  ;;  %v2244_v27 = vsub.f32 %v2076_v26, %v2160_v37  ;;  %v4564_v29 = vpop.eup %4563 }
 0x2f3   : > { %3645 = vperm.xlu1 %4474, %v2907_v52   ;;  %v7395_v61 = vpop.xlane.xlu1 %1459  ;;  %v2281_v52 = vsub.f32 %v2113_v15, %v2197_v45  ;;  %v7406_v14 = vmul.f32 0.0051020407, %v9274_v9  ;;  %v9277_v15 = vld [vmem:[#allocation235_spill] sm:$0xff]  ;;  %v2746_v9 = vmul.f32 %v4558_v53, %v2577_v17  ;;  %v2743_v53 = vmul.f32 %v4562_v51, %v2574_v3 }
 0x2f4   : > { %9271 = vst [vmem:[#allocation189_spill] sm:$0xff] %v7395_v61  ;;  %9273 = vst [vmem:[#allocation110_spill] sm:$0xff] %v7402_v19  ;;  %v2073_v45 = vmul.f32 0.0051020407, %v9277_v15  ;;  %v2657_v15 = vld [vmem:[%s7011_s29 + $0x90] sm:$0xff]  ;;  %v2328_v16 = vmax.f32 %v2244_v27, 0.0 }
 0x2f5   : > { %v7410_v61 = vpop.xlane.xlu0 %1791  ;;  %9278 = vst [vmem:[#allocation235_spill] sm:$0xff] %v7418_v63  ;;  %v2365_v26 = vmax.f32 %v2281_v52, 0.0  ;;  %v2157_v37 = vmul.f32 %v7406_v14, %v7406_v14  ;;  %v7429_v17 = vmul.f32 0.0051020407, %v9281_v32  ;;  %v9282_v52 = vld [vmem:[#allocation202_spill] sm:$0xff]  ;;  %v2830_v31 = vmul.f32 %v2746_v9, %v7284_v0 }
 0x2f6   : > { %3670 = vperm.xlu0 %4473, %v2912_v41   ;;  %9275 = vst [vmem:[#allocation213_spill] sm:$0xff] %v7410_v61  ;;  %v2202_v41 = vmul.f32 %v7402_v19, %v7402_v19  ;;  %v9279_v61 = vld [vmem:[#allocation173_spill] sm:$0xff]  ;;  %v2115_v19 = vmul.f32 0.0051020407, %v9282_v52  ;;  %v2075_v51 = vmul.f32 0.0051020407, %v9284_v56  ;;  %v2909_v27 = vsub.f32 %v2657_v15, %v2825_v55 }
 0x2f7   : > { %3067 = vperm.xlu1 %4474, %v2741_v10   ;;  %v7412_v22 = vpop.xlane.xlu1 %1795  ;;  %v2241_v10 = vsub.f32 %v2073_v45, %v2157_v37  ;;  %v2449_v32 = vadd.f32 0.001, %v2365_v26  ;;  %v2159_v0 = vmul.f32 %v7429_v17, %v7429_v17  ;;  %v2412_v56 = vadd.f32 0.001, %v2328_v16 }
 0x2f8   : > { %9276 = vst [vmem:[#allocation183_spill] sm:$0xff] %v7412_v22  ;;  %v7425_v22 = vmul.f32 0.0051020407, %v9279_v61  ;;  %v2286_v8 = vsub.f32 %v2118_v23, %v2202_v41  ;;  %v7435_v61 = vmul.f32 %v4564_v29, %v2619_v62  ;;  %v2662_v23 = vld [vmem:[%s7011_s29 + $0xb8] sm:$0xff]  ;;  %v4566_v41 = vpop.eup %4565  ;;  %v2579_v29 = vld [vmem:[%s6369_s26 + $0xc8] sm:$0xff]  ;;  %v7455_v15 = vmul.f32 %v2743_v53, %v7292_v33 }
 0x2f9   : > { %v7442_v3 = vpop.xlane.xlu0 %1959  ;;  %v2325_v55 = vmax.f32 %v2241_v10, 0.0  ;;  %v2914_v37 = vsub.f32 %v2662_v23, %v2830_v31  ;;  %v4568_v52 = vpop.eup %4567  ;;  %v7460_v16 = vmul.f32 0.0051020407, %v7063_v4  ;;  %4573 = vrsqrt.f32 %v2449_v32  ;;  %v2621_v23 = vld [vmem:[%s6369_s26 + $0x218] sm:$0xff] }
 0x2fa   : > { %9280 = vst [vmem:[#allocation173_spill] sm:$0xff] %v7425_v22  ;;  %3092 = vperm.xlu0 %4473, %v2746_v9   ;;  %9283 = vst [vmem:[#allocation198_spill] sm:$0xff] %v7435_v61  ;;  %v2199_v45 = vmul.f32 %v7425_v22, %v7425_v22  ;;  %v2370_v21 = vmax.f32 %v2286_v8, 0.0  ;;  %v2078_v9 = vmul.f32 0.0051020407, %v7073_v54  ;;  %v2243_v22 = vsub.f32 %v2075_v51, %v2159_v0 }
 0x2fb   : > { %3277 = vperm.xlu1 %4474, %v7418_v63   ;;  %v7432_v43 = vpop.xlane.xlu1 %1963  ;;  %v2162_v63 = vmul.f32 %v7440_v36, %v7440_v36  ;;  %v2748_v54 = vmul.f32 %v4566_v41, %v2579_v29  ;;  %4575 = vrsqrt.f32 %v2412_v56  ;;  %v2120_v10 = vmul.f32 0.0051020407, %v7083_v12 }
 0x2fc   : > { %v2283_v26 = vsub.f32 %v2115_v19, %v2199_v45  ;;  %v4570_v19 = vpop.eup %4569  ;;  %v2454_v31 = vadd.f32 0.001, %v2370_v21  ;;  %v2409_v45 = vadd.f32 0.001, %v2325_v55  ;;  %v2327_v56 = vmax.f32 %v2243_v22, 0.0 }
 0x2fd   : > { %v2246_v33 = vsub.f32 %v2078_v9, %v2162_v63  ;;  %v4572_v29 = vpop.eup %4571  ;;  %v2204_v63 = vmul.f32 %v7460_v16, %v7460_v16  ;;  %v7478_v21 = vmul.f32 0.0051020407, %v7046_v38  ;;  %v9288_v9 = vld [vmem:[#allocation2_spill] sm:$0xff] }
 0x2fe   : > { %3302 = vperm.xlu0 %4473, %v7435_v61   ;;  %v2659_v61 = vld [vmem:[%s7011_s29 + $0xa0] sm:$0xff]  ;;  %v2367_v0 = vmax.f32 %v2283_v26, 0.0  ;;  %v9289_v26 = vld [vmem:[#allocation4_spill] sm:$0xff]  ;;  %4577 = vrsqrt.f32 %v2454_v31 }
 0x2ff   : > { %3655 = vperm.xlu1 %4474, %v2909_v27   ;;  %v7452_v62 = vpop.permute.xlu1 %3187  ;;  %v2616_v27 = vld [vmem:[%s6369_s26 + $0x1f0] sm:$0xff]  ;;  %v2911_v41 = vsub.f32 %v2659_v61, %v7455_v15  ;;  %v2330_v22 = vmax.f32 %v2246_v33, 0.0  ;;  %v2288_v15 = vsub.f32 %v2120_v10, %v2204_v63  ;;  %4579 = vrsqrt.f32 %v2409_v45 }
 0x300   : > { %9285 = vst [vmem:[#allocation202_spill] sm:$0xff] %v7452_v62  ;;  %v7466_v4 = vmul.f32 %v4568_v52, %v2616_v27  ;;  %v9286_v62 = vld [vmem:[#allocation218_spill] sm:$0xff]  ;;  %v7486_v52 = vmul.f32 0.0051020407, %v7097_v35  ;;  %v2077_v35 = vmul.f32 0.0051020407, %v7068_v42  ;;  %v2161_v42 = vmul.f32 %v7478_v21, %v7478_v21 }
 0x301   : > { %v2978_v8 = vpop.permute.xlu0 %2977  ;;  %v7470_v32 = vmul.f32 0.0051020407, %v9286_v62  ;;  %v2576_v62 = vld [vmem:[%s6369_s26 + $0xb0] sm:$0xff]  ;;  %v2080_v33 = vmul.f32 0.0051020407, %v7112_v48  ;;  %v2372_v48 = vmax.f32 %v2288_v15, 0.0 }
 0x302   : > { %3680 = vperm.xlu0 %4473, %v2914_v37   ;;  %v3395_v55 = vmul.f32 %v2978_v8, %v9288_v9  ;;  %v3396_v61 = vmul.f32 %v2978_v8, %v9289_v26  ;;  %v7482_v37 = vmul.f32 %v4570_v19, %v2621_v23  ;;  %v2664_v23 = vld [vmem:[%s7011_s29 + $0xc8] sm:$0xff]  ;;  %v2745_v63 = vmul.f32 %v4572_v29, %v2576_v62 }
 0x303   : > { %3077 = vperm.xlu1 %4474, %v2743_v53   ;;  %v2983_v51 = vpop.permute.xlu1 %2982  ;;  %v2832_v53 = vmul.f32 %v2748_v54, %v7325_v13  ;;  %v9290_v13 = vld [vmem:[#allocation6_spill] sm:$0xff]  ;;  %v2451_v9 = vadd.f32 0.001, %v2367_v0  ;;  %v2117_v26 = vmul.f32 0.0051020407, %v7037_v5  ;;  %v2164_v0 = vmul.f32 %v7486_v52, %v7486_v52  ;;  %v4574_v29 = vpop.eup %4573 }
 0x304   : > { %v3397_v8 = vmul.f32 %v2983_v51, %v9290_v13  ;;  %v2414_v45 = vadd.f32 0.001, %v2330_v22  ;;  %v2245_v22 = vsub.f32 %v2077_v35, %v2161_v42  ;;  %v7516_v15 = vmul.f32 0.0051020407, %v7104_v30  ;;  %v2623_v42 = vld [vmem:[%s6369_s26 + $0x228] sm:$0xff] }
 0x305   : > { %v7474_v12 = vpop.permute.xlu0 %3192  ;;  %v2916_v62 = vsub.f32 %v2664_v23, %v2832_v53  ;;  %4581 = vrsqrt.f32 %v2451_v9  ;;  %v2456_v53 = vadd.f32 0.001, %v2372_v48  ;;  %v2122_v30 = vmul.f32 0.0051020407, %v7127_v57 }
 0x306   : > { %9287 = vst [vmem:[#allocation237_spill] sm:$0xff] %v7474_v12  ;;  %3102 = vperm.xlu0 %4473, %v2748_v54   ;;  %v9291_v54 = vld [vmem:[#allocation8_spill] sm:$0xff]  ;;  %4583 = vrsqrt.f32 %v2414_v45 }
 0x307   : > { %3287 = vperm.xlu1 %4474, %v7466_v4   ;;  %v3566_v38 = vpop.permute.xlu1 %3565  ;;  %v3398_v27 = vmul.f32 %v2983_v51, %v9291_v54 }
 0x308   : > { %v3983_v19 = vadd.f32 %v3566_v38, %v3395_v55  ;;  %v3984_v31 = vadd.f32 %v3566_v38, %v3396_v61  ;;  %v2201_v55 = vmul.f32 %v7470_v32, %v7470_v32  ;;  %v2411_v61 = vadd.f32 0.001, %v2327_v56  ;;  %v4576_v38 = vpop.eup %4575 }
 0x309   : > { %v3571_v10 = vpop.permute.xlu0 %3570  ;;  %v2829_v56 = vmul.f32 %v2745_v63, %v7355_v6  ;;  %v4578_v9 = vpop.eup %4577  ;;  %v2206_v6 = vmul.f32 %v7516_v15, %v7516_v15 }
 0x30a   : > { %4151 = vst [vmem:[%s7494_s7] sm:$0xff] %v3983_v19  ;;  %4152 = vst.msk [vmem:[%s7494_s7 + $0x8] sm:$0xff] %vm1124_vm1, %v3984_v31  ;;  %v3985_v13 = vadd.f32 %v3571_v10, %v3397_v8  ;;  %v3986_v51 = vadd.f32 %v3571_v10, %v3398_v27  ;;  %3312 = vperm.xlu0 %4473, %v7482_v37   ;;  %v2248_v8 = vsub.f32 %v2080_v33, %v2164_v0  ;;  %v2618_v27 = vld [vmem:[%s6369_s26 + $0x200] sm:$0xff]  ;;  %v2661_v31 = vld [vmem:[%s7011_s29 + $0xb0] sm:$0xff]  ;;  %v4580_v45 = vpop.eup %4579 }
 0x30b   : > { %3665 = vperm.xlu1 %4474, %v2911_v41   ;;  %v2988_v5 = vpop.permute.xlu1 %2987  ;;  %v2581_v41 = vld [vmem:[%s6369_s26 + $0xd8] sm:$0xff]  ;;  %v2285_v19 = vsub.f32 %v2117_v26, %v2201_v55  ;;  %v7525_v10 = vmul.f32 0.0051020407, %v7056_v39  ;;  %4585 = vrsqrt.f32 %v2411_v61  ;;  %v7530_v23 = vmul.f32 %v4574_v29, %v2618_v27  ;;  %v9294_v55 = vld [vmem:[#allocation14_spill] sm:$0xff] }
 0x30c   : > { %4153 = vst [vmem:[%s7494_s7 + $0x10] sm:$0xff] %v3985_v13  ;;  %4154 = vst.msk [vmem:[%s7494_s7 + $0x18] sm:$0xff] %vm1124_vm1, %v3986_v51  ;;  %v2750_v33 = vmul.f32 %v4576_v38, %v2581_v41  ;;  %v2329_v26 = vmax.f32 %v2245_v22, 0.0  ;;  %v2119_v13 = vmul.f32 0.0051020407, %v7079_v49  ;;  %v2332_v39 = vmax.f32 %v2248_v8, 0.0 }
 0x30d   : > { %v7518_v54 = vpop.permute.xlu0 %3202  ;;  %v2369_v57 = vmax.f32 %v2285_v19, 0.0  ;;  %v2203_v48 = vmul.f32 %v7525_v10, %v7525_v10  ;;  %4587 = vrsqrt.f32 %v2456_v53  ;;  %v2290_v0 = vsub.f32 %v2122_v30, %v2206_v6  ;;  %v2666_v8 = vld [vmem:[%s7011_s29 + $0xd8] sm:$0xff]  ;;  %v2578_v27 = vld [vmem:[%s6369_s26 + $0xc0] sm:$0xff] }
 0x30e   : > { %9292 = vst [vmem:[#allocation218_spill] sm:$0xff] %v7518_v54  ;;  %3690 = vperm.xlu0 %4473, %v2916_v62   ;;  %v7539_v29 = vmul.f32 0.0051020407, %v7135_v34  ;;  %v9295_v62 = vld [vmem:[#allocation16_spill] sm:$0xff]  ;;  %v7544_v22 = vmul.f32 %v4578_v9, %v2623_v42  ;;  %v2834_v41 = vmul.f32 %v2750_v33, %v7385_v28  ;;  %v2413_v19 = vadd.f32 0.001, %v2329_v26 }
 0x30f   : > { %3087 = vperm.xlu1 %4474, %v2745_v63   ;;  %v7528_v35 = vpop.permute.xlu1 %3197  ;;  %v2913_v63 = vsub.f32 %v2661_v31, %v2829_v56  ;;  %v2287_v31 = vsub.f32 %v2119_v13, %v2203_v48  ;;  %v2416_v56 = vadd.f32 0.001, %v2332_v39  ;;  %v2082_v34 = vmul.f32 0.0051020407, %v7159_v25  ;;  %v9297_v30 = vld [vmem:[#allocation10_spill] sm:$0xff]  ;;  %v4582_v13 = vpop.eup %4581 }
 0x310   : > { %9293 = vst [vmem:[#allocation2_spill] sm:$0xff] %v7528_v35  ;;  %v3399_v6 = vmul.f32 %v2988_v5, %v9297_v30  ;;  %v2374_v42 = vmax.f32 %v2290_v0, 0.0  ;;  %v2166_v28 = vmul.f32 %v7539_v29, %v7539_v29  ;;  %v2747_v26 = vmul.f32 %v4580_v45, %v2578_v27  ;;  %v4584_v0 = vpop.eup %4583 }
 0x311   : > { %v3581_v51 = vpop.permute.xlu0 %3580  ;;  %v2453_v39 = vadd.f32 0.001, %v2369_v57  ;;  %v2918_v48 = vsub.f32 %v2666_v8, %v2834_v41  ;;  %4589 = vrsqrt.f32 %v2413_v19  ;;  %v2583_v57 = vld [vmem:[%s6369_s26 + $0xe8] sm:$0xff]  ;;  %v2371_v27 = vmax.f32 %v2287_v31, 0.0  ;;  %v2580_v41 = vld [vmem:[%s6369_s26 + $0xd0] sm:$0xff] }
 0x312   : > { %3112 = vperm.xlu0 %4473, %v2750_v33   ;;  %v7558_v33 = vmul.f32 0.0051020407, %v7143_v11  ;;  %v7564_v11 = vmul.f32 0.0051020407, %v7088_v18  ;;  %4591 = vrsqrt.f32 %v2416_v56  ;;  %v2458_v18 = vadd.f32 0.001, %v2374_v42 }
 0x313   : > { %3297 = vperm.xlu1 %4474, %v7530_v23   ;;  %v2993_v49 = vpop.permute.xlu1 %2992  ;;  %4593 = vrsqrt.f32 %v2453_v39  ;;  %v2752_v19 = vmul.f32 %v4584_v0, %v2583_v57  ;;  %v2831_v31 = vmul.f32 %v2747_v26, %v7406_v14  ;;  %v2625_v42 = vld [vmem:[%s6369_s26 + $0x238] sm:$0xff]  ;;  %v9301_v39 = vld [vmem:[#allocation227_spill] sm:$0xff] }
 0x314   : > { %v3401_v61 = vmul.f32 %v2993_v49, %v9294_v55  ;;  %v3402_v38 = vmul.f32 %v2993_v49, %v9295_v62  ;;  %v9298_v55 = vld [vmem:[#allocation12_spill] sm:$0xff]  ;;  %v2208_v8 = vmul.f32 %v7558_v33, %v7558_v33  ;;  %v2163_v30 = vmul.f32 %v7564_v11, %v7564_v11 }
 0x315   : > { %v7550_v53 = vpop.permute.xlu0 %3212  ;;  %v3400_v35 = vmul.f32 %v2988_v5, %v9298_v55  ;;  %v2620_v62 = vld [vmem:[%s6369_s26 + $0x210] sm:$0xff]  ;;  %4595 = vrsqrt.f32 %v2458_v18 }
 0x316   : > { %9296 = vst [vmem:[#allocation4_spill] sm:$0xff] %v7550_v53  ;;  %v3989_v49 = vadd.f32 %v3581_v51, %v3401_v61  ;;  %v3990_v9 = vadd.f32 %v3581_v51, %v3402_v38  ;;  %3322 = vperm.xlu0 %4473, %v7544_v22   ;;  %v2124_v61 = vmul.f32 0.0051020407, %v7169_v2  ;;  %v4586_v38 = vpop.eup %4585  ;;  %v2674_v53 = vld [vmem:[%s7011_s29 + $0x118] sm:$0xff] }
 0x317   : > { %3675 = vperm.xlu1 %4474, %v2913_v63   ;;  %v3576_v25 = vpop.permute.xlu1 %3575  ;;  %v2250_v63 = vsub.f32 %v2082_v34, %v2166_v28  ;;  %v7578_v34 = vmul.f32 %v4582_v13, %v2620_v62  ;;  %v4588_v56 = vpop.eup %4587  ;;  %v2455_v28 = vadd.f32 0.001, %v2371_v27  ;;  %v2663_v13 = vld [vmem:[%s7011_s29 + $0xc0] sm:$0xff]  ;;  %v2749_v14 = vmul.f32 %v4586_v38, %v2580_v41  ;;  %v2668_v27 = vld [vmem:[%s7011_s29 + $0xe8] sm:$0xff] }
 0x318   : > { %4157 = vst [vmem:[%s7494_s7 + $0x30] sm:$0xff] %v3989_v49  ;;  %4158 = vst.msk [vmem:[%s7494_s7 + $0x38] sm:$0xff] %vm1124_vm1, %v3990_v9  ;;  %v3987_v5 = vadd.f32 %v3576_v25, %v3399_v6  ;;  %v3988_v51 = vadd.f32 %v3576_v25, %v3400_v35  ;;  %v2079_v35 = vmul.f32 0.0051020407, %v7107_v50  ;;  %v9299_v50 = vld [vmem:[#allocation221_spill] sm:$0xff]  ;;  %v2292_v49 = vsub.f32 %v2124_v61, %v2208_v8  ;;  %v9303_v41 = vld [vmem:[#allocation123_spill] sm:$0xff] }
 0x319   : > { %v7567_v45 = vpop.permute.xlu0 %3590  ;;  %v7584_v6 = vmul.f32 0.0051020407, %v9299_v50  ;;  %v2334_v55 = vmax.f32 %v2250_v63, 0.0  ;;  %v7590_v25 = vmul.f32 0.0051020407, %v7181_v44  ;;  %v7598_v0 = vmul.f32 %v4588_v56, %v2625_v42  ;;  %v9305_v42 = vld [vmem:[#allocation24_spill] sm:$0xff] }
 0x31a   : > { %4155 = vst [vmem:[%s7494_s7 + $0x20] sm:$0xff] %v3987_v5  ;;  %4156 = vst.msk [vmem:[%s7494_s7 + $0x28] sm:$0xff] %vm1124_vm1, %v3988_v51  ;;  %3700 = vperm.xlu0 %4473, %v2918_v48   ;;  %v2121_v5 = vmul.f32 0.0051020407, %v9301_v39  ;;  %v2084_v48 = vmul.f32 0.0051020407, %v7210_v20  ;;  %v2836_v63 = vmul.f32 %v2752_v19, %v7440_v36  ;;  %v2915_v38 = vsub.f32 %v2663_v13, %v2831_v31 }
 0x31b   : > { %3097 = vperm.xlu1 %4474, %v2747_v26   ;;  %v2998_v2 = vpop.permute.xlu1 %2997  ;;  %v2247_v26 = vsub.f32 %v2079_v35, %v2163_v30  ;;  %v2205_v44 = vmul.f32 %v7584_v6, %v7584_v6  ;;  %v2418_v61 = vadd.f32 0.001, %v2334_v55  ;;  %v2376_v57 = vmax.f32 %v2292_v49, 0.0  ;;  %v4590_v36 = vpop.eup %4589  ;;  %v9304_v55 = vld [vmem:[#allocation22_spill] sm:$0xff]  ;;  %v2585_v13 = vld [vmem:[%s6369_s26 + $0xf8] sm:$0xff] }
 0x31c   : > { %4597 = vrsqrt.f32 %v2455_v28  ;;  %v2168_v35 = vmul.f32 %v7590_v25, %v7590_v25  ;;  %v7610_v20 = vmul.f32 %v2749_v14, %v7429_v17  ;;  %v7616_v31 = vmul.f32 0.0051020407, %v7198_v60  ;;  %v4592_v30 = vpop.eup %4591  ;;  %v2582_v39 = vld [vmem:[%s6369_s26 + $0xe0] sm:$0xff] }
 0x31d   : > { %v7586_v9 = vpop.permute.xlu0 %3222  ;;  %v2331_v18 = vmax.f32 %v2247_v26, 0.0  ;;  %v2289_v8 = vsub.f32 %v2121_v5, %v2205_v44  ;;  %v2920_v17 = vsub.f32 %v2668_v27, %v2836_v63  ;;  %v2081_v26 = vmul.f32 0.0051020407, %v7151_v7  ;;  %v2622_v27 = vld [vmem:[%s6369_s26 + $0x220] sm:$0xff] }
 0x31e   : > { %9300 = vst [vmem:[#allocation6_spill] sm:$0xff] %v7586_v9  ;;  %3122 = vperm.xlu0 %4473, %v2752_v19   ;;  %v7613_v19 = vmul.f32 0.0051020407, %v9303_v41  ;;  %v2252_v50 = vsub.f32 %v2084_v48, %v2168_v35  ;;  %4599 = vrsqrt.f32 %v2418_v61  ;;  %v2460_v5 = vadd.f32 0.001, %v2376_v57  ;;  %v9306_v41 = vld [vmem:[#allocation18_spill] sm:$0xff] }
 0x31f   : > { %3307 = vperm.xlu1 %4474, %v7578_v34   ;;  %v7595_v51 = vpop.permute.xlu1 %3207  ;;  %v2126_v60 = vmul.f32 0.0051020407, %v7222_v40  ;;  %v3403_v48 = vmul.f32 %v2998_v2, %v9306_v41  ;;  %v9307_v35 = vld [vmem:[#allocation20_spill] sm:$0xff]  ;;  %v2415_v7 = vadd.f32 0.001, %v2331_v18  ;;  %v2210_v61 = vmul.f32 %v7616_v31, %v7616_v31 }
 0x320   : > { %9302 = vst [vmem:[#allocation8_spill] sm:$0xff] %v7595_v51  ;;  %v2754_v57 = vmul.f32 %v4592_v30, %v2585_v13  ;;  %v7632_v51 = vmul.f32 %v4590_v36, %v2582_v39  ;;  %v2627_v39 = vld [vmem:[%s6369_s26 + $0x248] sm:$0xff]  ;;  %4601 = vrsqrt.f32 %v2460_v5 }
 0x321   : > { %v7603_v62 = vpop.permute.xlu0 %3600  ;;  %v2294_v30 = vsub.f32 %v2126_v60, %v2210_v61  ;;  %4603 = vrsqrt.f32 %v2415_v7 }
 0x322   : > { %3332 = vperm.xlu0 %4473, %v7598_v0  }
 0x323   : > { %3685 = vperm.xlu1 %4474, %v2915_v38   ;;  %v3003_v56 = vpop.permute.xlu1 %3002  ;;  %v4594_v38 = vpop.eup %4593  ;;  %v2378_v61 = vmax.f32 %v2294_v30, 0.0 }
 0x324   : > { %v3405_v49 = vmul.f32 %v3003_v56, %v9304_v55  ;;  %v3406_v28 = vmul.f32 %v3003_v56, %v9305_v42  ;;  %v3404_v55 = vmul.f32 %v2998_v2, %v9307_v35  ;;  %v2665_v42 = vld [vmem:[%s7011_s29 + $0xd0] sm:$0xff]  ;;  %v2165_v2 = vmul.f32 %v7613_v19, %v7613_v19 }
 0x325   : > { %v3023_v44 = vpop.permute.xlu0 %3022  ;;  %v7644_v36 = vmul.f32 %v4594_v38, %v2622_v27  ;;  %v7656_v38 = vmul.f32 %v7632_v51, %v7478_v21 }
 0x326   : > { %v3993_v56 = vadd.f32 %v7567_v45, %v3405_v49  ;;  %v3994_v63 = vadd.f32 %v7567_v45, %v3406_v28  ;;  %3710 = vperm.xlu0 %4473, %v2920_v17   ;;  %v2336_v49 = vmax.f32 %v2252_v50, 0.0  ;;  %v4596_v28 = vpop.eup %4595  ;;  %v2373_v17 = vmax.f32 %v2289_v8, 0.0 }
 0x327   : > { %3107 = vperm.xlu1 %4474, %v2749_v14   ;;  %v3586_v40 = vpop.permute.xlu1 %3585  ;;  %v9308_v14 = vld [vmem:[#allocation136_spill] sm:$0xff]  ;;  %v2249_v35 = vsub.f32 %v2081_v26, %v2165_v2  ;;  %v2917_v50 = vsub.f32 %v2665_v42, %v7610_v20  ;;  %v2123_v8 = vmul.f32 0.0051020407, %v7165_v46  ;;  %v4598_v26 = vpop.eup %4597  ;;  %v7660_v27 = vmul.f32 %v4596_v28, %v2627_v39  ;;  %v2587_v39 = vld [vmem:[%s6369_s26 + $0x108] sm:$0xff] }
 0x328   : > { %4161 = vst [vmem:[%s7494_s7 + $0x50] sm:$0xff] %v3993_v56  ;;  %4162 = vst.msk [vmem:[%s7494_s7 + $0x58] sm:$0xff] %vm1124_vm1, %v3994_v63  ;;  %v3991_v45 = vadd.f32 %v3586_v40, %v3403_v48  ;;  %v3992_v18 = vadd.f32 %v3586_v40, %v3404_v55  ;;  %v7640_v41 = vmul.f32 0.0051020407, %v9308_v14  ;;  %v2838_v48 = vmul.f32 %v2754_v57, %v7486_v52  ;;  %v9310_v55 = vld [vmem:[#allocation38_spill] sm:$0xff]  ;;  %v9311_v63 = vld [vmem:[#allocation40_spill] sm:$0xff] }
 0x329   : > { %v7642_v13 = vpop.permute.xlu0 %3232  ;;  %v2420_v5 = vadd.f32 0.001, %v2336_v49  ;;  %v3413_v56 = vmul.f32 %v3023_v44, %v9310_v55  ;;  %v3414_v20 = vmul.f32 %v3023_v44, %v9311_v63  ;;  %v2457_v7 = vadd.f32 0.001, %v2373_v17  ;;  %v2670_v40 = vld [vmem:[%s7011_s29 + $0xf8] sm:$0xff]  ;;  %v2624_v49 = vld [vmem:[%s6369_s26 + $0x230] sm:$0xff] }
 0x32a   : > { %9309 = vst [vmem:[#allocation14_spill] sm:$0xff] %v7642_v13  ;;  %4159 = vst [vmem:[%s7494_s7 + $0x40] sm:$0xff] %v3991_v45  ;;  %3132 = vperm.xlu0 %4473, %v2754_v57   ;;  %v2207_v46 = vmul.f32 %v7640_v41, %v7640_v41  ;;  %v7665_v52 = vmul.f32 0.0051020407, %v7242_v58  ;;  %v2333_v57 = vmax.f32 %v2249_v35, 0.0  ;;  %v4600_v45 = vpop.eup %4599  ;;  %v7680_v14 = vld [vmem:[%s7011_s29 + $0xe0] sm:$0xff]  ;;  %v2922_v30 = vsub.f32 %v2670_v40, %v2838_v48 }
 0x32b   : > { %4160 = vst.msk [vmem:[%s7494_s7 + $0x48] sm:$0xff] %vm1124_vm1, %v3992_v18  ;;  %3317 = vperm.xlu1 %4474, %v7644_v36   ;;  %v3008_v60 = vpop.permute.xlu1 %3007  ;;  %v7669_v42 = vmul.f32 0.0051020407, %v7174_v59  ;;  %v7674_v28 = vmul.f32 0.0051020407, %v7257_v47  ;;  %4605 = vrsqrt.f32 %v2420_v5  ;;  %v7692_v55 = vmul.f32 %v4598_v26, %v2624_v49  ;;  %v2629_v49 = vld [vmem:[%s6369_s26 + $0x258] sm:$0xff] }
 0x32c   : > { %v2291_v18 = vsub.f32 %v2123_v8, %v2207_v46  ;;  %v2086_v58 = vmul.f32 0.0051020407, %v7273_v24  ;;  %v7683_v59 = vmul.f32 0.0051020407, %v7206_v1  ;;  %v2462_v35 = vadd.f32 0.001, %v2378_v61  ;;  %v4602_v61 = vpop.eup %4601 }
 0x32d   : > { %v3611_v21 = vpop.permute.xlu0 %3610  ;;  %v2170_v47 = vmul.f32 %v7665_v52, %v7665_v52  ;;  %v9313_v8 = vld [vmem:[#allocation233_spill] sm:$0xff]  ;;  %4607 = vrsqrt.f32 %v2457_v7  ;;  %v2167_v1 = vmul.f32 %v7669_v42, %v7669_v42  ;;  %v2919_v48 = vsub.f32 %v7680_v14, %v7656_v38  ;;  %v9314_v7 = vld [vmem:[#allocation134_spill] sm:$0xff]  ;;  %v9317_v14 = vld [vmem:[#allocation231_spill] sm:$0xff] }
 0x32e   : > { %v4001_v44 = vadd.f32 %v3611_v21, %v3413_v56  ;;  %v4002_v2 = vadd.f32 %v3611_v21, %v3414_v20  ;;  %3342 = vperm.xlu0 %4473, %v7660_v27   ;;  %v2128_v24 = vmul.f32 0.0051020407, %v9313_v8  ;;  %v2417_v56 = vadd.f32 0.001, %v2333_v57  ;;  %v9315_v57 = vld [vmem:[#allocation30_spill] sm:$0xff]  ;;  %v9321_v8 = vld [vmem:[#allocation28_spill] sm:$0xff] }
 0x32f   : > { %3695 = vperm.xlu1 %4474, %v2917_v50   ;;  %v7677_v17 = vpop.permute.xlu1 %3217  ;;  %v2375_v5 = vmax.f32 %v2291_v18, 0.0  ;;  %v2212_v63 = vmul.f32 %v7674_v28, %v7674_v28  ;;  %v2254_v20 = vsub.f32 %v2086_v58, %v2170_v47  ;;  %v2756_v26 = vmul.f32 %v4600_v45, %v2587_v39  ;;  %v4604_v18 = vpop.eup %4603  ;;  %v9318_v58 = vld [vmem:[#allocation184_spill] sm:$0xff]  ;;  %v9320_v47 = vld [vmem:[#allocation26_spill] sm:$0xff] }
 0x330   : > { %9312 = vst [vmem:[#allocation16_spill] sm:$0xff] %v7677_v17  ;;  %4169 = vst [vmem:[%s7494_s7 + $0x90] sm:$0xff] %v4001_v44  ;;  %v7702_v21 = vmul.f32 0.0051020407, %v9314_v7  ;;  %v2251_v40 = vsub.f32 %v7683_v59, %v2167_v1  ;;  %4609 = vrsqrt.f32 %v2462_v35  ;;  %v7712_v45 = vmul.f32 0.0051020407, %v9318_v58 }
 0x331   : > { %4170 = vst.msk [vmem:[%s7494_s7 + $0x98] sm:$0xff] %vm1124_vm1, %v4002_v2  ;;  %v3033_v50 = vpop.permute.xlu0 %3032  ;;  %v9316_v2 = vld [vmem:[#allocation32_spill] sm:$0xff]  ;;  %v3407_v59 = vmul.f32 %v3008_v60, %v9320_v47  ;;  %v3408_v1 = vmul.f32 %v3008_v60, %v9321_v8  ;;  %v2840_v58 = vmul.f32 %v2756_v26, %v7539_v29  ;;  %v9323_v47 = vld [vmem:[#allocation46_spill] sm:$0xff]  ;;  %4611 = vrsqrt.f32 %v2417_v56 }
 0x332   : > { %3720 = vperm.xlu0 %4473, %v2922_v30   ;;  %v7709_v30 = vmul.f32 0.0051020407, %v9317_v14  ;;  %v9322_v35 = vld [vmem:[#allocation192_spill] sm:$0xff]  ;;  %v7723_v14 = vmul.f32 %v4602_v61, %v2629_v49  ;;  %v3417_v60 = vmul.f32 %v3033_v50, %v9323_v47  ;;  %v9325_v61 = vld [vmem:[#allocation174_spill] sm:$0xff] }
 0x333   : > { %3117 = vperm.xlu1 %4474, %v7632_v51   ;;  %v3013_v46 = vpop.permute.xlu1 %3012  ;;  %v2296_v51 = vsub.f32 %v2128_v24, %v2212_v63  ;;  %v2088_v24 = vmul.f32 0.0051020407, %v9322_v35  ;;  %v9324_v8 = vld [vmem:[#allocation48_spill] sm:$0xff]  ;;  %v7734_v49 = vmul.f32 0.0051020407, %v9325_v61 }
 0x334   : > { %v3409_v44 = vmul.f32 %v3013_v46, %v9315_v57  ;;  %v3410_v38 = vmul.f32 %v3013_v46, %v9316_v2  ;;  %v2584_v57 = vld [vmem:[%s6369_s26 + $0xf0] sm:$0xff]  ;;  %v2338_v2 = vmax.f32 %v2254_v20, 0.0 }
 0x335   : > { %v7714_v39 = vpop.permute.xlu0 %3242  ;;  %v2753_v35 = vmul.f32 %v4604_v18, %v2584_v57  ;;  %v4606_v47 = vpop.eup %4605  ;;  %v9326_v18 = vld [vmem:[#allocation194_spill] sm:$0xff] }
 0x336   : > { %9319 = vst [vmem:[#allocation10_spill] sm:$0xff] %v7714_v39  ;;  %v3997_v46 = vadd.f32 %v7603_v62, %v3409_v44  ;;  %v3998_v7 = vadd.f32 %v7603_v62, %v3410_v38  ;;  %3142 = vperm.xlu0 %4473, %v2756_v26   ;;  %v3418_v44 = vmul.f32 %v3033_v50, %v9324_v8  ;;  %v2672_v26 = vld [vmem:[%s7011_s29 + $0x108] sm:$0xff]  ;;  %v2130_v57 = vmul.f32 0.0051020407, %v9326_v18  ;;  %v9327_v39 = vld [vmem:[#allocation188_spill] sm:$0xff] }
 0x337   : > { %3327 = vperm.xlu1 %4474, %v7692_v55   ;;  %v3596_v63 = vpop.permute.xlu1 %3595  ;;  %v2172_v38 = vmul.f32 %v7712_v45, %v7712_v45  ;;  %v2209_v50 = vmul.f32 %v7702_v21, %v7702_v21  ;;  %v4608_v17 = vpop.eup %4607 }
 0x338   : > { %4165 = vst [vmem:[%s7494_s7 + $0x70] sm:$0xff] %v3997_v46  ;;  %4166 = vst.msk [vmem:[%s7494_s7 + $0x78] sm:$0xff] %vm1124_vm1, %v3998_v7  ;;  %v3995_v62 = vadd.f32 %v3596_v63, %v3407_v59  ;;  %v3996_v20 = vadd.f32 %v3596_v63, %v3408_v1  ;;  %v2380_v46 = vmax.f32 %v2296_v51, 0.0  ;;  %v2589_v1 = vld [vmem:[%s6369_s26 + $0x118] sm:$0xff]  ;;  %v2459_v7 = vadd.f32 0.001, %v2375_v5 }
 0x339   : > { %v3621_v29 = vpop.permute.xlu0 %3620  ;;  %v2422_v63 = vadd.f32 0.001, %v2338_v2  ;;  %v2256_v8 = vsub.f32 %v2088_v24, %v2172_v38  ;;  %v2335_v51 = vmax.f32 %v2251_v40, 0.0  ;;  %v2214_v2 = vmul.f32 %v7734_v49, %v7734_v49  ;;  %v9329_v38 = vld [vmem:[#allocation183_spill] sm:$0xff] }
 0x33a   : > { %4163 = vst [vmem:[%s7494_s7 + $0x60] sm:$0xff] %v3995_v62  ;;  %4164 = vst.msk [vmem:[%s7494_s7 + $0x68] sm:$0xff] %vm1124_vm1, %v3996_v20  ;;  %v4005_v56 = vadd.f32 %v3621_v29, %v3417_v60  ;;  %v4006_v59 = vadd.f32 %v3621_v29, %v3418_v44  ;;  %3352 = vperm.xlu0 %4473, %v7723_v14   ;;  %v2293_v62 = vsub.f32 %v7709_v30, %v2209_v50  ;;  %v2626_v44 = vld [vmem:[%s6369_s26 + $0x240] sm:$0xff]  ;;  %v9328_v29 = vld [vmem:[#allocation239_spill] sm:$0xff]  ;;  %v4610_v50 = vpop.eup %4609 }
 0x33b   : > { %3705 = vperm.xlu1 %4474, %v2919_v48   ;;  %v3018_v61 = vpop.permute.xlu1 %3017  ;;  %v7747_v20 = vmul.f32 0.0051020407, %v9327_v39  ;;  %v2924_v60 = vsub.f32 %v2672_v26, %v2840_v58  ;;  %v7754_v5 = vmul.f32 0.0051020407, %v9328_v29  ;;  %v2758_v24 = vmul.f32 %v4606_v47, %v2589_v1  ;;  %v2631_v1 = vld [vmem:[%s6369_s26 + $0x268] sm:$0xff] }
 0x33c   : > { %4173 = vst [vmem:[%s7494_s7 + $0xb0] sm:$0xff] %v4005_v56  ;;  %4174 = vst.msk [vmem:[%s7494_s7 + $0xb8] sm:$0xff] %vm1124_vm1, %v4006_v59  ;;  %v2464_v40 = vadd.f32 0.001, %v2380_v46  ;;  %v2090_v30 = vmul.f32 0.0051020407, %v9329_v38  ;;  %v2837_v39 = vmul.f32 %v2753_v35, %v7564_v11  ;;  %4613 = vrsqrt.f32 %v2422_v63  ;;  %v4612_v38 = vpop.eup %4611 }
 0x33d   : > { %v3043_v48 = vpop.permute.xlu0 %3042  ;;  %v2340_v56 = vmax.f32 %v2256_v8, 0.0  ;;  %v2298_v58 = vsub.f32 %v2130_v57, %v2214_v2  ;;  %v7762_v59 = vmul.f32 %v4608_v17, %v2626_v44  ;;  %4615 = vrsqrt.f32 %v2459_v7  ;;  %v9332_v8 = vld [vmem:[#allocation189_spill] sm:$0xff]  ;;  %v9335_v44 = vld [vmem:[#allocation36_spill] sm:$0xff] }
 0x33e   : > { %3730 = vperm.xlu0 %4473, %v2924_v60   ;;  %v2419_v18 = vadd.f32 0.001, %v2335_v51  ;;  %v2377_v47 = vmax.f32 %v2293_v62, 0.0  ;;  %v2174_v46 = vmul.f32 %v7747_v20, %v7747_v20  ;;  %v2169_v11 = vmul.f32 %v7754_v5, %v7754_v5  ;;  %v9331_v60 = vld [vmem:[#allocation158_spill] sm:$0xff]  ;;  %v2669_v2 = vld [vmem:[%s7011_s29 + $0xf0] sm:$0xff] }
 0x33f   : > { %3127 = vperm.xlu1 %4474, %v2753_v35   ;;  %v7760_v26 = vpop.permute.xlu1 %3227  ;;  %v2085_v63 = vmul.f32 0.0051020407, %v9331_v60  ;;  %v7771_v57 = vmul.f32 0.0051020407, %v9332_v8  ;;  %v2842_v17 = vmul.f32 %v2758_v24, %v7590_v25  ;;  %4617 = vrsqrt.f32 %v2464_v40  ;;  %v9334_v51 = vld [vmem:[#allocation34_spill] sm:$0xff] }
 0x340   : > { %9330 = vst [vmem:[#allocation12_spill] sm:$0xff] %v7760_v26  ;;  %v2258_v7 = vsub.f32 %v2090_v30, %v2174_v46  ;;  %v3411_v62 = vmul.f32 %v3018_v61, %v9334_v51  ;;  %v3412_v29 = vmul.f32 %v3018_v61, %v9335_v44  ;;  %v2424_v26 = vadd.f32 0.001, %v2340_v56  ;;  %v9336_v40 = vld [vmem:[#allocation54_spill] sm:$0xff]  ;;  %v9337_v46 = vld [vmem:[#allocation56_spill] sm:$0xff]  ;;  %v9338_v44 = vld [vmem:[#allocation241_spill] sm:$0xff] }
 0x341   : > { %v7773_v35 = vpop.permute.xlu0 %3252  ;;  %v2382_v13 = vmax.f32 %v2298_v58, 0.0  ;;  %v2132_v60 = vmul.f32 0.0051020407, %v7432_v43  ;;  %v7781_v25 = vmul.f32 %v4610_v50, %v2631_v1  ;;  %v3421_v30 = vmul.f32 %v3043_v48, %v9336_v40  ;;  %v2586_v1 = vld [vmem:[%s6369_s26 + $0x100] sm:$0xff] }
 0x342   : > { %9333 = vst [vmem:[#allocation221_spill] sm:$0xff] %v7773_v35  ;;  %3152 = vperm.xlu0 %4473, %v2758_v24   ;;  %v3422_v61 = vmul.f32 %v3043_v48, %v9337_v46  ;;  %v7786_v35 = vmul.f32 0.0051020407, %v9338_v44  ;;  %v2253_v56 = vsub.f32 %v2085_v63, %v2169_v11  ;;  %v2216_v43 = vmul.f32 %v7771_v57, %v7771_v57 }
 0x343   : > { %3337 = vperm.xlu1 %4474, %v7762_v59   ;;  %v3606_v8 = vpop.permute.xlu1 %3605  ;;  %v2921_v9 = vsub.f32 %v2669_v2, %v2837_v39  ;;  %v2342_v54 = vmax.f32 %v2258_v7, 0.0  ;;  %4619 = vrsqrt.f32 %v2424_v26  ;;  %v2466_v11 = vadd.f32 0.001, %v2382_v13  ;;  %v9340_v2 = vld [vmem:[#allocation243_spill] sm:$0xff] }
 0x344   : > { %v3999_v24 = vadd.f32 %v3606_v8, %v3411_v62  ;;  %v4000_v51 = vadd.f32 %v3606_v8, %v3412_v29  ;;  %v9339_v62 = vld [vmem:[#allocation242_spill] sm:$0xff]  ;;  %v2300_v63 = vsub.f32 %v2132_v60, %v2216_v43  ;;  %4621 = vrsqrt.f32 %v2419_v18  ;;  %v9341_v18 = vld [vmem:[#allocation245_spill] sm:$0xff] }
 0x345   : > { %v3631_v58 = vpop.permute.xlu0 %3630  ;;  %v2127_v29 = vmul.f32 0.0051020407, %v9339_v62  ;;  %v2461_v7 = vadd.f32 0.001, %v2377_v47  ;;  %v7798_v8 = vmul.f32 0.0051020407, %v9340_v2  ;;  %v2926_v40 = vsub.f32 %v2674_v53, %v2842_v17 }
 0x346   : > { %4167 = vst [vmem:[%s7494_s7 + $0x80] sm:$0xff] %v3999_v24  ;;  %4168 = vst.msk [vmem:[%s7494_s7 + $0x88] sm:$0xff] %vm1124_vm1, %v4000_v51  ;;  %v4009_v50 = vadd.f32 %v3631_v58, %v3421_v30  ;;  %v4010_v48 = vadd.f32 %v3631_v58, %v3422_v61  ;;  %3362 = vperm.xlu0 %4473, %v7781_v25   ;;  %v4614_v30 = vpop.eup %4613  ;;  %v2211_v46 = vmul.f32 %v7786_v35, %v7786_v35  ;;  %v2628_v51 = vld [vmem:[%s6369_s26 + $0x250] sm:$0xff]  ;;  %v2633_v58 = vld [vmem:[%s6369_s26 + $0x278] sm:$0xff] }
 0x347   : > { %3715 = vperm.xlu1 %4474, %v2921_v9   ;;  %v3028_v39 = vpop.permute.xlu1 %3027  ;;  %v2337_v26 = vmax.f32 %v2253_v56, 0.0  ;;  %v2755_v13 = vmul.f32 %v4612_v38, %v2586_v1  ;;  %v2591_v9 = vld [vmem:[%s6369_s26 + $0x128] sm:$0xff]  ;;  %v4616_v60 = vpop.eup %4615  ;;  %v2087_v24 = vmul.f32 0.0051020407, %v9341_v18  ;;  %v2426_v47 = vadd.f32 0.001, %v2342_v54 }
 0x348   : > { %4177 = vst [vmem:[%s7494_s7 + $0xd0] sm:$0xff] %v4009_v50  ;;  %4178 = vst.msk [vmem:[%s7494_s7 + $0xd8] sm:$0xff] %vm1124_vm1, %v4010_v48  ;;  %v2295_v44 = vsub.f32 %v2127_v29, %v2211_v46  ;;  %4623 = vrsqrt.f32 %v2466_v11  ;;  %v2384_v43 = vmax.f32 %v2300_v63, 0.0  ;;  %v2171_v38 = vmul.f32 %v7798_v8, %v7798_v8  ;;  %v9343_v48 = vld [vmem:[#allocation168_spill] sm:$0xff]  ;;  %v9345_v63 = vld [vmem:[#allocation42_spill] sm:$0xff] }
 0x349   : > { %v3053_v61 = vpop.permute.xlu0 %3052  ;;  %v4618_v17 = vpop.eup %4617  ;;  %4625 = vrsqrt.f32 %v2461_v7  ;;  %v7812_v56 = vmul.f32 %v4614_v30, %v2591_v9  ;;  %v2421_v50 = vadd.f32 0.001, %v2337_v26  ;;  %v7816_v54 = vmul.f32 0.0051020407, %v9343_v48  ;;  %v9346_v2 = vld [vmem:[#allocation44_spill] sm:$0xff]  ;;  %v2671_v30 = vld [vmem:[%s7011_s29 + $0x100] sm:$0xff] }
 0x34a   : > { %3740 = vperm.xlu0 %4473, %v2926_v40   ;;  %v7820_v62 = vmul.f32 %v4616_v60, %v2628_v51  ;;  %v2839_v29 = vmul.f32 %v2755_v13, %v7613_v19  ;;  %v2255_v11 = vsub.f32 %v2087_v24, %v2171_v38  ;;  %4627 = vrsqrt.f32 %v2426_v47  ;;  %v9347_v26 = vld [vmem:[#allocation234_spill] sm:$0xff]  ;;  %v9349_v47 = vld [vmem:[#allocation64_spill] sm:$0xff] }
 0x34b   : > { %3137 = vperm.xlu1 %4474, %v2755_v13   ;;  %v7808_v53 = vpop.permute.xlu1 %3237  ;;  %v3415_v7 = vmul.f32 %v3028_v39, %v9345_v63  ;;  %v3416_v40 = vmul.f32 %v3028_v39, %v9346_v2  ;;  %v2379_v46 = vmax.f32 %v2295_v44, 0.0  ;;  %v2129_v9 = vmul.f32 0.0051020407, %v9347_v26  ;;  %v9348_v13 = vld [vmem:[#allocation62_spill] sm:$0xff]  ;;  %v9350_v63 = vld [vmem:[#allocation199_spill] sm:$0xff] }
 0x34c   : > { %9342 = vst [vmem:[#allocation227_spill] sm:$0xff] %v7808_v53  ;;  %v2468_v18 = vadd.f32 0.001, %v2384_v43  ;;  %v7829_v19 = vmul.f32 %v4618_v17, %v2633_v58  ;;  %v3425_v24 = vmul.f32 %v3053_v61, %v9348_v13  ;;  %v3426_v51 = vmul.f32 %v3053_v61, %v9349_v47  ;;  %v2593_v53 = vld [vmem:[%s6369_s26 + $0x138] sm:$0xff] }
 0x34d   : > { %v7818_v1 = vpop.permute.xlu0 %3262  ;;  %v4620_v48 = vpop.eup %4619  ;;  %v2213_v44 = vmul.f32 %v7816_v54, %v7816_v54  ;;  %v7836_v43 = vmul.f32 0.0051020407, %v9350_v63  ;;  %v2923_v26 = vsub.f32 %v2671_v30, %v2839_v29  ;;  %v2339_v58 = vmax.f32 %v2255_v11, 0.0  ;;  %v9351_v13 = vld [vmem:[#allocation213_spill] sm:$0xff] }
 0x34e   : > { %9344 = vst [vmem:[#allocation123_spill] sm:$0xff] %v7818_v1  ;;  %3162 = vperm.xlu0 %4473, %v7812_v56   ;;  %v4622_v17 = vpop.eup %4621  ;;  %v2089_v47 = vmul.f32 0.0051020407, %v9351_v13  ;;  %4629 = vrsqrt.f32 %v2468_v18  ;;  %v2463_v30 = vadd.f32 0.001, %v2379_v46  ;;  %v7848_v11 = vmul.f32 %v4620_v48, %v2593_v53  ;;  %v2595_v13 = vld [vmem:[%s6369_s26 + $0x148] sm:$0xff] }
 0x34f   : > { %3347 = vperm.xlu1 %4474, %v7820_v62   ;;  %v3616_v60 = vpop.permute.xlu1 %3615  ;;  %4631 = vrsqrt.f32 %v2421_v50  ;;  %v2630_v50 = vld [vmem:[%s6369_s26 + $0x260] sm:$0xff]  ;;  %v2131_v53 = vmul.f32 0.0051020407, %v7442_v3 }
 0x350   : > { %v4003_v39 = vadd.f32 %v3616_v60, %v3415_v7  ;;  %v4004_v38 = vadd.f32 %v3616_v60, %v3416_v40  ;;  %v2588_v40 = vld [vmem:[%s6369_s26 + $0x110] sm:$0xff]  ;;  %v2297_v60 = vsub.f32 %v2129_v9, %v2213_v44  ;;  %v2635_v44 = vld [vmem:[%s6369_s26 + $0x288] sm:$0xff]  ;;  %4633 = vrsqrt.f32 %v2463_v30 }
 0x351   : > { %v3641_v2 = vpop.permute.xlu0 %3640  ;;  %v2757_v18 = vmul.f32 %v4622_v17, %v2588_v40  ;;  %v2673_v30 = vld [vmem:[%s7011_s29 + $0x110] sm:$0xff] }
 0x352   : > { %4171 = vst [vmem:[%s7494_s7 + $0xa0] sm:$0xff] %v4003_v39  ;;  %4172 = vst.msk [vmem:[%s7494_s7 + $0xa8] sm:$0xff] %vm1124_vm1, %v4004_v38  ;;  %v4013_v61 = vadd.f32 %v3641_v2, %v3425_v24  ;;  %v4014_v7 = vadd.f32 %v3641_v2, %v3426_v51  ;;  %3372 = vperm.xlu0 %4473, %v7829_v19   ;;  %v4624_v24 = vpop.eup %4623  ;;  %v2173_v51 = vmul.f32 %v7836_v43, %v7836_v43  ;;  %v9352_v39 = vld [vmem:[#allocation222_spill] sm:$0xff] }
 0x353   : > { %3725 = vperm.xlu1 %4474, %v2923_v26   ;;  %v3038_v29 = vpop.permute.xlu1 %3037  ;;  %v7853_v38 = vmul.f32 0.0051020407, %v9352_v39  ;;  %v4626_v63 = vpop.eup %4625  ;;  %v2423_v2 = vadd.f32 0.001, %v2339_v58  ;;  %v2381_v46 = vmax.f32 %v2297_v60, 0.0  ;;  %v2841_v60 = vmul.f32 %v2757_v18, %v7669_v42  ;;  %v9358_v42 = vld [vmem:[#allocation70_spill] sm:$0xff] }
 0x354   : > { %4181 = vst [vmem:[%s7494_s7 + $0xf0] sm:$0xff] %v4013_v61  ;;  %4182 = vst.msk [vmem:[%s7494_s7 + $0xf8] sm:$0xff] %vm1124_vm1, %v4014_v7  ;;  %v2257_v26 = vsub.f32 %v2089_v47, %v2173_v51  ;;  %v4628_v61 = vpop.eup %4627  ;;  %v7861_v7 = vmul.f32 %v4624_v24, %v2635_v44  ;;  %v7868_v40 = vmul.f32 %v4626_v63, %v2630_v50  ;;  %v9356_v47 = vld [vmem:[#allocation50_spill] sm:$0xff]  ;;  %v9357_v51 = vld [vmem:[#allocation52_spill] sm:$0xff] }
 0x355   : > { %9353 = vst [vmem:[#allocation22_spill] sm:$0xff] %v7853_v38  ;;  %v3063_v9 = vpop.permute.xlu0 %3062  ;;  %v2215_v17 = vmul.f32 %v7853_v38, %v7853_v38  ;;  %4635 = vrsqrt.f32 %v2423_v2  ;;  %v3419_v3 = vmul.f32 %v3038_v29, %v9356_v47  ;;  %v3420_v39 = vmul.f32 %v3038_v29, %v9357_v51  ;;  %v9359_v2 = vld [vmem:[#allocation72_spill] sm:$0xff] }
 0x356   : > { %3172 = vperm.xlu0 %4473, %v7848_v11   ;;  %v2465_v24 = vadd.f32 0.001, %v2381_v46  ;;  %v2341_v44 = vmax.f32 %v2257_v26, 0.0  ;;  %v2764_v50 = vmul.f32 %v4628_v61, %v2595_v13  ;;  %v3430_v47 = vmul.f32 %v3063_v9, %v9359_v2  ;;  %v2637_v46 = vld [vmem:[%s6369_s26 + $0x298] sm:$0xff]  ;;  %v2590_v61 = vld [vmem:[%s6369_s26 + $0x120] sm:$0xff] }
 0x357   : > { %3147 = vperm.xlu1 %4474, %v2757_v18   ;;  %v7859_v48 = vpop.permute.xlu1 %3247  ;;  %v3429_v18 = vmul.f32 %v3063_v9, %v9358_v42  ;;  %v2925_v12 = vsub.f32 %v2673_v30, %v2841_v60 }
 0x358   : > { %9354 = vst [vmem:[#allocation24_spill] sm:$0xff] %v7859_v48  ;;  %v2299_v48 = vsub.f32 %v2131_v53, %v2215_v17  ;;  %v4630_v51 = vpop.eup %4629  ;;  %4637 = vrsqrt.f32 %v2465_v24  ;;  %v2425_v17 = vadd.f32 0.001, %v2341_v44  ;;  %v2846_v44 = vmul.f32 %v7848_v11, %v7712_v45 }
 0x359   : > { %v7866_v58 = vpop.permute.xlu0 %3272  ;;  %v4632_v38 = vpop.eup %4631  ;;  %v7886_v60 = vmul.f32 %v4630_v51, %v2637_v46  ;;  %v2592_v51 = vld [vmem:[%s6369_s26 + $0x130] sm:$0xff]  ;;  %v2848_v46 = vmul.f32 %v2764_v50, %v7747_v20  ;;  %v2634_v20 = vld [vmem:[%s6369_s26 + $0x280] sm:$0xff] }
 0x35a   : > { %9355 = vst [vmem:[#allocation18_spill] sm:$0xff] %v7866_v58  ;;  %3382 = vperm.xlu0 %4473, %v7861_v7   ;;  %v2383_v13 = vmax.f32 %v2299_v48, 0.0  ;;  %v4634_v30 = vpop.eup %4633  ;;  %4639 = vrsqrt.f32 %v2425_v17 }
 0x35b   : > { %3357 = vperm.xlu1 %4474, %v7868_v40   ;;  %v3626_v63 = vpop.permute.xlu1 %3625 }
 0x35c   : > { %v4007_v58 = vadd.f32 %v3626_v63, %v3419_v3  ;;  %v4008_v29 = vadd.f32 %v3626_v63, %v3420_v39  ;;  %v7890_v39 = vmul.f32 %v4632_v38, %v2590_v61  ;;  %v2467_v48 = vadd.f32 0.001, %v2383_v13  ;;  %v9363_v61 = vld [vmem:[#allocation80_spill] sm:$0xff] }
 0x35d   : > { %v3651_v1 = vpop.permute.xlu0 %3650 }
 0x35e   : > { %4175 = vst [vmem:[%s7494_s7 + $0xc0] sm:$0xff] %v4007_v58  ;;  %4176 = vst.msk [vmem:[%s7494_s7 + $0xc8] sm:$0xff] %vm1124_vm1, %v4008_v29  ;;  %v4017_v26 = vadd.f32 %v3651_v1, %v3429_v18  ;;  %v4018_v53 = vadd.f32 %v3651_v1, %v3430_v47  ;;  %3182 = vperm.xlu0 %4473, %v2764_v50   ;;  %v2844_v58 = vmul.f32 %v7812_v56, %v7665_v52  ;;  %v2676_v1 = vld [vmem:[%s7011_s29 + $0x128] sm:$0xff]  ;;  %v2678_v56 = vld [vmem:[%s7011_s29 + $0x138] sm:$0xff] }
 0x35f   : > { %3735 = vperm.xlu1 %4474, %v2925_v12   ;;  %v3048_v9 = vpop.permute.xlu1 %3047  ;;  %v2632_v12 = vld [vmem:[%s6369_s26 + $0x270] sm:$0xff]  ;;  %v4636_v63 = vpop.eup %4635  ;;  %v9360_v18 = vld [vmem:[#allocation58_spill] sm:$0xff]  ;;  %4641 = vrsqrt.f32 %v2467_v48  ;;  %v2930_v11 = vsub.f32 %v2678_v56, %v2846_v44 }
 0x360   : > { %4185 = vst [vmem:[%s7494_s7 + $0x110] sm:$0xff] %v4017_v26  ;;  %4186 = vst.msk [vmem:[%s7494_s7 + $0x118] sm:$0xff] %vm1124_vm1, %v4018_v53  ;;  %v2928_v52 = vsub.f32 %v2676_v1, %v2844_v58  ;;  %v7903_v42 = vmul.f32 %v4634_v30, %v2632_v12  ;;  %v3423_v2 = vmul.f32 %v3048_v9, %v9360_v18  ;;  %v9361_v47 = vld [vmem:[#allocation60_spill] sm:$0xff]  ;;  %v9362_v26 = vld [vmem:[#allocation78_spill] sm:$0xff] }
 0x361   : > { %v3073_v3 = vpop.permute.xlu0 %3072  ;;  %v3424_v29 = vmul.f32 %v3048_v9, %v9361_v47  ;;  %v2761_v1 = vmul.f32 %v4636_v63, %v2592_v51  ;;  %v2680_v30 = vld [vmem:[%s7011_s29 + $0x148] sm:$0xff]  ;;  %v9365_v63 = vld [vmem:[#allocation201_spill] sm:$0xff]  ;;  %v2594_v51 = vld [vmem:[%s6369_s26 + $0x140] sm:$0xff] }
 0x362   : > { %3392 = vperm.xlu0 %4473, %v7886_v60   ;;  %v3433_v53 = vmul.f32 %v3073_v3, %v9362_v26  ;;  %v3434_v13 = vmul.f32 %v3073_v3, %v9363_v61  ;;  %v4638_v12 = vpop.eup %4637  ;;  %v2932_v3 = vsub.f32 %v2680_v30, %v2848_v46  ;;  %v2682_v47 = vld [vmem:[%s7011_s29 + $0x158] sm:$0xff]  ;;  %v9368_v26 = vld [vmem:[#allocation220_spill] sm:$0xff]  ;;  %v2684_v46 = vld [vmem:[%s7011_s29 + $0x168] sm:$0xff] }
 0x363   : > { %3157 = vperm.xlu1 %4474, %v7890_v39   ;;  %v7896_v24 = vpop.permute.xlu1 %3257 }
 0x365   : > { %v7901_v38 = vpop.permute.xlu0 %3282 }
 0x366   : > { %3750 = vperm.xlu0 %4473, %v2928_v52   ;;  %v9364_v52 = vld [vmem:[#allocation170_spill] sm:$0xff] }
 0x367   : > { %3367 = vperm.xlu1 %4474, %v7903_v42   ;;  %v3636_v45 = vpop.permute.xlu1 %3635  ;;  %v2850_v56 = vmul.f32 %v9365_v63, %v9364_v52  ;;  %v9371_v52 = vld [vmem:[#allocation210_spill] sm:$0xff]  ;;  %v9372_v63 = vld [vmem:[#allocation216_spill] sm:$0xff] }
 0x368   : > { %v4011_v17 = vadd.f32 %v3636_v45, %v3423_v2  ;;  %v4012_v9 = vadd.f32 %v3636_v45, %v3424_v29  ;;  %v7922_v2 = vmul.f32 %v4638_v12, %v2634_v20  ;;  %v4640_v29 = vpop.eup %4639  ;;  %v9370_v12 = vld [vmem:[#allocation68_spill] sm:$0xff] }
 0x369   : > { %v3661_v58 = vpop.permute.xlu0 %3660  ;;  %v2934_v61 = vsub.f32 %v2682_v47, %v2850_v56  ;;  %v2854_v56 = vmul.f32 %v9372_v63, %v9371_v52  ;;  %v9373_v47 = vld [vmem:[#allocation86_spill] sm:$0xff]  ;;  %v2845_v63 = vmul.f32 %v2761_v1, %v7798_v8 }
 0x36a   : > { %4179 = vst [vmem:[%s7494_s7 + $0xe0] sm:$0xff] %v4011_v17  ;;  %4180 = vst.msk [vmem:[%s7494_s7 + $0xe8] sm:$0xff] %vm1124_vm1, %v4012_v9  ;;  %v4021_v48 = vadd.f32 %v3661_v58, %v3433_v53  ;;  %v4022_v44 = vadd.f32 %v3661_v58, %v3434_v13  ;;  %3760 = vperm.xlu0 %4473, %v2930_v11   ;;  %v9367_v11 = vld [vmem:[#allocation193_spill] sm:$0xff]  ;;  %v4642_v13 = vpop.eup %4641  ;;  %v2763_v9 = vmul.f32 %v4640_v29, %v2594_v51  ;;  %v9369_v58 = vld [vmem:[#allocation66_spill] sm:$0xff] }
 0x36b   : > { %3167 = vperm.xlu1 %4474, %v2761_v1   ;;  %v3058_v50 = vpop.permute.xlu1 %3057  ;;  %v2852_v53 = vmul.f32 %v9368_v26, %v9367_v11  ;;  %v9374_v26 = vld [vmem:[#allocation88_spill] sm:$0xff]  ;;  %v2675_v52 = vld [vmem:[%s7011_s29 + $0x120] sm:$0xff] }
 0x36c   : > { %4189 = vst [vmem:[%s7494_s7 + $0x130] sm:$0xff] %v4021_v48  ;;  %4190 = vst.msk [vmem:[%s7494_s7 + $0x138] sm:$0xff] %vm1124_vm1, %v4022_v44  ;;  %v3427_v30 = vmul.f32 %v3058_v50, %v9369_v58  ;;  %v3428_v48 = vmul.f32 %v3058_v50, %v9370_v12  ;;  %v2636_v44 = vld [vmem:[%s6369_s26 + $0x290] sm:$0xff]  ;;  %v2843_v12 = vmul.f32 %v7890_v39, %v7754_v5  ;;  %v2679_v1 = vld [vmem:[%s7011_s29 + $0x140] sm:$0xff] }
 0x36d   : > { %v3083_v18 = vpop.permute.xlu0 %3082  ;;  %v7941_v50 = vmul.f32 %v4642_v13, %v2636_v44 }
 0x36e   : > { %3770 = vperm.xlu0 %4473, %v2932_v3   ;;  %v2936_v3 = vsub.f32 %v2684_v46, %v2852_v53  ;;  %v3437_v11 = vmul.f32 %v3083_v18, %v9373_v47  ;;  %v3438_v29 = vmul.f32 %v3083_v18, %v9374_v26  ;;  %v2927_v39 = vsub.f32 %v2675_v52, %v2843_v12  ;;  %v9378_v47 = vld [vmem:[#allocation113_spill] sm:$0xff]  ;;  %v9380_v12 = vld [vmem:[#allocation74_spill] sm:$0xff] }
 0x36f   : > { %3377 = vperm.xlu1 %4474, %v7922_v2   ;;  %v7927_v45 = vpop.permute.xlu1 %3267 }
 0x370   : > { %9366 = vst [vmem:[#allocation20_spill] sm:$0xff] %v7927_v45 }
 0x371   : > { %v7932_v17 = vpop.permute.xlu0 %3292 }
 0x372   : > { %3780 = vperm.xlu0 %4473, %v2934_v61   ;;  %v2686_v61 = vld [vmem:[%s7011_s29 + $0x178] sm:$0xff] }
 0x373   : > { %3177 = vperm.xlu1 %4474, %v2763_v9   ;;  %v3646_v20 = vpop.permute.xlu1 %3645  ;;  %v2938_v13 = vsub.f32 %v2686_v61, %v2854_v56  ;;  %v2847_v61 = vmul.f32 %v2763_v9, %v7836_v43 }
 0x374   : > { %v4015_v51 = vadd.f32 %v3646_v20, %v3427_v30  ;;  %v4016_v58 = vadd.f32 %v3646_v20, %v3428_v48  ;;  %v9375_v30 = vld [vmem:[#allocation225_spill] sm:$0xff]  ;;  %v9376_v48 = vld [vmem:[#allocation215_spill] sm:$0xff] }
 0x375   : > { %v3671_v45 = vpop.permute.xlu0 %3670  ;;  %v2856_v44 = vmul.f32 %v9376_v48, %v9375_v30  ;;  %v2688_v20 = vld [vmem:[%s7011_s29 + $0x188] sm:$0xff]  ;;  %v9382_v30 = vld [vmem:[#allocation125_spill] sm:$0xff]  ;;  %v9383_v48 = vld [vmem:[#allocation228_spill] sm:$0xff] }
 0x376   : > { %4183 = vst [vmem:[%s7494_s7 + $0x100] sm:$0xff] %v4015_v51  ;;  %4184 = vst.msk [vmem:[%s7494_s7 + $0x108] sm:$0xff] %vm1124_vm1, %v4016_v58  ;;  %v4025_v53 = vadd.f32 %v3671_v45, %v3437_v11  ;;  %v4026_v46 = vadd.f32 %v3671_v45, %v3438_v29  ;;  %3790 = vperm.xlu0 %4473, %v2936_v3   ;;  %v2677_v45 = vld [vmem:[%s7011_s29 + $0x130] sm:$0xff]  ;;  %v9379_v11 = vld [vmem:[#allocation226_spill] sm:$0xff] }
 0x377   : > { %3387 = vperm.xlu1 %4474, %v7941_v50   ;;  %v3068_v18 = vpop.permute.xlu1 %3067  ;;  %v2858_v26 = vmul.f32 %v9379_v11, %v9378_v47  ;;  %v2940_v29 = vsub.f32 %v2688_v20, %v2856_v44  ;;  %v2690_v51 = vld [vmem:[%s7011_s29 + $0x198] sm:$0xff]  ;;  %v2929_v58 = vsub.f32 %v2677_v45, %v2845_v63  ;;  %v2860_v44 = vmul.f32 %v9383_v48, %v9382_v30  ;;  %v9385_v63 = vld [vmem:[#allocation96_spill] sm:$0xff]  ;;  %v2692_v11 = vld [vmem:[%s7011_s29 + $0x1a8] sm:$0xff] }
 0x378   : > { %4193 = vst [vmem:[%s7494_s7 + $0x150] sm:$0xff] %v4025_v53  ;;  %4194 = vst.msk [vmem:[%s7494_s7 + $0x158] sm:$0xff] %vm1124_vm1, %v4026_v46  ;;  %v3431_v53 = vmul.f32 %v3068_v18, %v9380_v12  ;;  %v9381_v46 = vld [vmem:[#allocation76_spill] sm:$0xff]  ;;  %v2694_v48 = vld [vmem:[%s7011_s29 + $0x1b8] sm:$0xff] }
 0x379   : > { %v3093_v5 = vpop.permute.xlu0 %3092  ;;  %v3432_v8 = vmul.f32 %v3068_v18, %v9381_v46  ;;  %v2931_v18 = vsub.f32 %v2679_v1, %v2847_v61  ;;  %v9387_v12 = vld [vmem:[#allocation236_spill] sm:$0xff]  ;;  %v2944_v61 = vsub.f32 %v2692_v11, %v2860_v44  ;;  %v2696_v44 = vld [vmem:[%s7011_s29 + $0x1c8] sm:$0xff] }
 0x37a   : > { %3800 = vperm.xlu0 %4473, %v2938_v13   ;;  %v2942_v13 = vsub.f32 %v2690_v51, %v2858_v26  ;;  %v3442_v43 = vmul.f32 %v3093_v5, %v9385_v63  ;;  %v2681_v46 = vld [vmem:[%s7011_s29 + $0x150] sm:$0xff]  ;;  %v9391_v63 = vld [vmem:[#allocation206_spill] sm:$0xff] }
 0x37b   : > { %3745 = vperm.xlu1 %4474, %v2927_v39   ;;  %v7959_v3 = vpop.permute.xlu1 %3277  ;;  %v9384_v39 = vld [vmem:[#allocation94_spill] sm:$0xff] }
 0x37c   : > { %9377 = vst [vmem:[#allocation136_spill] sm:$0xff] %v7959_v3  ;;  %v3441_v20 = vmul.f32 %v3093_v5, %v9384_v39  ;;  %v9390_v39 = vld [vmem:[#allocation190_spill] sm:$0xff] }
 0x37d   : > { %v7964_v56 = vpop.permute.xlu0 %3302  ;;  %v9406_v3 = vld [vmem:[#allocation122_spill] sm:$0xff] }
 0x37e   : > { %3810 = vperm.xlu0 %4473, %v2940_v29   ;;  %v9386_v29 = vld [vmem:[#allocation178_spill] sm:$0xff] }
 0x37f   : > { %3755 = vperm.xlu1 %4474, %v2929_v58   ;;  %v3656_v52 = vpop.permute.xlu1 %3655  ;;  %v2849_v58 = vmul.f32 %v9387_v12, %v9386_v29  ;;  %v9395_v12 = vld [vmem:[#allocation99_spill] sm:$0xff] }
 0x380   : > { %v4019_v9 = vadd.f32 %v3656_v52, %v3431_v53  ;;  %v4020_v45 = vadd.f32 %v3656_v52, %v3432_v8  ;;  %v9388_v53 = vld [vmem:[#allocation146_spill] sm:$0xff]  ;;  %v9389_v8 = vld [vmem:[#allocation229_spill] sm:$0xff] }
 0x381   : > { %v3681_v47 = vpop.permute.xlu0 %3680  ;;  %v2862_v1 = vmul.f32 %v9389_v8, %v9388_v53  ;;  %v2933_v30 = vsub.f32 %v2681_v46, %v2849_v58  ;;  %v9398_v53 = vld [vmem:[#allocation84_spill] sm:$0xff] }
 0x382   : > { %4187 = vst [vmem:[%s7494_s7 + $0x120] sm:$0xff] %v4019_v9  ;;  %4188 = vst.msk [vmem:[%s7494_s7 + $0x128] sm:$0xff] %vm1124_vm1, %v4020_v45  ;;  %v4029_v26 = vadd.f32 %v3681_v47, %v3441_v20  ;;  %v4030_v51 = vadd.f32 %v3681_v47, %v3442_v43  ;;  %3820 = vperm.xlu0 %4473, %v2942_v13   ;;  %v2851_v9 = vmul.f32 %v9391_v63, %v9390_v39  ;;  %v2683_v13 = vld [vmem:[%s7011_s29 + $0x160] sm:$0xff] }
 0x383   : > { %3765 = vperm.xlu1 %4474, %v2931_v18   ;;  %v3078_v5 = vpop.permute.xlu1 %3077  ;;  %v9393_v43 = vld [vmem:[#allocation150_spill] sm:$0xff]  ;;  %v2946_v18 = vsub.f32 %v2694_v48, %v2862_v1  ;;  %v2685_v1 = vld [vmem:[%s7011_s29 + $0x170] sm:$0xff] }
 0x384   : > { %4197 = vst [vmem:[%s7494_s7 + $0x170] sm:$0xff] %v4029_v26  ;;  %4198 = vst.msk [vmem:[%s7494_s7 + $0x178] sm:$0xff] %vm1124_vm1, %v4030_v51  ;;  %v9394_v45 = vld [vmem:[#allocation238_spill] sm:$0xff]  ;;  %v2935_v29 = vsub.f32 %v2683_v13, %v2851_v9  ;;  %v3436_v8 = vmul.f32 %v3078_v5, %v9398_v53 }
 0x385   : > { %v3103_v52 = vpop.permute.xlu0 %3102  ;;  %v2864_v47 = vmul.f32 %v9394_v45, %v9393_v43  ;;  %v9396_v26 = vld [vmem:[#allocation214_spill] sm:$0xff]  ;;  %v9402_v43 = vld [vmem:[#allocation172_spill] sm:$0xff] }
 0x386   : > { %3830 = vperm.xlu0 %4473, %v2944_v61   ;;  %v2853_v58 = vmul.f32 %v9396_v26, %v9395_v12  ;;  %v9397_v51 = vld [vmem:[#allocation82_spill] sm:$0xff]  ;;  %v9399_v61 = vld [vmem:[#allocation107_spill] sm:$0xff] }
 0x387   : > { %3775 = vperm.xlu1 %4474, %v2933_v30   ;;  %v7990_v20 = vpop.permute.xlu1 %3287  ;;  %v3435_v46 = vmul.f32 %v3078_v5, %v9397_v51  ;;  %v9400_v30 = vld [vmem:[#allocation109_spill] sm:$0xff]  ;;  %v2948_v9 = vsub.f32 %v2696_v44, %v2864_v47  ;;  %v9401_v13 = vld [vmem:[#allocation230_spill] sm:$0xff]  ;;  %v9404_v5 = vld [vmem:[#allocation108_spill] sm:$0xff] }
 0x388   : > { %9392 = vst [vmem:[#allocation38_spill] sm:$0xff] %v7990_v20  ;;  %v2866_v45 = vmul.f32 %v9402_v43, %v9401_v13  ;;  %v9403_v12 = vld [vmem:[#allocation106_spill] sm:$0xff]  ;;  %v3446_v51 = vmul.f32 %v3103_v52, %v9404_v5  ;;  %v2698_v20 = vld [vmem:[%s7011_s29 + $0x1d8] sm:$0xff]  ;;  %v2700_v43 = vld [vmem:[%s7011_s29 + $0x1e8] sm:$0xff] }
 0x389   : > { %v3313_v11 = vpop.permute.xlu0 %3312  ;;  %v3445_v26 = vmul.f32 %v3103_v52, %v9403_v12  ;;  %v2687_v13 = vld [vmem:[%s7011_s29 + $0x180] sm:$0xff]  ;;  %v9409_v12 = vld [vmem:[#allocation112_spill] sm:$0xff]  ;;  %v9410_v5 = vld [vmem:[#allocation135_spill] sm:$0xff] }
 0x38a   : > { %v8000_v39 = vmul.f32 %v3313_v11, %v9399_v61  ;;  %v8003_v63 = vmul.f32 %v3313_v11, %v9400_v30  ;;  %3840 = vperm.xlu0 %4473, %v2946_v18   ;;  %v2937_v30 = vsub.f32 %v2685_v1, %v2853_v58  ;;  %v9405_v18 = vld [vmem:[#allocation111_spill] sm:$0xff]  ;;  %v2950_v58 = vsub.f32 %v2698_v20, %v2866_v45  ;;  %v2702_v20 = vld [vmem:[%s7011_s29 + $0x1f8] sm:$0xff] }
 0x38b   : > { %3785 = vperm.xlu1 %4474, %v2935_v29   ;;  %v3666_v48 = vpop.permute.xlu1 %3665  ;;  %v2855_v29 = vmul.f32 %v9406_v3, %v9405_v18 }
 0x38c   : > { %v4023_v53 = vadd.f32 %v3666_v48, %v3435_v46  ;;  %v4024_v61 = vadd.f32 %v3666_v48, %v3436_v8  ;;  %v9407_v46 = vld [vmem:[#allocation232_spill] sm:$0xff] }
 0x38d   : > { %v3691_v11 = vpop.permute.xlu0 %3690  ;;  %v9408_v8 = vld [vmem:[#allocation204_spill] sm:$0xff]  ;;  %v2939_v3 = vsub.f32 %v2687_v13, %v2855_v29  ;;  %v9416_v13 = vld [vmem:[#allocation90_spill] sm:$0xff] }
 0x38e   : > { %4191 = vst [vmem:[%s7494_s7 + $0x140] sm:$0xff] %v4023_v53  ;;  %4192 = vst.msk [vmem:[%s7494_s7 + $0x148] sm:$0xff] %vm1124_vm1, %v4024_v61  ;;  %v4033_v47 = vadd.f32 %v3691_v11, %v3445_v26  ;;  %v4034_v44 = vadd.f32 %v3691_v11, %v3446_v51  ;;  %3850 = vperm.xlu0 %4473, %v2948_v9   ;;  %v2868_v1 = vmul.f32 %v9408_v8, %v9407_v46  ;;  %v2689_v9 = vld [vmem:[%s7011_s29 + $0x190] sm:$0xff]  ;;  %v9413_v61 = vld [vmem:[#allocation246_spill] sm:$0xff] }
 0x38f   : > { %3795 = vperm.xlu1 %4474, %v2937_v30   ;;  %v3088_v52 = vpop.permute.xlu1 %3087  ;;  %v2857_v53 = vmul.f32 %v9410_v5, %v9409_v12  ;;  %v9412_v51 = vld [vmem:[#allocation240_spill] sm:$0xff] }
 0x390   : > { %4201 = vst [vmem:[%s7494_s7 + $0x190] sm:$0xff] %v4033_v47  ;;  %4202 = vst.msk [vmem:[%s7494_s7 + $0x198] sm:$0xff] %vm1124_vm1, %v4034_v44  ;;  %v2870_v11 = vmul.f32 %v9413_v61, %v9412_v51  ;;  %v2952_v30 = vsub.f32 %v2700_v43, %v2868_v1  ;;  %v9414_v47 = vld [vmem:[#allocation124_spill] sm:$0xff]  ;;  %v9415_v44 = vld [vmem:[#allocation147_spill] sm:$0xff]  ;;  %v3439_v46 = vmul.f32 %v3088_v52, %v9416_v13 }
 0x391   : > { %v3113_v48 = vpop.permute.xlu0 %3112  ;;  %v2941_v18 = vsub.f32 %v2689_v9, %v2857_v53  ;;  %v2859_v29 = vmul.f32 %v9415_v44, %v9414_v47  ;;  %v9417_v8 = vld [vmem:[#allocation92_spill] sm:$0xff]  ;;  %v2691_v1 = vld [vmem:[%s7011_s29 + $0x1a0] sm:$0xff]  ;;  %v9422_v9 = vld [vmem:[#allocation187_spill] sm:$0xff] }
 0x392   : > { %3860 = vperm.xlu0 %4473, %v2950_v58   ;;  %v3440_v12 = vmul.f32 %v3088_v52, %v9417_v8  ;;  %v9418_v58 = vld [vmem:[#allocation119_spill] sm:$0xff]  ;;  %v2954_v53 = vsub.f32 %v2702_v20, %v2870_v11  ;;  %v9423_v51 = vld [vmem:[#allocation198_spill] sm:$0xff]  ;;  %v9425_v52 = vld [vmem:[#allocation120_spill] sm:$0xff] }
 0x393   : > { %3805 = vperm.xlu1 %4474, %v2939_v3   ;;  %v8026_v26 = vpop.permute.xlu1 %3297  ;;  %v9420_v3 = vld [vmem:[#allocation121_spill] sm:$0xff]  ;;  %v2872_v61 = vmul.f32 %v9423_v51, %v9422_v9  ;;  %v9424_v47 = vld [vmem:[#allocation118_spill] sm:$0xff]  ;;  %v3450_v13 = vmul.f32 %v3113_v48, %v9425_v52  ;;  %v2693_v9 = vld [vmem:[%s7011_s29 + $0x1b0] sm:$0xff] }
 0x394   : > { %9411 = vst [vmem:[#allocation40_spill] sm:$0xff] %v8026_v26  ;;  %v3449_v44 = vmul.f32 %v3113_v48, %v9424_v47  ;;  %v9429_v51 = vld [vmem:[#allocation148_spill] sm:$0xff] }
 0x395   : > { %v3323_v45 = vpop.permute.xlu0 %3322  ;;  %v9430_v47 = vld [vmem:[#allocation244_spill] sm:$0xff] }
 0x396   : > { %v8036_v5 = vmul.f32 %v3323_v45, %v9418_v58  ;;  %v8039_v26 = vmul.f32 %v3323_v45, %v9420_v3  ;;  %3870 = vperm.xlu0 %4473, %v2952_v30   ;;  %v2943_v3 = vsub.f32 %v2691_v1, %v2859_v29  ;;  %v9426_v30 = vld [vmem:[#allocation137_spill] sm:$0xff]  ;;  %v2863_v52 = vmul.f32 %v9430_v47, %v9429_v51  ;;  %v9438_v47 = vld [vmem:[#allocation131_spill] sm:$0xff] }
 0x397   : > { %3815 = vperm.xlu1 %4474, %v2941_v18   ;;  %v3676_v43 = vpop.permute.xlu1 %3675 }
 0x398   : > { %9419 = vst [vmem:[#allocation233_spill] sm:$0xff] %v8036_v5  ;;  %9421 = vst [vmem:[#allocation134_spill] sm:$0xff] %v8039_v26  ;;  %v4027_v8 = vadd.f32 %v3676_v43, %v3439_v46  ;;  %v4028_v58 = vadd.f32 %v3676_v43, %v3440_v12  ;;  %v2704_v26 = vld [vmem:[%s7011_s29 + $0x208] sm:$0xff]  ;;  %v9428_v46 = vld [vmem:[#allocation169_spill] sm:$0xff] }
 0x399   : > { %v3701_v45 = vpop.permute.xlu0 %3700  ;;  %v9427_v5 = vld [vmem:[#allocation171_spill] sm:$0xff]  ;;  %v2956_v29 = vsub.f32 %v2704_v26, %v2872_v61  ;;  %v2874_v12 = vmul.f32 %v7482_v37, %v9428_v46  ;;  %v2706_v43 = vld [vmem:[%s7011_s29 + $0x218] sm:$0xff] }
 0x39a   : > { %v2861_v18 = vmul.f32 %v9427_v5, %v9426_v30  ;;  %4195 = vst [vmem:[%s7494_s7 + $0x160] sm:$0xff] %v4027_v8  ;;  %4196 = vst.msk [vmem:[%s7494_s7 + $0x168] sm:$0xff] %vm1124_vm1, %v4028_v58  ;;  %v4037_v11 = vadd.f32 %v3701_v45, %v3449_v44  ;;  %v4038_v20 = vadd.f32 %v3701_v45, %v3450_v13  ;;  %3880 = vperm.xlu0 %4473, %v2954_v53   ;;  %v2695_v44 = vld [vmem:[%s7011_s29 + $0x1c0] sm:$0xff]  ;;  %v9432_v58 = vld [vmem:[#allocation103_spill] sm:$0xff] }
 0x39b   : > { %3825 = vperm.xlu1 %4474, %v2943_v3   ;;  %v3098_v48 = vpop.permute.xlu1 %3097  ;;  %v9431_v13 = vld [vmem:[#allocation110_spill] sm:$0xff]  ;;  %v9433_v26 = vld [vmem:[#allocation105_spill] sm:$0xff]  ;;  %v2958_v37 = vsub.f32 %v2706_v43, %v2874_v12  ;;  %v2708_v3 = vld [vmem:[%s7011_s29 + $0x228] sm:$0xff] }
 0x39c   : > { %4205 = vst [vmem:[%s7494_s7 + $0x1b0] sm:$0xff] %v4037_v11  ;;  %4206 = vst.msk [vmem:[%s7494_s7 + $0x1b8] sm:$0xff] %vm1124_vm1, %v4038_v20  ;;  %v2945_v5 = vsub.f32 %v2693_v9, %v2861_v18  ;;  %v2876_v8 = vmul.f32 %v7544_v22, %v9431_v13  ;;  %v2947_v18 = vsub.f32 %v2695_v44, %v2863_v52  ;;  %v9434_v11 = vld [vmem:[#allocation149_spill] sm:$0xff]  ;;  %v9435_v20 = vld [vmem:[#allocation98_spill] sm:$0xff] }
 0x39d   : > { %v3123_v1 = vpop.permute.xlu0 %3122  ;;  %v2865_v9 = vmul.f32 %v9435_v20, %v9434_v11  ;;  %v9439_v13 = vld [vmem:[#allocation133_spill] sm:$0xff]  ;;  %v2697_v12 = vld [vmem:[%s7011_s29 + $0x1d0] sm:$0xff]  ;;  %v2878_v44 = vmul.f32 %v7598_v0, %v7460_v16 }
 0x39e   : > { %3890 = vperm.xlu0 %4473, %v2956_v29   ;;  %v9436_v29 = vld [vmem:[#allocation102_spill] sm:$0xff]  ;;  %v2960_v52 = vsub.f32 %v2708_v3, %v2876_v8 }
 0x39f   : > { %3835 = vperm.xlu1 %4474, %v2945_v5   ;;  %v3308_v53 = vpop.permute.xlu1 %3307  ;;  %v3443_v46 = vmul.f32 %v3098_v48, %v9436_v29  ;;  %v9437_v5 = vld [vmem:[#allocation104_spill] sm:$0xff]  ;;  %v2699_v8 = vld [vmem:[%s7011_s29 + $0x1e0] sm:$0xff] }
 0x3a0   : > { %v8065_v45 = vmul.f32 %v3308_v53, %v9432_v58  ;;  %v8068_v61 = vmul.f32 %v3308_v53, %v9433_v26  ;;  %v3444_v51 = vmul.f32 %v3098_v48, %v9437_v5  ;;  %v9440_v53 = vld [vmem:[#allocation130_spill] sm:$0xff]  ;;  %v9441_v48 = vld [vmem:[#allocation132_spill] sm:$0xff]  ;;  %v2949_v5 = vsub.f32 %v2697_v12, %v2865_v9  ;;  %v2712_v12 = vld [vmem:[%s7011_s29 + $0x248] sm:$0xff] }
 0x3a1   : > { %v3333_v30 = vpop.permute.xlu0 %3332  ;;  %v3453_v26 = vmul.f32 %v3123_v1, %v9440_v53  ;;  %v3454_v11 = vmul.f32 %v3123_v1, %v9441_v48  ;;  %v2880_v9 = vmul.f32 %v7660_v27, %v7516_v15  ;;  %v2882_v48 = vmul.f32 %v7723_v14, %v7558_v33  ;;  %v2714_v27 = vld [vmem:[%s7011_s29 + $0x258] sm:$0xff] }
 0x3a2   : > { %v8076_v22 = vmul.f32 %v3333_v30, %v9438_v47  ;;  %v8079_v58 = vmul.f32 %v3333_v30, %v9439_v13  ;;  %3900 = vperm.xlu0 %4473, %v2958_v37   ;;  %v2710_v47 = vld [vmem:[%s7011_s29 + $0x238] sm:$0xff]  ;;  %v9442_v37 = vld [vmem:[#allocation186_spill] sm:$0xff]  ;;  %v9443_v13 = vld [vmem:[#allocation235_spill] sm:$0xff] }
 0x3a3   : > { %3845 = vperm.xlu1 %4474, %v2947_v18   ;;  %v3686_v43 = vpop.permute.xlu1 %3685  ;;  %v2867_v18 = vmul.f32 %v9443_v13, %v9442_v37  ;;  %v2962_v3 = vsub.f32 %v2710_v47, %v2878_v44  ;;  %v9446_v44 = vld [vmem:[#allocation117_spill] sm:$0xff]  ;;  %v2964_v15 = vsub.f32 %v2712_v12, %v2880_v9  ;;  %v9447_v47 = vld [vmem:[#allocation196_spill] sm:$0xff]  ;;  %v9448_v37 = vld [vmem:[#allocation114_spill] sm:$0xff] }
 0x3a4   : > { %v4031_v20 = vadd.f32 %v3686_v43, %v3443_v46  ;;  %v4032_v29 = vadd.f32 %v3686_v43, %v3444_v51  ;;  %v9444_v43 = vld [vmem:[#allocation191_spill] sm:$0xff]  ;;  %v9451_v14 = vld [vmem:[#allocation145_spill] sm:$0xff]  ;;  %v9452_v12 = vld [vmem:[#allocation142_spill] sm:$0xff] }
 0x3a5   : > { %v3711_v30 = vpop.permute.xlu0 %3710  ;;  %v2951_v51 = vsub.f32 %v2699_v8, %v2867_v18  ;;  %v2869_v53 = vmul.f32 %v7466_v4, %v9444_v43  ;;  %v2871_v4 = vmul.f32 %v7530_v23, %v9447_v47  ;;  %v9449_v18 = vld [vmem:[#allocation116_spill] sm:$0xff]  ;;  %v2884_v23 = vmul.f32 %v7781_v25, %v7616_v31 }
 0x3a6   : > { %4199 = vst [vmem:[%s7494_s7 + $0x180] sm:$0xff] %v4031_v20  ;;  %4200 = vst.msk [vmem:[%s7494_s7 + $0x188] sm:$0xff] %vm1124_vm1, %v4032_v29  ;;  %v4041_v16 = vadd.f32 %v3711_v30, %v3453_v26  ;;  %v4042_v0 = vadd.f32 %v3711_v30, %v3454_v11  ;;  %3910 = vperm.xlu0 %4473, %v2960_v52   ;;  %v2701_v26 = vld [vmem:[%s7011_s29 + $0x1f0] sm:$0xff]  ;;  %v9445_v11 = vld [vmem:[#allocation115_spill] sm:$0xff]  ;;  %v2886_v47 = vmul.f32 %v7829_v19, %v7674_v28 }
 0x3a7   : > { %3855 = vperm.xlu1 %4474, %v2949_v5   ;;  %v3108_v1 = vpop.permute.xlu1 %3107  ;;  %v2953_v5 = vsub.f32 %v2701_v26, %v2869_v53  ;;  %v2720_v19 = vld [vmem:[%s7011_s29 + $0x288] sm:$0xff] }
 0x3a8   : > { %4209 = vst [vmem:[%s7494_s7 + $0x1d0] sm:$0xff] %v4041_v16  ;;  %4210 = vst.msk [vmem:[%s7494_s7 + $0x1d8] sm:$0xff] %vm1124_vm1, %v4042_v0  ;;  %v3447_v13 = vmul.f32 %v3108_v1, %v9448_v37  ;;  %v3448_v16 = vmul.f32 %v3108_v1, %v9449_v18  ;;  %v9450_v0 = vld [vmem:[#allocation143_spill] sm:$0xff]  ;;  %v9453_v1 = vld [vmem:[#allocation144_spill] sm:$0xff] }
 0x3a9   : > { %v3133_v46 = vpop.permute.xlu0 %3132  ;;  %v2718_v37 = vld [vmem:[%s7011_s29 + $0x278] sm:$0xff]  ;;  %v2707_v18 = vld [vmem:[%s7011_s29 + $0x220] sm:$0xff] }
 0x3aa   : > { %3920 = vperm.xlu0 %4473, %v2962_v3   ;;  %v2703_v3 = vld [vmem:[%s7011_s29 + $0x200] sm:$0xff]  ;;  %v3457_v43 = vmul.f32 %v3133_v46, %v9452_v12  ;;  %v3458_v53 = vmul.f32 %v3133_v46, %v9453_v1  ;;  %v2970_v28 = vsub.f32 %v2718_v37, %v2886_v47  ;;  %v9458_v1 = vld [vmem:[#allocation128_spill] sm:$0xff]  ;;  %v2722_v47 = vld [vmem:[%s7011_s29 + $0x298] sm:$0xff] }
 0x3ab   : > { %3865 = vperm.xlu1 %4474, %v2951_v51   ;;  %v3318_v52 = vpop.permute.xlu1 %3317  ;;  %v2966_v51 = vsub.f32 %v2714_v27, %v2882_v48  ;;  %v2705_v48 = vld [vmem:[%s7011_s29 + $0x210] sm:$0xff] }
 0x3ac   : > { %v8105_v20 = vmul.f32 %v3318_v52, %v9445_v11  ;;  %v8108_v29 = vmul.f32 %v3318_v52, %v9446_v44  ;;  %v2955_v44 = vsub.f32 %v2703_v3, %v2871_v4 }
 0x3ad   : > { %v3343_v30 = vpop.permute.xlu0 %3342 }
 0x3ae   : > { %v8116_v33 = vmul.f32 %v3343_v30, %v9450_v0  ;;  %v8119_v8 = vmul.f32 %v3343_v30, %v9451_v14  ;;  %3930 = vperm.xlu0 %4473, %v2964_v15   ;;  %v2716_v30 = vld [vmem:[%s7011_s29 + $0x268] sm:$0xff]  ;;  %v9454_v15 = vld [vmem:[#allocation173_spill] sm:$0xff]  ;;  %v2888_v0 = vmul.f32 %v7861_v7, %v7734_v49 }
 0x3af   : > { %3875 = vperm.xlu1 %4474, %v2953_v5   ;;  %v3696_v9 = vpop.permute.xlu1 %3695  ;;  %v2873_v5 = vmul.f32 %v7578_v34, %v9454_v15  ;;  %v2968_v27 = vsub.f32 %v2716_v30, %v2884_v23  ;;  %v9455_v14 = vld [vmem:[#allocation127_spill] sm:$0xff] }
 0x3b0   : > { %v4035_v26 = vadd.f32 %v3696_v9, %v3447_v13  ;;  %v4036_v52 = vadd.f32 %v3696_v9, %v3448_v16  ;;  %v2875_v13 = vmul.f32 %v7644_v36, %v7470_v32  ;;  %v9456_v9 = vld [vmem:[#allocation129_spill] sm:$0xff]  ;;  %v2877_v32 = vmul.f32 %v7692_v55, %v7525_v10  ;;  %v9457_v36 = vld [vmem:[#allocation126_spill] sm:$0xff]  ;;  %v9460_v7 = vld [vmem:[#allocation159_spill] sm:$0xff] }
 0x3b1   : > { %v3721_v11 = vpop.permute.xlu0 %3720  ;;  %v2957_v34 = vsub.f32 %v2705_v48, %v2873_v5  ;;  %v2972_v30 = vsub.f32 %v2720_v19, %v2888_v0  ;;  %v2890_v10 = vmul.f32 %v7886_v60, %v7771_v57  ;;  %v9461_v55 = vld [vmem:[#allocation154_spill] sm:$0xff]  ;;  %v9462_v5 = vld [vmem:[#allocation156_spill] sm:$0xff] }
 0x3b2   : > { %4203 = vst [vmem:[%s7494_s7 + $0x1a0] sm:$0xff] %v4035_v26  ;;  %4204 = vst.msk [vmem:[%s7494_s7 + $0x1a8] sm:$0xff] %vm1124_vm1, %v4036_v52  ;;  %v4045_v31 = vadd.f32 %v3721_v11, %v3457_v43  ;;  %v4046_v25 = vadd.f32 %v3721_v11, %v3458_v53  ;;  %3940 = vperm.xlu0 %4473, %v2966_v51   ;;  %v2959_v12 = vsub.f32 %v2707_v18, %v2875_v13  ;;  %v9459_v26 = vld [vmem:[#allocation157_spill] sm:$0xff]  ;;  %v2709_v11 = vld [vmem:[%s7011_s29 + $0x230] sm:$0xff] }
 0x3b3   : > { %3885 = vperm.xlu1 %4474, %v2955_v44   ;;  %v3118_v46 = vpop.permute.xlu1 %3117  ;;  %v2711_v60 = vld [vmem:[%s7011_s29 + $0x240] sm:$0xff] }
 0x3b4   : > { %4213 = vst [vmem:[%s7494_s7 + $0x1f0] sm:$0xff] %v4045_v31  ;;  %4214 = vst.msk [vmem:[%s7494_s7 + $0x1f8] sm:$0xff] %vm1124_vm1, %v4046_v25  ;;  %v3451_v43 = vmul.f32 %v3118_v46, %v9457_v36  ;;  %v3452_v53 = vmul.f32 %v3118_v46, %v9458_v1  ;;  %v9465_v36 = vld [vmem:[#allocation138_spill] sm:$0xff] }
 0x3b5   : > { %v3143_v4 = vpop.permute.xlu0 %3142  ;;  %v9467_v1 = vld [vmem:[#allocation166_spill] sm:$0xff] }
 0x3b6   : > { %3950 = vperm.xlu0 %4473, %v2968_v27   ;;  %v3461_v15 = vmul.f32 %v3143_v4, %v9461_v55  ;;  %v3462_v31 = vmul.f32 %v3143_v4, %v9462_v5  ;;  %v2961_v27 = vsub.f32 %v2709_v11, %v2877_v32  ;;  %v2974_v4 = vsub.f32 %v2722_v47, %v2890_v10  ;;  %v2715_v11 = vld [vmem:[%s7011_s29 + $0x260] sm:$0xff] }
 0x3b7   : > { %3895 = vperm.xlu1 %4474, %v2957_v34   ;;  %v3328_v16 = vpop.permute.xlu1 %3327  ;;  %v2879_v34 = vmul.f32 %v7762_v59, %v7584_v6  ;;  %v2881_v6 = vmul.f32 %v7820_v62, %v7640_v41  ;;  %v2713_v59 = vld [vmem:[%s7011_s29 + $0x250] sm:$0xff]  ;;  %v2883_v32 = vmul.f32 %v7868_v40, %v7702_v21  ;;  %v9470_v21 = vld [vmem:[#allocation163_spill] sm:$0xff] }
 0x3b8   : > { %v8145_v3 = vmul.f32 %v3328_v16, %v9455_v14  ;;  %v8148_v51 = vmul.f32 %v3328_v16, %v9456_v9  ;;  %v9463_v14 = vld [vmem:[#allocation139_spill] sm:$0xff]  ;;  %v9466_v41 = vld [vmem:[#allocation140_spill] sm:$0xff] }
 0x3b9   : > { %v3353_v23 = vpop.permute.xlu0 %3352  ;;  %v2963_v16 = vsub.f32 %v2711_v60, %v2879_v34  ;;  %v2719_v60 = vld [vmem:[%s7011_s29 + $0x280] sm:$0xff] }
 0x3ba   : > { %v8156_v49 = vmul.f32 %v3353_v23, %v9459_v26  ;;  %v8159_v52 = vmul.f32 %v3353_v23, %v9460_v7  ;;  %3960 = vperm.xlu0 %4473, %v2970_v28   ;;  %v9464_v28 = vld [vmem:[#allocation141_spill] sm:$0xff]  ;;  %v9468_v26 = vld [vmem:[#allocation167_spill] sm:$0xff] }
 0x3bb   : > { %3905 = vperm.xlu1 %4474, %v2959_v12   ;;  %v3706_v44 = vpop.permute.xlu1 %3705  ;;  %v2965_v12 = vsub.f32 %v2713_v59, %v2881_v6  ;;  %v9473_v59 = vld [vmem:[#allocation22_spill] sm:$0xff] }
 0x3bc   : > { %v4039_v25 = vadd.f32 %v3706_v44, %v3451_v43  ;;  %v4040_v48 = vadd.f32 %v3706_v44, %v3452_v53 }
 0x3bd   : > { %v3731_v46 = vpop.permute.xlu0 %3730 }
 0x3be   : > { %4207 = vst [vmem:[%s7494_s7 + $0x1c0] sm:$0xff] %v4039_v25  ;;  %4208 = vst.msk [vmem:[%s7494_s7 + $0x1c8] sm:$0xff] %vm1124_vm1, %v4040_v48  ;;  %v4049_v37 = vadd.f32 %v3731_v46, %v3461_v15  ;;  %v4050_v57 = vadd.f32 %v3731_v46, %v3462_v31  ;;  %3970 = vperm.xlu0 %4473, %v2972_v30   ;;  %v9469_v30 = vld [vmem:[#allocation162_spill] sm:$0xff]  ;;  %v2967_v31 = vsub.f32 %v2715_v11, %v2883_v32  ;;  %v9477_v32 = vld [vmem:[#allocation185_spill] sm:$0xff] }
 0x3bf   : > { %3915 = vperm.xlu1 %4474, %v2961_v27   ;;  %v3128_v13 = vpop.permute.xlu1 %3127  ;;  %v2885_v25 = vmul.f32 %v7903_v42, %v7786_v35  ;;  %v2717_v27 = vld [vmem:[%s7011_s29 + $0x270] sm:$0xff]  ;;  %v9471_v42 = vld [vmem:[#allocation153_spill] sm:$0xff] }
 0x3c0   : > { %4217 = vst [vmem:[%s7494_s7 + $0x210] sm:$0xff] %v4049_v37  ;;  %4218 = vst.msk [vmem:[%s7494_s7 + $0x218] sm:$0xff] %vm1124_vm1, %v4050_v57  ;;  %v3455_v43 = vmul.f32 %v3128_v13, %v9465_v36  ;;  %v3456_v62 = vmul.f32 %v3128_v13, %v9466_v41  ;;  %v2887_v57 = vmul.f32 %v7922_v2, %v7816_v54  ;;  %v9476_v2 = vld [vmem:[#allocation182_spill] sm:$0xff] }
 0x3c1   : > { %v3153_v18 = vpop.permute.xlu0 %3152  ;;  %v2969_v37 = vsub.f32 %v2717_v27, %v2885_v25 }
 0x3c2   : > { %3980 = vperm.xlu0 %4473, %v2974_v4   ;;  %v3465_v10 = vmul.f32 %v3153_v18, %v9469_v30  ;;  %v3466_v40 = vmul.f32 %v3153_v18, %v9470_v21  ;;  %v9472_v4 = vld [vmem:[#allocation155_spill] sm:$0xff]  ;;  %v2971_v6 = vsub.f32 %v2719_v60, %v2887_v57  ;;  %v9478_v30 = vld [vmem:[#allocation208_spill] sm:$0xff]  ;;  %v9479_v21 = vld [vmem:[#allocation209_spill] sm:$0xff] }
 0x3c3   : > { %3925 = vperm.xlu1 %4474, %v2963_v16   ;;  %v3338_v0 = vpop.permute.xlu1 %3337 }
 0x3c4   : > { %v8180_v9 = vmul.f32 %v3338_v0, %v9463_v14  ;;  %v8183_v19 = vmul.f32 %v3338_v0, %v9464_v28  ;;  %v2889_v0 = vmul.f32 %v7941_v50, %v9473_v59  ;;  %v9474_v14 = vld [vmem:[#allocation151_spill] sm:$0xff] }
 0x3c5   : > { %v3363_v23 = vpop.permute.xlu0 %3362 }
 0x3c6   : > { %v8190_v53 = vmul.f32 %v3363_v23, %v9467_v1  ;;  %v8193_v7 = vmul.f32 %v3363_v23, %v9468_v26  ;;  %v9475_v23 = vld [vmem:[#allocation152_spill] sm:$0xff] }
 0x3c7   : > { %3935 = vperm.xlu1 %4474, %v2965_v12   ;;  %v3716_v44 = vpop.permute.xlu1 %3715 }
 0x3c8   : > { %v4043_v55 = vadd.f32 %v3716_v44, %v3455_v43  ;;  %v4044_v15 = vadd.f32 %v3716_v44, %v3456_v62  ;;  %v2721_v43 = vld [vmem:[%s7011_s29 + $0x290] sm:$0xff] }
 0x3c9   : > { %v3741_v5 = vpop.permute.xlu0 %3740  ;;  %v2973_v11 = vsub.f32 %v2721_v43, %v2889_v0 }
 0x3ca   : > { %4211 = vst [vmem:[%s7494_s7 + $0x1e0] sm:$0xff] %v4043_v55  ;;  %4212 = vst.msk [vmem:[%s7494_s7 + $0x1e8] sm:$0xff] %vm1124_vm1, %v4044_v15  ;;  %v4053_v48 = vadd.f32 %v3741_v5, %v3465_v10  ;;  %v4054_v46 = vadd.f32 %v3741_v5, %v3466_v40  ;;  %v9480_v15 = vld [vmem:[#allocation164_spill] sm:$0xff] }
 0x3cb   : > { %3945 = vperm.xlu1 %4474, %v2967_v31   ;;  %v3138_v47 = vpop.permute.xlu1 %3137  ;;  %v9481_v31 = vld [vmem:[#allocation165_spill] sm:$0xff] }
 0x3cc   : > { %4221 = vst [vmem:[%s7494_s7 + $0x230] sm:$0xff] %v4053_v48  ;;  %4222 = vst.msk [vmem:[%s7494_s7 + $0x238] sm:$0xff] %vm1124_vm1, %v4054_v46  ;;  %v3459_v28 = vmul.f32 %v3138_v47, %v9474_v14  ;;  %v3460_v54 = vmul.f32 %v3138_v47, %v9475_v23  ;;  %v9482_v46 = vld [vmem:[#allocation160_spill] sm:$0xff]  ;;  %v9483_v47 = vld [vmem:[#allocation161_spill] sm:$0xff] }
 0x3cd   : > { %v3163_v34 = vpop.permute.xlu0 %3162  ;;  %v9486_v14 = vld [vmem:[#allocation177_spill] sm:$0xff]  ;;  %v9487_v23 = vld [vmem:[#allocation179_spill] sm:$0xff] }
 0x3cf   : > { %3955 = vperm.xlu1 %4474, %v2969_v37   ;;  %v3348_v35 = vpop.permute.xlu1 %3347 }
 0x3d0   : > { %v8211_v13 = vmul.f32 %v3348_v35, %v9471_v42  ;;  %v8214_v18 = vmul.f32 %v3348_v35, %v9472_v4  ;;  %v9484_v4 = vld [vmem:[#allocation101_spill] sm:$0xff] }
 0x3d1   : > { %v3373_v16 = vpop.permute.xlu0 %3372 }
 0x3d2   : > { %v8221_v12 = vmul.f32 %v3373_v16, %v9476_v2  ;;  %v8224_v36 = vmul.f32 %v3373_v16, %v9477_v32 }
 0x3d3   : > { %3965 = vperm.xlu1 %4474, %v2971_v6   ;;  %v3726_v41 = vpop.permute.xlu1 %3725  ;;  %v9485_v6 = vld [vmem:[#allocation224_spill] sm:$0xff] }
 0x3d4   : > { %v4047_v62 = vadd.f32 %v3726_v41, %v3459_v28  ;;  %v4048_v1 = vadd.f32 %v3726_v41, %v3460_v54  ;;  %v3469_v28 = vmul.f32 %v3163_v34, %v9486_v14  ;;  %v3470_v54 = vmul.f32 %v3163_v34, %v9487_v23 }
 0x3d5   : > { %v3173_v26 = vpop.permute.xlu0 %3172 }
 0x3d6   : > { %4215 = vst [vmem:[%s7494_s7 + $0x200] sm:$0xff] %v4047_v62  ;;  %4216 = vst.msk [vmem:[%s7494_s7 + $0x208] sm:$0xff] %vm1124_vm1, %v4048_v1  ;;  %v9488_v62 = vld [vmem:[#allocation200_spill] sm:$0xff] }
 0x3d7   : > { %3975 = vperm.xlu1 %4474, %v2973_v11   ;;  %v3148_v50 = vpop.permute.xlu1 %3147  ;;  %v3473_v1 = vmul.f32 %v3173_v26, %v9488_v62  ;;  %v9489_v11 = vld [vmem:[#allocation203_spill] sm:$0xff] }
 0x3d8   : > { %v3463_v27 = vmul.f32 %v3148_v50, %v9482_v46  ;;  %v3464_v37 = vmul.f32 %v3148_v50, %v9483_v47  ;;  %v3474_v50 = vmul.f32 %v3173_v26, %v9489_v11  ;;  %v9499_v11 = vld [vmem:[#allocation15_spill] sm:$0xff] }
 0x3d9   : > { %v3383_v44 = vpop.permute.xlu0 %3382 }
 0x3da   : > { %v8231_v10 = vmul.f32 %v3383_v44, %v9478_v30  ;;  %v8234_v40 = vmul.f32 %v3383_v44, %v9479_v21  ;;  %v9490_v44 = vld [vmem:[#allocation180_spill] sm:$0xff]  ;;  %v9491_v21 = vld [vmem:[#allocation181_spill] sm:$0xff] }
 0x3db   : > { %v3358_v55 = vpop.permute.xlu1 %3357 }
 0x3dc   : > { %v8237_v5 = vmul.f32 %v3358_v55, %v9480_v15  ;;  %v8240_v25 = vmul.f32 %v3358_v55, %v9481_v31 }
 0x3dd   : > { %v3183_v48 = vpop.permute.xlu0 %3182 }
 0x3df   : > { %v3736_v57 = vpop.permute.xlu1 %3735 }
 0x3e0   : > { %v4051_v60 = vadd.f32 %v3736_v57, %v3463_v27  ;;  %v4052_v35 = vadd.f32 %v3736_v57, %v3464_v37  ;;  %v9492_v27 = vld [vmem:[#allocation217_spill] sm:$0xff]  ;;  %v9493_v37 = vld [vmem:[#allocation219_spill] sm:$0xff] }
 0x3e1   : > { %v3393_v42 = vpop.permute.xlu0 %3392  ;;  %v3477_v47 = vmul.f32 %v3183_v48, %v9492_v27  ;;  %v3478_v57 = vmul.f32 %v3183_v48, %v9493_v37  ;;  %v9502_v37 = vld [vmem:[#allocation23_spill] sm:$0xff] }
 0x3e2   : > { %4219 = vst [vmem:[%s7494_s7 + $0x220] sm:$0xff] %v4051_v60  ;;  %4220 = vst.msk [vmem:[%s7494_s7 + $0x228] sm:$0xff] %vm1124_vm1, %v4052_v35  ;;  %v8248_v16 = vmul.f32 %v3393_v42, %v9484_v4  ;;  %v8251_v59 = vmul.f32 %v3393_v42, %v9485_v6  ;;  %v9494_v4 = vld [vmem:[#allocation7_spill] sm:$0xff]  ;;  %v9495_v6 = vld [vmem:[#allocation237_spill] sm:$0xff] }
 0x3e3   : > { %v3158_v0 = vpop.permute.xlu1 %3157  ;;  %v3481_v14 = vmul.f32 %v9495_v6, %v9494_v4 }
 0x3e5   : > { %v3751_v2 = vpop.permute.xlu0 %3750 }
 0x3e6   : > { %v4057_v32 = vadd.f32 %v3751_v2, %v3469_v28  ;;  %v4058_v43 = vadd.f32 %v3751_v2, %v3470_v54  ;;  %v9496_v28 = vld [vmem:[#allocation9_spill] sm:$0xff]  ;;  %v9498_v2 = vld [vmem:[#allocation207_spill] sm:$0xff] }
 0x3e7   : > { %v3368_v41 = vpop.permute.xlu1 %3367  ;;  %v3482_v23 = vmul.f32 %v9495_v6, %v9496_v28  ;;  %v9497_v54 = vld [vmem:[#allocation205_spill] sm:$0xff]  ;;  %v9506_v6 = vld [vmem:[#allocation223_spill] sm:$0xff] }
 0x3e8   : > { %4225 = vst [vmem:[%s7494_s7 + $0x250] sm:$0xff] %v4057_v32  ;;  %4226 = vst.msk [vmem:[%s7494_s7 + $0x258] sm:$0xff] %vm1124_vm1, %v4058_v43  ;;  %v8261_v30 = vmul.f32 %v3368_v41, %v9490_v44  ;;  %v8264_v55 = vmul.f32 %v3368_v41, %v9491_v21  ;;  %v9501_v21 = vld [vmem:[#allocation17_spill] sm:$0xff] }
 0x3e9   : > { %v3761_v34 = vpop.permute.xlu0 %3760 }
 0x3ea   : > { %v4061_v15 = vadd.f32 %v3761_v34, %v3473_v1  ;;  %v4062_v31 = vadd.f32 %v3761_v34, %v3474_v50  ;;  %v9500_v50 = vld [vmem:[#allocation218_spill] sm:$0xff] }
 0x3eb   : > { %v3168_v46 = vpop.permute.xlu1 %3167  ;;  %v3485_v44 = vmul.f32 %v9500_v50, %v9499_v11  ;;  %v3486_v34 = vmul.f32 %v9500_v50, %v9501_v21  ;;  %v9509_v50 = vld [vmem:[#allocation31_spill] sm:$0xff] }
 0x3ec   : > { %4229 = vst [vmem:[%s7494_s7 + $0x270] sm:$0xff] %v4061_v15  ;;  %4230 = vst.msk [vmem:[%s7494_s7 + $0x278] sm:$0xff] %vm1124_vm1, %v4062_v31 }
 0x3ed   : > { %v3771_v26 = vpop.permute.xlu0 %3770 }
 0x3ee   : > { %v4065_v60 = vadd.f32 %v3771_v26, %v3477_v47  ;;  %v4066_v35 = vadd.f32 %v3771_v26, %v3478_v57  ;;  %v9503_v57 = vld [vmem:[#allocation4_spill] sm:$0xff] }
 0x3ef   : > { %v3378_v42 = vpop.permute.xlu1 %3377  ;;  %v3489_v26 = vmul.f32 %v9503_v57, %v9502_v37  ;;  %v9512_v37 = vld [vmem:[#allocation195_spill] sm:$0xff] }
 0x3f0   : > { %4233 = vst [vmem:[%s7494_s7 + $0x290] sm:$0xff] %v4065_v60  ;;  %4234 = vst.msk [vmem:[%s7494_s7 + $0x298] sm:$0xff] %vm1124_vm1, %v4066_v35  ;;  %v8279_v48 = vmul.f32 %v3378_v42, %v9497_v54  ;;  %v8282_v32 = vmul.f32 %v3378_v42, %v9498_v2  ;;  %v9504_v60 = vld [vmem:[#allocation25_spill] sm:$0xff]  ;;  %v9505_v42 = vld [vmem:[#allocation100_spill] sm:$0xff] }
 0x3f1   : > { %v3781_v43 = vpop.permute.xlu0 %3780  ;;  %v3490_v35 = vmul.f32 %v9503_v57, %v9504_v60  ;;  %v9508_v2 = vld [vmem:[#allocation176_spill] sm:$0xff]  ;;  %v3471_v57 = vmul.f32 %v3168_v46, %v9512_v37  ;;  %v9521_v37 = vld [vmem:[#allocation49_spill] sm:$0xff] }
 0x3f2   : > { %v4069_v41 = vadd.f32 %v3781_v43, %v3481_v14  ;;  %v4070_v62 = vadd.f32 %v3781_v43, %v3482_v23  ;;  %v9507_v23 = vld [vmem:[#allocation175_spill] sm:$0xff]  ;;  %v3468_v43 = vmul.f32 %v3158_v0, %v9508_v2  ;;  %v9516_v2 = vld [vmem:[#allocation41_spill] sm:$0xff] }
 0x3f3   : > { %v3178_v1 = vpop.permute.xlu1 %3177  ;;  %v3467_v54 = vmul.f32 %v3158_v0, %v9507_v23  ;;  %v9513_v0 = vld [vmem:[#allocation197_spill] sm:$0xff] }
 0x3f4   : > { %4237 = vst [vmem:[%s7494_s7 + $0x2b0] sm:$0xff] %v4069_v41  ;;  %4238 = vst.msk [vmem:[%s7494_s7 + $0x2b8] sm:$0xff] %vm1124_vm1, %v4070_v62 }
 0x3f5   : > { %v3791_v15 = vpop.permute.xlu0 %3790 }
 0x3f6   : > { %v4073_v31 = vadd.f32 %v3791_v15, %v3485_v44  ;;  %v4074_v27 = vadd.f32 %v3791_v15, %v3486_v34  ;;  %v9510_v44 = vld [vmem:[#allocation6_spill] sm:$0xff]  ;;  %v9511_v34 = vld [vmem:[#allocation33_spill] sm:$0xff] }
 0x3f7   : > { %v3388_v47 = vpop.permute.xlu1 %3387  ;;  %v3493_v21 = vmul.f32 %v9510_v44, %v9509_v50  ;;  %v3494_v15 = vmul.f32 %v9510_v44, %v9511_v34  ;;  %v9518_v50 = vld [vmem:[#allocation212_spill] sm:$0xff] }
 0x3f8   : > { %4241 = vst [vmem:[%s7494_s7 + $0x2d0] sm:$0xff] %v4073_v31  ;;  %4242 = vst.msk [vmem:[%s7494_s7 + $0x2d8] sm:$0xff] %vm1124_vm1, %v4074_v27  ;;  %v8299_v4 = vmul.f32 %v3388_v47, %v9505_v42  ;;  %v8302_v14 = vmul.f32 %v3388_v47, %v9506_v6  ;;  %v9514_v6 = vld [vmem:[#allocation39_spill] sm:$0xff]  ;;  %v3476_v44 = vmul.f32 %v3178_v1, %v9518_v50 }
 0x3f9   : > { %v3801_v28 = vpop.permute.xlu0 %3800 }
 0x3fa   : > { %v4077_v41 = vadd.f32 %v3801_v28, %v3489_v26  ;;  %v4078_v62 = vadd.f32 %v3801_v28, %v3490_v35  ;;  %v3472_v26 = vmul.f32 %v3168_v46, %v9513_v0  ;;  %v9515_v28 = vld [vmem:[#allocation14_spill] sm:$0xff] }
 0x3fb   : > { %v3746_v11 = vpop.permute.xlu1 %3745  ;;  %v3497_v23 = vmul.f32 %v9515_v28, %v9514_v6  ;;  %v9524_v6 = vld [vmem:[#allocation5_spill] sm:$0xff] }
 0x3fc   : > { %4245 = vst [vmem:[%s7494_s7 + $0x2f0] sm:$0xff] %v4077_v41  ;;  %4246 = vst.msk [vmem:[%s7494_s7 + $0x2f8] sm:$0xff] %vm1124_vm1, %v4078_v62  ;;  %v4055_v31 = vadd.f32 %v3746_v11, %v3467_v54  ;;  %v4056_v27 = vadd.f32 %v3746_v11, %v3468_v43  ;;  %v3498_v54 = vmul.f32 %v9515_v28, %v9516_v2  ;;  %v9517_v62 = vld [vmem:[#allocation211_spill] sm:$0xff] }
 0x3fd   : > { %v3811_v47 = vpop.permute.xlu0 %3810  ;;  %v3475_v11 = vmul.f32 %v3178_v1, %v9517_v62  ;;  %v9527_v62 = vld [vmem:[#allocation57_spill] sm:$0xff] }
 0x3fe   : > { %4223 = vst [vmem:[%s7494_s7 + $0x240] sm:$0xff] %v4055_v31  ;;  %4224 = vst.msk [vmem:[%s7494_s7 + $0x248] sm:$0xff] %vm1124_vm1, %v4056_v27  ;;  %v4081_v60 = vadd.f32 %v3811_v47, %v3493_v21  ;;  %v4082_v35 = vadd.f32 %v3811_v47, %v3494_v15  ;;  %v9519_v31 = vld [vmem:[#allocation47_spill] sm:$0xff]  ;;  %v9520_v27 = vld [vmem:[#allocation10_spill] sm:$0xff] }
 0x3ff   : > { %v3756_v42 = vpop.permute.xlu1 %3755  ;;  %v3501_v47 = vmul.f32 %v9520_v27, %v9519_v31 }
 0x400   : > { %4249 = vst [vmem:[%s7494_s7 + $0x310] sm:$0xff] %v4081_v60  ;;  %4250 = vst.msk [vmem:[%s7494_s7 + $0x318] sm:$0xff] %vm1124_vm1, %v4082_v35  ;;  %v4059_v43 = vadd.f32 %v3756_v42, %v3471_v57  ;;  %v4060_v46 = vadd.f32 %v3756_v42, %v3472_v26  ;;  %v3502_v57 = vmul.f32 %v9520_v27, %v9521_v37  ;;  %v9522_v60 = vld [vmem:[#allocation3_spill] sm:$0xff]  ;;  %v9523_v35 = vld [vmem:[#allocation202_spill] sm:$0xff] }
 0x401   : > { %v3821_v41 = vpop.permute.xlu0 %3820  ;;  %v3479_v42 = vmul.f32 %v9523_v35, %v9522_v60  ;;  %v3480_v28 = vmul.f32 %v9523_v35, %v9524_v6  ;;  %v9530_v27 = vld [vmem:[#allocation13_spill] sm:$0xff] }
 0x402   : > { %4227 = vst [vmem:[%s7494_s7 + $0x260] sm:$0xff] %v4059_v43  ;;  %4228 = vst.msk [vmem:[%s7494_s7 + $0x268] sm:$0xff] %vm1124_vm1, %v4060_v46  ;;  %v4085_v21 = vadd.f32 %v3821_v41, %v3497_v23  ;;  %v4086_v34 = vadd.f32 %v3821_v41, %v3498_v54  ;;  %v9525_v43 = vld [vmem:[#allocation55_spill] sm:$0xff]  ;;  %v9526_v46 = vld [vmem:[#allocation221_spill] sm:$0xff] }
 0x403   : > { %v3766_v15 = vpop.permute.xlu1 %3765  ;;  %v3505_v41 = vmul.f32 %v9526_v46, %v9525_v43  ;;  %v9533_v35 = vld [vmem:[#allocation65_spill] sm:$0xff] }
 0x404   : > { %4253 = vst [vmem:[%s7494_s7 + $0x330] sm:$0xff] %v4085_v21  ;;  %4254 = vst.msk [vmem:[%s7494_s7 + $0x338] sm:$0xff] %vm1124_vm1, %v4086_v34  ;;  %v4063_v0 = vadd.f32 %v3766_v15, %v3475_v11  ;;  %v4064_v1 = vadd.f32 %v3766_v15, %v3476_v44  ;;  %v3506_v11 = vmul.f32 %v9526_v46, %v9527_v62  ;;  %v9528_v34 = vld [vmem:[#allocation11_spill] sm:$0xff]  ;;  %v9529_v15 = vld [vmem:[#allocation2_spill] sm:$0xff] }
 0x405   : > { %v3831_v26 = vpop.permute.xlu0 %3830  ;;  %v3483_v31 = vmul.f32 %v9529_v15, %v9528_v34  ;;  %v9536_v46 = vld [vmem:[#allocation21_spill] sm:$0xff] }
 0x406   : > { %4231 = vst [vmem:[%s7494_s7 + $0x280] sm:$0xff] %v4063_v0  ;;  %4232 = vst.msk [vmem:[%s7494_s7 + $0x288] sm:$0xff] %vm1124_vm1, %v4064_v1  ;;  %v4089_v23 = vadd.f32 %v3831_v26, %v3501_v47  ;;  %v4090_v2 = vadd.f32 %v3831_v26, %v3502_v57  ;;  %v3484_v47 = vmul.f32 %v9529_v15, %v9530_v27  ;;  %v9531_v1 = vld [vmem:[#allocation63_spill] sm:$0xff]  ;;  %v9539_v15 = vld [vmem:[#allocation73_spill] sm:$0xff] }
 0x407   : > { %v3776_v54 = vpop.permute.xlu1 %3775  ;;  %v9532_v26 = vld [vmem:[#allocation123_spill] sm:$0xff] }
 0x408   : > { %4257 = vst [vmem:[%s7494_s7 + $0x350] sm:$0xff] %v4089_v23  ;;  %4258 = vst.msk [vmem:[%s7494_s7 + $0x358] sm:$0xff] %vm1124_vm1, %v4090_v2  ;;  %v4067_v50 = vadd.f32 %v3776_v54, %v3479_v42  ;;  %v4068_v44 = vadd.f32 %v3776_v54, %v3480_v28  ;;  %v3509_v60 = vmul.f32 %v9532_v26, %v9531_v1  ;;  %v9534_v2 = vld [vmem:[#allocation19_spill] sm:$0xff]  ;;  %v9535_v54 = vld [vmem:[#allocation8_spill] sm:$0xff] }
 0x409   : > { %v3841_v21 = vpop.permute.xlu0 %3840  ;;  %v3510_v42 = vmul.f32 %v9532_v26, %v9533_v35  ;;  %v3487_v43 = vmul.f32 %v9535_v54, %v9534_v2  ;;  %v9542_v26 = vld [vmem:[#allocation29_spill] sm:$0xff] }
 0x40a   : > { %4235 = vst [vmem:[%s7494_s7 + $0x2a0] sm:$0xff] %v4067_v50  ;;  %4236 = vst.msk [vmem:[%s7494_s7 + $0x2a8] sm:$0xff] %vm1124_vm1, %v4068_v44  ;;  %v4093_v37 = vadd.f32 %v3841_v21, %v3505_v41  ;;  %v4094_v57 = vadd.f32 %v3841_v21, %v3506_v11  ;;  %v3488_v41 = vmul.f32 %v9535_v54, %v9536_v46  ;;  %v9537_v44 = vld [vmem:[#allocation71_spill] sm:$0xff]  ;;  %v9538_v21 = vld [vmem:[#allocation18_spill] sm:$0xff] }
 0x40b   : > { %v3786_v0 = vpop.permute.xlu1 %3785  ;;  %v3513_v34 = vmul.f32 %v9538_v21, %v9537_v44  ;;  %v9544_v2 = vld [vmem:[#allocation81_spill] sm:$0xff] }
 0x40c   : > { %4261 = vst [vmem:[%s7494_s7 + $0x370] sm:$0xff] %v4093_v37  ;;  %4262 = vst.msk [vmem:[%s7494_s7 + $0x378] sm:$0xff] %vm1124_vm1, %v4094_v57  ;;  %v4071_v6 = vadd.f32 %v3786_v0, %v3483_v31  ;;  %v4072_v28 = vadd.f32 %v3786_v0, %v3484_v47  ;;  %v3514_v31 = vmul.f32 %v9538_v21, %v9539_v15  ;;  %v9540_v57 = vld [vmem:[#allocation27_spill] sm:$0xff]  ;;  %v9541_v0 = vld [vmem:[#allocation16_spill] sm:$0xff] }
 0x40d   : > { %v3851_v23 = vpop.permute.xlu0 %3850  ;;  %v3491_v1 = vmul.f32 %v9541_v0, %v9540_v57  ;;  %v3518_v54 = vmul.f32 %v7901_v38, %v9544_v2  ;;  %v9547_v44 = vld [vmem:[#allocation37_spill] sm:$0xff]  ;;  %v9553_v2 = vld [vmem:[#allocation95_spill] sm:$0xff] }
 0x40e   : > { %4239 = vst [vmem:[%s7494_s7 + $0x2c0] sm:$0xff] %v4071_v6  ;;  %4240 = vst.msk [vmem:[%s7494_s7 + $0x2c8] sm:$0xff] %vm1124_vm1, %v4072_v28  ;;  %v4097_v62 = vadd.f32 %v3851_v23, %v3509_v60  ;;  %v4098_v11 = vadd.f32 %v3851_v23, %v3510_v42  ;;  %v3492_v60 = vmul.f32 %v9541_v0, %v9542_v26  ;;  %v9543_v28 = vld [vmem:[#allocation79_spill] sm:$0xff] }
 0x40f   : > { %v3796_v50 = vpop.permute.xlu1 %3795  ;;  %v3517_v23 = vmul.f32 %v7901_v38, %v9543_v28  ;;  %v9550_v26 = vld [vmem:[#allocation43_spill] sm:$0xff] }
 0x410   : > { %4265 = vst [vmem:[%s7494_s7 + $0x390] sm:$0xff] %v4097_v62  ;;  %4266 = vst.msk [vmem:[%s7494_s7 + $0x398] sm:$0xff] %vm1124_vm1, %v4098_v11  ;;  %v4075_v27 = vadd.f32 %v3796_v50, %v3487_v43  ;;  %v4076_v47 = vadd.f32 %v3796_v50, %v3488_v41  ;;  %v9545_v62 = vld [vmem:[#allocation35_spill] sm:$0xff]  ;;  %v9546_v11 = vld [vmem:[#allocation12_spill] sm:$0xff] }
 0x411   : > { %v3861_v37 = vpop.permute.xlu0 %3860  ;;  %v3495_v50 = vmul.f32 %v9546_v11, %v9545_v62  ;;  %v3496_v21 = vmul.f32 %v9546_v11, %v9547_v44  ;;  %v9556_v44 = vld [vmem:[#allocation24_spill] sm:$0xff] }
 0x412   : > { %4243 = vst [vmem:[%s7494_s7 + $0x2e0] sm:$0xff] %v4075_v27  ;;  %4244 = vst.msk [vmem:[%s7494_s7 + $0x2e8] sm:$0xff] %vm1124_vm1, %v4076_v47  ;;  %v4101_v35 = vadd.f32 %v3861_v37, %v3513_v34  ;;  %v4102_v42 = vadd.f32 %v3861_v37, %v3514_v31  ;;  %v9548_v31 = vld [vmem:[#allocation87_spill] sm:$0xff]  ;;  %v9549_v47 = vld [vmem:[#allocation89_spill] sm:$0xff] }
 0x413   : > { %v3806_v6 = vpop.permute.xlu1 %3805  ;;  %v3521_v27 = vmul.f32 %v7932_v17, %v9548_v31  ;;  %v3522_v37 = vmul.f32 %v7932_v17, %v9549_v47 }
 0x414   : > { %4269 = vst [vmem:[%s7494_s7 + $0x3b0] sm:$0xff] %v4101_v35  ;;  %4270 = vst.msk [vmem:[%s7494_s7 + $0x3b8] sm:$0xff] %vm1124_vm1, %v4102_v42  ;;  %v4079_v43 = vadd.f32 %v3806_v6, %v3491_v1  ;;  %v4080_v46 = vadd.f32 %v3806_v6, %v3492_v60  ;;  %v9551_v60 = vld [vmem:[#allocation227_spill] sm:$0xff]  ;;  %v9552_v42 = vld [vmem:[#allocation45_spill] sm:$0xff] }
 0x415   : > { %v3871_v41 = vpop.permute.xlu0 %3870  ;;  %v3499_v35 = vmul.f32 %v9551_v60, %v9550_v26  ;;  %v3500_v6 = vmul.f32 %v9551_v60, %v9552_v42 }
 0x416   : > { %4247 = vst [vmem:[%s7494_s7 + $0x300] sm:$0xff] %v4079_v43  ;;  %4248 = vst.msk [vmem:[%s7494_s7 + $0x308] sm:$0xff] %vm1124_vm1, %v4080_v46  ;;  %v4105_v34 = vadd.f32 %v3871_v41, %v3517_v23  ;;  %v4106_v38 = vadd.f32 %v3871_v41, %v3518_v54  ;;  %v3525_v54 = vmul.f32 %v7964_v56, %v9553_v2  ;;  %v9554_v43 = vld [vmem:[#allocation97_spill] sm:$0xff]  ;;  %v9561_v2 = vld [vmem:[#allocation20_spill] sm:$0xff] }
 0x417   : > { %v3816_v15 = vpop.permute.xlu1 %3815  ;;  %v3526_v46 = vmul.f32 %v7964_v56, %v9554_v43 }
 0x418   : > { %4273 = vst [vmem:[%s7494_s7 + $0x3d0] sm:$0xff] %v4105_v34  ;;  %4274 = vst.msk [vmem:[%s7494_s7 + $0x3d8] sm:$0xff] %vm1124_vm1, %v4106_v38  ;;  %v4083_v57 = vadd.f32 %v3816_v15, %v3495_v50  ;;  %v4084_v0 = vadd.f32 %v3816_v15, %v3496_v21  ;;  %v9555_v50 = vld [vmem:[#allocation51_spill] sm:$0xff]  ;;  %v9557_v34 = vld [vmem:[#allocation53_spill] sm:$0xff] }
 0x419   : > { %v3881_v1 = vpop.permute.xlu0 %3880  ;;  %v3503_v21 = vmul.f32 %v9556_v44, %v9555_v50  ;;  %v3504_v38 = vmul.f32 %v9556_v44, %v9557_v34  ;;  %v9566_v34 = vld [vmem:[#allocation136_spill] sm:$0xff] }
 0x41a   : > { %4251 = vst [vmem:[%s7494_s7 + $0x320] sm:$0xff] %v4083_v57  ;;  %4252 = vst.msk [vmem:[%s7494_s7 + $0x328] sm:$0xff] %vm1124_vm1, %v4084_v0  ;;  %v4109_v28 = vadd.f32 %v3881_v1, %v3521_v27  ;;  %v4110_v17 = vadd.f32 %v3881_v1, %v3522_v37  ;;  %v9558_v57 = vld [vmem:[#allocation59_spill] sm:$0xff]  ;;  %v9559_v1 = vld [vmem:[#allocation61_spill] sm:$0xff] }
 0x41b   : > { %v3826_v23 = vpop.permute.xlu1 %3825  ;;  %v3507_v0 = vmul.f32 %v7896_v24, %v9558_v57  ;;  %v3508_v26 = vmul.f32 %v7896_v24, %v9559_v1  ;;  %v9568_v1 = vld [vmem:[#allocation83_spill] sm:$0xff] }
 0x41c   : > { %4277 = vst [vmem:[%s7494_s7 + $0x3f0] sm:$0xff] %v4109_v28  ;;  %4278 = vst.msk [vmem:[%s7494_s7 + $0x3f8] sm:$0xff] %vm1124_vm1, %v4110_v17  ;;  %v4087_v41 = vadd.f32 %v3826_v23, %v3499_v35  ;;  %v4088_v62 = vadd.f32 %v3826_v23, %v3500_v6  ;;  %v9560_v23 = vld [vmem:[#allocation67_spill] sm:$0xff] }
 0x41d   : > { %v3891_v11 = vpop.permute.xlu0 %3890  ;;  %v3511_v24 = vmul.f32 %v9561_v2, %v9560_v23 }
 0x41e   : > { %4255 = vst [vmem:[%s7494_s7 + $0x340] sm:$0xff] %v4087_v41  ;;  %4256 = vst.msk [vmem:[%s7494_s7 + $0x348] sm:$0xff] %vm1124_vm1, %v4088_v62  ;;  %v4113_v15 = vadd.f32 %v3891_v11, %v3525_v54  ;;  %v4114_v56 = vadd.f32 %v3891_v11, %v3526_v46  ;;  %v9562_v54 = vld [vmem:[#allocation69_spill] sm:$0xff]  ;;  %v9564_v46 = vld [vmem:[#allocation134_spill] sm:$0xff] }
 0x41f   : > { %v3836_v31 = vpop.permute.xlu1 %3835  ;;  %v3512_v43 = vmul.f32 %v9561_v2, %v9562_v54  ;;  %v9571_v2 = vld [vmem:[#allocation91_spill] sm:$0xff] }
 0x420   : > { %4281 = vst [vmem:[%s7494_s7 + $0x410] sm:$0xff] %v4113_v15  ;;  %4282 = vst.msk [vmem:[%s7494_s7 + $0x418] sm:$0xff] %vm1124_vm1, %v4114_v56  ;;  %v4091_v27 = vadd.f32 %v3836_v31, %v3503_v21  ;;  %v4092_v47 = vadd.f32 %v3836_v31, %v3504_v38  ;;  %v9565_v21 = vld [vmem:[#allocation75_spill] sm:$0xff]  ;;  %v9567_v15 = vld [vmem:[#allocation77_spill] sm:$0xff] }
 0x421   : > { %v3901_v37 = vpop.permute.xlu0 %3900  ;;  %v3515_v38 = vmul.f32 %v9566_v34, %v9565_v21  ;;  %v3516_v56 = vmul.f32 %v9566_v34, %v9567_v15 }
 0x422   : > { %4259 = vst [vmem:[%s7494_s7 + $0x360] sm:$0xff] %v4091_v27  ;;  %4260 = vst.msk [vmem:[%s7494_s7 + $0x368] sm:$0xff] %vm1124_vm1, %v4092_v47  ;;  %v4117_v60 = vadd.f32 %v3901_v37, %v8000_v39  ;;  %v4118_v35 = vadd.f32 %v3901_v37, %v8003_v63  ;;  %v9563_v39 = vld [vmem:[#allocation233_spill] sm:$0xff] }
 0x423   : > { %v3846_v42 = vpop.permute.xlu1 %3845 }
 0x424   : > { %4285 = vst [vmem:[%s7494_s7 + $0x430] sm:$0xff] %v4117_v60  ;;  %4286 = vst.msk [vmem:[%s7494_s7 + $0x438] sm:$0xff] %vm1124_vm1, %v4118_v35  ;;  %v4095_v6 = vadd.f32 %v3846_v42, %v3507_v0  ;;  %v4096_v28 = vadd.f32 %v3846_v42, %v3508_v26  ;;  %v9569_v26 = vld [vmem:[#allocation38_spill] sm:$0xff]  ;;  %v9570_v35 = vld [vmem:[#allocation85_spill] sm:$0xff] }
 0x425   : > { %v3911_v17 = vpop.permute.xlu0 %3910  ;;  %v3519_v60 = vmul.f32 %v9569_v26, %v9568_v1  ;;  %v3520_v42 = vmul.f32 %v9569_v26, %v9570_v35 }
 0x426   : > { %4263 = vst [vmem:[%s7494_s7 + $0x380] sm:$0xff] %v4095_v6  ;;  %4264 = vst.msk [vmem:[%s7494_s7 + $0x388] sm:$0xff] %vm1124_vm1, %v4096_v28  ;;  %v4121_v63 = vadd.f32 %v3911_v17, %v9563_v39  ;;  %v4122_v41 = vadd.f32 %v3911_v17, %v9564_v46 }
 0x427   : > { %v3856_v62 = vpop.permute.xlu1 %3855 }
 0x428   : > { %4289 = vst [vmem:[%s7494_s7 + $0x450] sm:$0xff] %v4121_v63  ;;  %4290 = vst.msk [vmem:[%s7494_s7 + $0x458] sm:$0xff] %vm1124_vm1, %v4122_v41  ;;  %v4099_v11 = vadd.f32 %v3856_v62, %v3511_v24  ;;  %v4100_v50 = vadd.f32 %v3856_v62, %v3512_v43  ;;  %v9572_v24 = vld [vmem:[#allocation40_spill] sm:$0xff]  ;;  %v9573_v43 = vld [vmem:[#allocation93_spill] sm:$0xff] }
 0x429   : > { %v3921_v44 = vpop.permute.xlu0 %3920  ;;  %v3523_v54 = vmul.f32 %v9572_v24, %v9571_v2  ;;  %v3524_v39 = vmul.f32 %v9572_v24, %v9573_v43 }
 0x42a   : > { %4267 = vst [vmem:[%s7494_s7 + $0x3a0] sm:$0xff] %v4099_v11  ;;  %4268 = vst.msk [vmem:[%s7494_s7 + $0x3a8] sm:$0xff] %vm1124_vm1, %v4100_v50  ;;  %v4125_v31 = vadd.f32 %v3921_v44, %v8076_v22  ;;  %v4126_v27 = vadd.f32 %v3921_v44, %v8079_v58 }
 0x42b   : > { %v3866_v47 = vpop.permute.xlu1 %3865 }
 0x42c   : > { %4293 = vst [vmem:[%s7494_s7 + $0x470] sm:$0xff] %v4125_v31  ;;  %4294 = vst.msk [vmem:[%s7494_s7 + $0x478] sm:$0xff] %vm1124_vm1, %v4126_v27  ;;  %v4103_v37 = vadd.f32 %v3866_v47, %v3515_v38  ;;  %v4104_v57 = vadd.f32 %v3866_v47, %v3516_v56 }
 0x42d   : > { %v3931_v0 = vpop.permute.xlu0 %3930 }
 0x42e   : > { %4271 = vst [vmem:[%s7494_s7 + $0x3c0] sm:$0xff] %v4103_v37  ;;  %4272 = vst.msk [vmem:[%s7494_s7 + $0x3c8] sm:$0xff] %vm1124_vm1, %v4104_v57  ;;  %v4129_v22 = vadd.f32 %v3931_v0, %v8116_v33  ;;  %v4130_v58 = vadd.f32 %v3931_v0, %v8119_v8 }
 0x42f   : > { %v3876_v6 = vpop.permute.xlu1 %3875 }
 0x430   : > { %4297 = vst [vmem:[%s7494_s7 + $0x490] sm:$0xff] %v4129_v22  ;;  %4298 = vst.msk [vmem:[%s7494_s7 + $0x498] sm:$0xff] %vm1124_vm1, %v4130_v58  ;;  %v4107_v28 = vadd.f32 %v3876_v6, %v3519_v60  ;;  %v4108_v17 = vadd.f32 %v3876_v6, %v3520_v42 }
 0x431   : > { %v3941_v23 = vpop.permute.xlu0 %3940 }
 0x432   : > { %4275 = vst [vmem:[%s7494_s7 + $0x3e0] sm:$0xff] %v4107_v28  ;;  %4276 = vst.msk [vmem:[%s7494_s7 + $0x3e8] sm:$0xff] %vm1124_vm1, %v4108_v17  ;;  %v4133_v33 = vadd.f32 %v3941_v23, %v8156_v49  ;;  %v4134_v8 = vadd.f32 %v3941_v23, %v8159_v52 }
 0x433   : > { %v3886_v63 = vpop.permute.xlu1 %3885 }
 0x434   : > { %4301 = vst [vmem:[%s7494_s7 + $0x4b0] sm:$0xff] %v4133_v33  ;;  %4302 = vst.msk [vmem:[%s7494_s7 + $0x4b8] sm:$0xff] %vm1124_vm1, %v4134_v8  ;;  %v4111_v46 = vadd.f32 %v3886_v63, %v3523_v54  ;;  %v4112_v41 = vadd.f32 %v3886_v63, %v3524_v39 }
 0x435   : > { %v3951_v62 = vpop.permute.xlu0 %3950 }
 0x436   : > { %4279 = vst [vmem:[%s7494_s7 + $0x400] sm:$0xff] %v4111_v46  ;;  %4280 = vst.msk [vmem:[%s7494_s7 + $0x408] sm:$0xff] %vm1124_vm1, %v4112_v41  ;;  %v4137_v11 = vadd.f32 %v3951_v62, %v8190_v53  ;;  %v4138_v49 = vadd.f32 %v3951_v62, %v8193_v7 }
 0x437   : > { %v3896_v50 = vpop.permute.xlu1 %3895 }
 0x438   : > { %4305 = vst [vmem:[%s7494_s7 + $0x4d0] sm:$0xff] %v4137_v11  ;;  %4306 = vst.msk [vmem:[%s7494_s7 + $0x4d8] sm:$0xff] %vm1124_vm1, %v4138_v49  ;;  %v4115_v52 = vadd.f32 %v3896_v50, %v8065_v45  ;;  %v4116_v44 = vadd.f32 %v3896_v50, %v8068_v61 }
 0x439   : > { %v3961_v21 = vpop.permute.xlu0 %3960 }
 0x43a   : > { %4283 = vst [vmem:[%s7494_s7 + $0x420] sm:$0xff] %v4115_v52  ;;  %4284 = vst.msk [vmem:[%s7494_s7 + $0x428] sm:$0xff] %vm1124_vm1, %v4116_v44  ;;  %v4141_v53 = vadd.f32 %v3961_v21, %v8221_v12  ;;  %v4142_v7 = vadd.f32 %v3961_v21, %v8224_v36 }
 0x43b   : > { %v3906_v34 = vpop.permute.xlu1 %3905 }
 0x43c   : > { %4309 = vst [vmem:[%s7494_s7 + $0x4f0] sm:$0xff] %v4141_v53  ;;  %4310 = vst.msk [vmem:[%s7494_s7 + $0x4f8] sm:$0xff] %vm1124_vm1, %v4142_v7  ;;  %v4119_v45 = vadd.f32 %v3906_v34, %v8105_v20  ;;  %v4120_v61 = vadd.f32 %v3906_v34, %v8108_v29 }
 0x43d   : > { %v3971_v38 = vpop.permute.xlu0 %3970 }
 0x43e   : > { %4287 = vst [vmem:[%s7494_s7 + $0x440] sm:$0xff] %v4119_v45  ;;  %4288 = vst.msk [vmem:[%s7494_s7 + $0x448] sm:$0xff] %vm1124_vm1, %v4120_v61  ;;  %v4145_v12 = vadd.f32 %v3971_v38, %v8231_v10  ;;  %v4146_v36 = vadd.f32 %v3971_v38, %v8234_v40 }
 0x43f   : > { %v3916_v15 = vpop.permute.xlu1 %3915 }
 0x440   : > { %4313 = vst [vmem:[%s7494_s7 + $0x510] sm:$0xff] %v4145_v12  ;;  %4314 = vst.msk [vmem:[%s7494_s7 + $0x518] sm:$0xff] %vm1124_vm1, %v4146_v36  ;;  %v4123_v20 = vadd.f32 %v3916_v15, %v8145_v3  ;;  %v4124_v29 = vadd.f32 %v3916_v15, %v8148_v51 }
 0x441   : > { %v3981_v56 = vpop.permute.xlu0 %3980 }
 0x442   : > { %4291 = vst [vmem:[%s7494_s7 + $0x460] sm:$0xff] %v4123_v20  ;;  %4292 = vst.msk [vmem:[%s7494_s7 + $0x468] sm:$0xff] %vm1124_vm1, %v4124_v29  ;;  %v4149_v10 = vadd.f32 %v3981_v56, %v8248_v16  ;;  %v4150_v40 = vadd.f32 %v3981_v56, %v8251_v59 }
 0x443   : > { %v3926_v31 = vpop.permute.xlu1 %3925 }
 0x444   : > { %4317 = vst [vmem:[%s7494_s7 + $0x530] sm:$0xff] %v4149_v10  ;;  %4318 = vst.msk [vmem:[%s7494_s7 + $0x538] sm:$0xff] %vm1124_vm1, %v4150_v40  ;;  %v4127_v3 = vadd.f32 %v3926_v31, %v8180_v9  ;;  %v4128_v51 = vadd.f32 %v3926_v31, %v8183_v19 }
 0x446   : > { %4295 = vst [vmem:[%s7494_s7 + $0x480] sm:$0xff] %v4127_v3  ;;  %4296 = vst.msk [vmem:[%s7494_s7 + $0x488] sm:$0xff] %vm1124_vm1, %v4128_v51 }
 0x447   : > { %v3936_v27 = vpop.permute.xlu1 %3935 }
 0x448   : > { %v4131_v16 = vadd.f32 %v3936_v27, %v8211_v13  ;;  %v4132_v59 = vadd.f32 %v3936_v27, %v8214_v18 }
 0x44a   : > { %4299 = vst [vmem:[%s7494_s7 + $0x4a0] sm:$0xff] %v4131_v16  ;;  %4300 = vst.msk [vmem:[%s7494_s7 + $0x4a8] sm:$0xff] %vm1124_vm1, %v4132_v59 }
 0x44b   : > { %v3946_v47 = vpop.permute.xlu1 %3945 }
 0x44c   : > { %v4135_v9 = vadd.f32 %v3946_v47, %v8237_v5  ;;  %v4136_v19 = vadd.f32 %v3946_v47, %v8240_v25 }
 0x44e   : > { %4303 = vst [vmem:[%s7494_s7 + $0x4c0] sm:$0xff] %v4135_v9  ;;  %4304 = vst.msk [vmem:[%s7494_s7 + $0x4c8] sm:$0xff] %vm1124_vm1, %v4136_v19 }
 0x44f   : > { %v3956_v37 = vpop.permute.xlu1 %3955 }
 0x450   : > { %v4139_v13 = vadd.f32 %v3956_v37, %v8261_v30  ;;  %v4140_v18 = vadd.f32 %v3956_v37, %v8264_v55 }
 0x452   : > { %4307 = vst [vmem:[%s7494_s7 + $0x4e0] sm:$0xff] %v4139_v13  ;;  %4308 = vst.msk [vmem:[%s7494_s7 + $0x4e8] sm:$0xff] %vm1124_vm1, %v4140_v18 }
 0x453   : > { %v3966_v57 = vpop.permute.xlu1 %3965 }
 0x454   : > { %v4143_v0 = vadd.f32 %v3966_v57, %v8279_v48  ;;  %v4144_v5 = vadd.f32 %v3966_v57, %v8282_v32 }
 0x456   : > { %4311 = vst [vmem:[%s7494_s7 + $0x500] sm:$0xff] %v4143_v0  ;;  %4312 = vst.msk [vmem:[%s7494_s7 + $0x508] sm:$0xff] %vm1124_vm1, %v4144_v5 }
 0x457   : > { %v3976_v25 = vpop.permute.xlu1 %3975 }
 0x458   : > { %v4147_v1 = vadd.f32 %v3976_v25, %v8299_v4  ;;  %v4148_v26 = vadd.f32 %v3976_v25, %v8302_v14 }
 0x45a   : > { %4315 = vst [vmem:[%s7494_s7 + $0x520] sm:$0xff] %v4147_v1  ;;  %4316 = vst.msk [vmem:[%s7494_s7 + $0x528] sm:$0xff] %vm1124_vm1, %v4148_v26 }
 0x45b PF: > { %s14_s15 = sadd.s32 1, %s4649_s15  }
 0x45c   : > { %p11_p4 = scmp.ge.s32.totalorder %s14_s15, 4  }
 0x45e   :  { %13 = sbr.rel (!%p11_p4) target bundleno = 1 (0x1), region = 68 }

</bundles_post_ra>
